<compile_context>
chip_gen: v6e
topology: v6e:2x2x1
jax: 0.10.0
libtpu: 0.0.40
codegen_flags: <defaults>
</compile_context>

<pallas_src>
import jax
import jax.numpy as jnp
from jax import lax
from jax.experimental import pallas as pl
from jax.experimental.pallas import tpu as pltpu


_SQRT1_2 = 0.7071067811865476


def _erf_poly(x):
    # Abramowitz & Stegun 7.1.26, |err| <= 1.5e-7. Uses only VPU/EUP ops (abs, mul, add,
    # div, exp, select) so it lowers on every TPU generation; matches exact-erf GELU
    # (PyTorch nn.GELU default) to ~1e-7.
    p = 0.3275911
    a1, a2, a3, a4, a5 = 0.254829592, -0.284496736, 1.421413741, -1.453152027, 1.061405429
    ax = jnp.abs(x)
    t = 1.0 / (1.0 + p * ax)
    poly = ((((a5 * t + a4) * t + a3) * t + a2) * t + a1) * t
    y = 1.0 - poly * jnp.exp(-ax * ax)
    return jnp.where(x < 0.0, -y, y)


def _gelu_exact(x):
    return 0.5 * x * (1.0 + _erf_poly(x * _SQRT1_2))


def _mlp_kernel(x_ref, w1_ref, b1_ref, wdw_ref, bdw_ref, w2_ref, b2_ref,
                o_ref, hp_ref, acc_ref):
    """One grid step = (image n, hidden-channel tile c).

    x_ref  : (1, H, W, Cin)     input tile (NHWC; BN folded into fc1 weights)
    w1_ref : (Cin, TCH)         fc1 weights for this hidden tile (BN-folded)
    b1_ref : (1, TCH)           fc1 bias (BN-folded)
    wdw_ref: (3, 3, TCH)        depthwise 3x3 taps, channel-last
    bdw_ref: (1, TCH)           depthwise bias
    w2_ref : (TCH, Cout)        fc2 weights for this hidden tile
    b2_ref : (1, Cout)          fc2 bias
    o_ref  : (1, H, W, Cout)    output tile (written on the last hidden tile)
    hp_ref : (H+2, W+2, TCH)    VMEM scratch: zero-padded hidden activation
    acc_ref: (H*W, Cout)        VMEM scratch: fc2 accumulator (resident across c)
    """
    c = pl.program_id(1)
    n_c = pl.num_programs(1)
    _, H, W, Cout = o_ref.shape
    Cin = x_ref.shape[3]
    TCH = w1_ref.shape[1]

    # ---- fc1 (1x1 conv) with eval-mode BatchNorm pre-folded into (w1, b1) -> MXU matmul
    x2 = x_ref[0].reshape(H * W, Cin).astype(jnp.float32)
    h = jnp.dot(x2, w1_ref[...].astype(jnp.float32),
                preferred_element_type=jnp.float32)
    h = (h + b1_ref[0].astype(jnp.float32)).reshape(H, W, TCH)

    # ---- depthwise 3x3 conv (stride 1, pad 1): halo via padded VMEM scratch, no host pad.
    # Zero border only once per image: the interior write below never touches it, so it
    # stays valid for every hidden-channel tile of this image (safe under megacore
    # sharding because the whole c-sweep of an image runs on one core).
    @pl.when(c == 0)
    def _():
        zrow = jnp.zeros((1, W + 2, TCH), jnp.float32)
        zcol = jnp.zeros((H + 2, 1, TCH), jnp.float32)
        hp_ref[0:1, :, :] = zrow
        hp_ref[H + 1:H + 2, :, :] = zrow
        hp_ref[:, 0:1, :] = zcol
        hp_ref[:, W + 1:W + 2, :] = zcol

    hp_ref[1:H + 1, 1:W + 1, :] = h

    taps = wdw_ref[...].astype(jnp.float32)                         # (3, 3, TCH)
    # bias-initialized accumulator (saves one full-tile VPU add)
    acc_dw = jnp.broadcast_to(bdw_ref[0].astype(jnp.float32), (H, W, TCH))
    # hoist the three W (sublane) shifts; reuse each across the three H offsets
    for dx in range(3):
        hx = hp_ref[:, dx:dx + W, :]                                # (H+2, W, TCH)
        for dy in range(3):
            acc_dw = acc_dw + hx[dy:dy + H] * taps[dy, dx]

    # ---- GELU (exact-erf, matches nn.GELU()); dropout(p=0.0) == identity
    act2 = _gelu_exact(acc_dw).reshape(H * W, TCH)

    # ---- fc2 (1x1 conv): accumulate over hidden-channel tiles in f32 scratch
    partial = jnp.dot(act2, w2_ref[...].astype(jnp.float32),
                      preferred_element_type=jnp.float32)

    @pl.when(c == 0)
    def _():
        acc_ref[...] = jnp.broadcast_to(b2_ref[0].astype(jnp.float32), (H * W, Cout))

    @pl.when(c < n_c - 1)
    def _():
        acc_ref[...] += partial

    @pl.when(c == n_c - 1)
    def _():
        # fuse the last partial with the lane-dense output store (skip one acc round trip)
        o_ref[0] = (acc_ref[...] + partial).reshape(H, W, Cout).astype(o_ref.dtype)


def mlp_forward_nhwc(x, params, *, tile_ch=128):
    """Fused Mlp forward. x: (N, H, W, Cin) NHWC. Returns (N, H, W, Cout)."""
    gamma, beta = params["bn_gamma"], params["bn_beta"]
    mean, var, eps = params["bn_mean"], params["bn_var"], params["bn_eps"]
    w1, b1 = params["w1"], params["b1"]            # (CH, Cin), (CH,)
    wdw, bdw = params["wdw"], params["bdw"]        # (CH, 1, 3, 3), (CH,)
    w2, b2 = params["w2"], params["b2"]            # (Cout, CH), (Cout,)

    N, H, W, Cin = x.shape
    CH = w1.shape[0]
    Cout = w2.shape[0]
    TCH = min(tile_ch, CH)
    assert CH % TCH == 0, "hidden_features must be divisible by the channel tile"
    n_ct = CH // TCH

    # Fold eval-mode BatchNorm into fc1 (removes a separate full HBM pass over x).
    scale = gamma / jnp.sqrt(var + eps)                      # (Cin,)
    shift = beta - mean * scale                              # (Cin,)
    w1_mat = w1.T                                            # (Cin, CH)
    w1_eff = (w1_mat * scale[:, None]).astype(jnp.float32)   # (Cin, CH)
    b1_eff = (shift @ w1_mat + b1).reshape(1, CH).astype(jnp.float32)

    wdw_33c = jnp.transpose(wdw[:, 0, :, :], (1, 2, 0)).astype(jnp.float32)   # (3, 3, CH)
    bdw_r = bdw.reshape(1, CH).astype(jnp.float32)
    w2_mat = w2.T.astype(jnp.float32)                        # (CH, Cout)
    b2_r = b2.reshape(1, Cout).astype(jnp.float32)

    return pl.pallas_call(
        _mlp_kernel,
        out_shape=jax.ShapeDtypeStruct((N, H, W, Cout), x.dtype),
        grid_spec=pltpu.PrefetchScalarGridSpec(
            num_scalar_prefetch=0,
            grid=(N, n_ct),                                  # reduction (hidden tiles) last
            in_specs=[
                pl.BlockSpec((1, H, W, Cin), lambda n, c: (n, 0, 0, 0)),
                pl.BlockSpec((Cin, TCH), lambda n, c: (0, c)),
                pl.BlockSpec((1, TCH), lambda n, c: (0, c)),
                pl.BlockSpec((3, 3, TCH), lambda n, c: (0, 0, c)),
                pl.BlockSpec((1, TCH), lambda n, c: (0, c)),
                pl.BlockSpec((TCH, Cout), lambda n, c: (c, 0)),
                pl.BlockSpec((1, Cout), lambda n, c: (0, 0)),
            ],
            out_specs=pl.BlockSpec((1, H, W, Cout), lambda n, c: (n, 0, 0, 0)),
            scratch_shapes=[
                pltpu.VMEM((H + 2, W + 2, TCH), jnp.float32),   # padded hidden tile
                pltpu.VMEM((H * W, Cout), jnp.float32),         # fc2 accumulator
            ],
        ),
        compiler_params=pltpu.CompilerParams(
            dimension_semantics=("parallel", "arbitrary"),
            vmem_limit_bytes=48 * 1024 * 1024,
        ),
    )(x, w1_eff, b1_eff, wdw_33c, bdw_r, w2_mat, b2_r)


def mlp_forward_nchw(x_nchw, params, *, tile_ch=128):
    """PyTorch-layout convenience wrapper.

    Production callers should keep activations in NHWC: each boundary transpose is an extra
    full HBM pass on a memory-bound op.
    """
    x = jnp.transpose(x_nchw, (0, 2, 3, 1))
    y = mlp_forward_nhwc(x, params, tile_ch=tile_ch)
    return jnp.transpose(y, (0, 3, 1, 2))


def _mlp_reference_nhwc(x, params):
    """Pure-JAX reference (eval-mode BN, exact-erf GELU, dropout=identity)."""
    gamma, beta = params["bn_gamma"], params["bn_beta"]
    mean, var, eps = params["bn_mean"], params["bn_var"], params["bn_eps"]
    w1, b1 = params["w1"], params["b1"]
    wdw, bdw = params["wdw"], params["bdw"]
    w2, b2 = params["w2"], params["b2"]
    CH = w1.shape[0]

    scale = gamma / jnp.sqrt(var + eps)
    xn = x * scale + (beta - mean * scale)
    h = jnp.einsum("nhwc,dc->nhwd", xn, w1) + b1
    kd = jnp.transpose(wdw, (2, 3, 1, 0))                    # (3, 3, 1, CH)
    h = lax.conv_general_dilated(
        h, kd, window_strides=(1, 1), padding=((1, 1), (1, 1)),
        dimension_numbers=("NHWC", "HWIO", "NHWC"),
        feature_group_count=CH,
    ) + bdw
    a = jax.nn.gelu(h, approximate=False)
    return jnp.einsum("nhwd,od->nhwo", a, w2) + b2


if __name__ == "__main__":
    key = jax.random.PRNGKey(0)
    ks = jax.random.split(key, 12)

    # Small but lane-aligned shapes (channel dims multiples of 128 so every BlockSpec lane
    # dim is aligned); real module default is in=out=768, hidden=3072.
    N, H, W = 2, 16, 16
    Cin = 128          # in_features (= out_features, Mlp default)
    CH = 256           # hidden_features -> 2 hidden-channel tiles of 128
    Cout = Cin

    x = jax.random.normal(ks[0], (N, H, W, Cin), jnp.float32)
    params = dict(
        bn_gamma=1.0 + 0.1 * jax.random.normal(ks[1], (Cin,), jnp.float32),
        bn_beta=0.1 * jax.random.normal(ks[2], (Cin,), jnp.float32),
        bn_mean=0.1 * jax.random.normal(ks[3], (Cin,), jnp.float32),
        bn_var=jax.random.uniform(ks[4], (Cin,), jnp.float32, 0.5, 1.5),
        bn_eps=1e-5,
        w1=0.1 * jax.random.normal(ks[5], (CH, Cin), jnp.float32),
        b1=0.1 * jax.random.normal(ks[6], (CH,), jnp.float32),
        wdw=0.3 * jax.random.normal(ks[7], (CH, 1, 3, 3), jnp.float32),
        bdw=0.1 * jax.random.normal(ks[8], (CH,), jnp.float32),
        w2=0.1 * jax.random.normal(ks[9], (Cout, CH), jnp.float32),
        b2=0.1 * jax.random.normal(ks[10], (Cout,), jnp.float32),
    )

    out = mlp_forward_nhwc(x, params, tile_ch=128)
    out = jax.block_until_ready(out)

    ref = _mlp_reference_nhwc(x, params)
    assert out.shape == (N, H, W, Cout)
    max_err = jnp.max(jnp.abs(out - ref))
    assert jnp.allclose(out, ref, atol=3e-2, rtol=3e-2), f"mismatch vs reference, max abs err {max_err}"

    # PyTorch-layout (NCHW) wrapper sanity check.
    out_nchw = mlp_forward_nchw(jnp.transpose(x, (0, 3, 1, 2)), params)
    out_nchw = jax.block_until_ready(out_nchw)
    assert jnp.allclose(jnp.transpose(out_nchw, (0, 2, 3, 1)), ref, atol=3e-2, rtol=3e-2)

    print("KERNEL_OK")
</pallas_src>

<mosaic_0001>
module attributes {stable_mosaic.version = 11 : i64} {
  func.func @_mlp_kernel(%arg0: i32, %arg1: i32, %arg2: memref<1x16x16x128xf32, #tpu.memory_space<vmem>>, %arg3: memref<128x128xf32, #tpu.memory_space<vmem>>, %arg4: memref<1x128xf32, #tpu.memory_space<vmem>>, %arg5: memref<3x3x128xf32, #tpu.memory_space<vmem>>, %arg6: memref<1x128xf32, #tpu.memory_space<vmem>>, %arg7: memref<128x128xf32, #tpu.memory_space<vmem>>, %arg8: memref<1x128xf32, #tpu.memory_space<vmem>>, %arg9: memref<1x16x16x128xf32, #tpu.memory_space<vmem>>, %arg10: memref<18x18x128xf32, #tpu.memory_space<vmem>>, %arg11: memref<256x128xf32, #tpu.memory_space<vmem>>) attributes {dimension_semantics = [#tpu.dimension_semantics<parallel>, #tpu.dimension_semantics<arbitrary>], iteration_bounds = array<i64: 2, 2>, scalar_prefetch = 0 : i64, scratch_operands = 2 : i64, tpu.core_type = #tpu.core_type<tc>, window_params = [{transform_indices = @transform_0, window_bounds = array<i64: 1, 16, 16, 128>}, {transform_indices = @transform_1, window_bounds = array<i64: 128, 128>}, {transform_indices = @transform_2, window_bounds = array<i64: 1, 128>}, {transform_indices = @transform_3, window_bounds = array<i64: 3, 3, 128>}, {transform_indices = @transform_4, window_bounds = array<i64: 1, 128>}, {transform_indices = @transform_5, window_bounds = array<i64: 128, 128>}, {pipeline_mode = #tpu.pipeline_mode<synchronous>, transform_indices = @transform_6, window_bounds = array<i64: 1, 128>}, {transform_indices = @transform_7, window_bounds = array<i64: 1, 16, 16, 128>}]} {
    %c0 = arith.constant 0 : index
    %c0_0 = arith.constant 0 : index
    %c0_1 = arith.constant 0 : index
    %c0_2 = arith.constant 0 : index
    %0 = vector.load %arg2[%c0, %c0_0, %c0_1, %c0_2] : memref<1x16x16x128xf32, #tpu.memory_space<vmem>>, vector<1x16x16x128xf32>
    %1 = vector.shape_cast %0 : vector<1x16x16x128xf32> to vector<16x16x128xf32>
    %2 = vector.shape_cast %1 : vector<16x16x128xf32> to vector<256x128xf32>
    %c0_3 = arith.constant 0 : index
    %c0_4 = arith.constant 0 : index
    %3 = vector.load %arg3[%c0_3, %c0_4] : memref<128x128xf32, #tpu.memory_space<vmem>>, vector<128x128xf32>
    %cst = arith.constant dense<0.000000e+00> : vector<256x128xf32>
    %4 = tpu.matmul %2, %3, %cst {dimension_numbers = #tpu.dot_dimension_numbers<[1], [0], [0], [1], [0, 0, 1, 1], [], []>} : vector<256x128xf32>, vector<128x128xf32>, vector<256x128xf32> -> vector<256x128xf32>
    %c0_5 = arith.constant 0 : index
    %c0_6 = arith.constant 0 : index
    %5 = vector.load %arg4[%c0_5, %c0_6] : memref<1x128xf32, #tpu.memory_space<vmem>>, vector<1x128xf32>
    %6 = vector.shape_cast %5 : vector<1x128xf32> to vector<128xf32>
    %7 = vector.shape_cast %6 : vector<128xf32> to vector<1x128xf32>
    %8 = vector.broadcast %7 : vector<1x128xf32> to vector<256x128xf32>
    %9 = arith.addf %4, %8 : vector<256x128xf32>
    %10 = vector.shape_cast %9 : vector<256x128xf32> to vector<16x16x128xf32>
    %c0_i32 = arith.constant 0 : i32
    %11 = arith.cmpi eq, %arg1, %c0_i32 : i32
    %12 = arith.extui %11 : i1 to i32
    %c0_i32_7 = arith.constant 0 : i32
    %13 = arith.cmpi ne, %12, %c0_i32_7 : i32
    scf.if %13 {
      %cst_46 = arith.constant 0.000000e+00 : f32
      %138 = vector.broadcast %cst_46 : f32 to vector<1x18x128xf32>
      %cst_47 = arith.constant 0.000000e+00 : f32
      %139 = vector.broadcast %cst_47 : f32 to vector<18x1x128xf32>
      %c0_48 = arith.constant 0 : index
      %c0_49 = arith.constant 0 : index
      %c0_50 = arith.constant 0 : index
      %140 = vector.load %arg10[%c0_48, %c0_49, %c0_50] : memref<18x18x128xf32, #tpu.memory_space<vmem>>, vector<1x18x128xf32>
      tpu.vector_store %arg10[%c0_48, %c0_49, %c0_50], %138 {strides = array<i32>} : memref<18x18x128xf32, #tpu.memory_space<vmem>>, vector<1x18x128xf32>,
      %c17 = arith.constant 17 : index
      %c0_51 = arith.constant 0 : index
      %c0_52 = arith.constant 0 : index
      %141 = vector.load %arg10[%c17, %c0_51, %c0_52] : memref<18x18x128xf32, #tpu.memory_space<vmem>>, vector<1x18x128xf32>
      tpu.vector_store %arg10[%c17, %c0_51, %c0_52], %138 {strides = array<i32>} : memref<18x18x128xf32, #tpu.memory_space<vmem>>, vector<1x18x128xf32>,
      %c0_53 = arith.constant 0 : index
      %c0_54 = arith.constant 0 : index
      %c0_55 = arith.constant 0 : index
      %142 = vector.load %arg10[%c0_53, %c0_54, %c0_55] : memref<18x18x128xf32, #tpu.memory_space<vmem>>, vector<18x1x128xf32>
      tpu.vector_store %arg10[%c0_53, %c0_54, %c0_55], %139 {strides = array<i32>} : memref<18x18x128xf32, #tpu.memory_space<vmem>>, vector<18x1x128xf32>,
      %c0_56 = arith.constant 0 : index
      %c17_57 = arith.constant 17 : index
      %c0_58 = arith.constant 0 : index
      %143 = vector.load %arg10[%c0_56, %c17_57, %c0_58] : memref<18x18x128xf32, #tpu.memory_space<vmem>>, vector<18x1x128xf32>
      tpu.vector_store %arg10[%c0_56, %c17_57, %c0_58], %139 {strides = array<i32>} : memref<18x18x128xf32, #tpu.memory_space<vmem>>, vector<18x1x128xf32>,
    } else {
    }
    %c1 = arith.constant 1 : index
    %c1_8 = arith.constant 1 : index
    %c0_9 = arith.constant 0 : index
    %14 = vector.load %arg10[%c1, %c1_8, %c0_9] : memref<18x18x128xf32, #tpu.memory_space<vmem>>, vector<16x16x128xf32>
    tpu.vector_store %arg10[%c1, %c1_8, %c0_9], %10 {strides = array<i32>} : memref<18x18x128xf32, #tpu.memory_space<vmem>>, vector<16x16x128xf32>,
    %c0_10 = arith.constant 0 : index
    %c0_11 = arith.constant 0 : index
    %c0_12 = arith.constant 0 : index
    %15 = vector.load %arg5[%c0_10, %c0_11, %c0_12] : memref<3x3x128xf32, #tpu.memory_space<vmem>>, vector<3x3x128xf32>
    %c0_13 = arith.constant 0 : index
    %c0_14 = arith.constant 0 : index
    %16 = vector.load %arg6[%c0_13, %c0_14] : memref<1x128xf32, #tpu.memory_space<vmem>>, vector<1x128xf32>
    %17 = vector.shape_cast %16 : vector<1x128xf32> to vector<128xf32>
    %18 = vector.shape_cast %17 : vector<128xf32> to vector<1x1x128xf32>
    %19 = vector.broadcast %18 : vector<1x1x128xf32> to vector<16x16x128xf32>
    %c0_15 = arith.constant 0 : index
    %c0_16 = arith.constant 0 : index
    %c0_17 = arith.constant 0 : index
    %20 = vector.load %arg10[%c0_15, %c0_16, %c0_17] : memref<18x18x128xf32, #tpu.memory_space<vmem>>, vector<18x16x128xf32>
    %21 = vector.extract_strided_slice %20 {offsets = [0, 0, 0], sizes = [16, 16, 128], strides = [1, 1, 1]} : vector<18x16x128xf32> to vector<16x16x128xf32>
    %22 = vector.extract_strided_slice %15 {offsets = [0, 0, 0], sizes = [1, 1, 128], strides = [1, 1, 1]} : vector<3x3x128xf32> to vector<1x1x128xf32>
    %23 = vector.shape_cast %22 : vector<1x1x128xf32> to vector<128xf32>
    %24 = vector.shape_cast %23 : vector<128xf32> to vector<1x1x128xf32>
    %25 = vector.broadcast %24 : vector<1x1x128xf32> to vector<16x16x128xf32>
    %26 = arith.mulf %21, %25 : vector<16x16x128xf32>
    %27 = arith.addf %19, %26 : vector<16x16x128xf32>
    %28 = vector.extract_strided_slice %20 {offsets = [1, 0, 0], sizes = [16, 16, 128], strides = [1, 1, 1]} : vector<18x16x128xf32> to vector<16x16x128xf32>
    %29 = vector.extract_strided_slice %15 {offsets = [1, 0, 0], sizes = [1, 1, 128], strides = [1, 1, 1]} : vector<3x3x128xf32> to vector<1x1x128xf32>
    %30 = vector.shape_cast %29 : vector<1x1x128xf32> to vector<128xf32>
    %31 = vector.shape_cast %30 : vector<128xf32> to vector<1x1x128xf32>
    %32 = vector.broadcast %31 : vector<1x1x128xf32> to vector<16x16x128xf32>
    %33 = arith.mulf %28, %32 : vector<16x16x128xf32>
    %34 = arith.addf %27, %33 : vector<16x16x128xf32>
    %35 = vector.extract_strided_slice %20 {offsets = [2, 0, 0], sizes = [16, 16, 128], strides = [1, 1, 1]} : vector<18x16x128xf32> to vector<16x16x128xf32>
    %36 = vector.extract_strided_slice %15 {offsets = [2, 0, 0], sizes = [1, 1, 128], strides = [1, 1, 1]} : vector<3x3x128xf32> to vector<1x1x128xf32>
    %37 = vector.shape_cast %36 : vector<1x1x128xf32> to vector<128xf32>
    %38 = vector.shape_cast %37 : vector<128xf32> to vector<1x1x128xf32>
    %39 = vector.broadcast %38 : vector<1x1x128xf32> to vector<16x16x128xf32>
    %40 = arith.mulf %35, %39 : vector<16x16x128xf32>
    %41 = arith.addf %34, %40 : vector<16x16x128xf32>
    %c0_18 = arith.constant 0 : index
    %c1_19 = arith.constant 1 : index
    %c0_20 = arith.constant 0 : index
    %42 = vector.load %arg10[%c0_18, %c1_19, %c0_20] : memref<18x18x128xf32, #tpu.memory_space<vmem>>, vector<18x16x128xf32>
    %43 = vector.extract_strided_slice %42 {offsets = [0, 0, 0], sizes = [16, 16, 128], strides = [1, 1, 1]} : vector<18x16x128xf32> to vector<16x16x128xf32>
    %44 = vector.extract_strided_slice %15 {offsets = [0, 1, 0], sizes = [1, 1, 128], strides = [1, 1, 1]} : vector<3x3x128xf32> to vector<1x1x128xf32>
    %45 = vector.shape_cast %44 : vector<1x1x128xf32> to vector<128xf32>
    %46 = vector.shape_cast %45 : vector<128xf32> to vector<1x1x128xf32>
    %47 = vector.broadcast %46 : vector<1x1x128xf32> to vector<16x16x128xf32>
    %48 = arith.mulf %43, %47 : vector<16x16x128xf32>
    %49 = arith.addf %41, %48 : vector<16x16x128xf32>
    %50 = vector.extract_strided_slice %42 {offsets = [1, 0, 0], sizes = [16, 16, 128], strides = [1, 1, 1]} : vector<18x16x128xf32> to vector<16x16x128xf32>
    %51 = vector.extract_strided_slice %15 {offsets = [1, 1, 0], sizes = [1, 1, 128], strides = [1, 1, 1]} : vector<3x3x128xf32> to vector<1x1x128xf32>
    %52 = vector.shape_cast %51 : vector<1x1x128xf32> to vector<128xf32>
    %53 = vector.shape_cast %52 : vector<128xf32> to vector<1x1x128xf32>
    %54 = vector.broadcast %53 : vector<1x1x128xf32> to vector<16x16x128xf32>
    %55 = arith.mulf %50, %54 : vector<16x16x128xf32>
    %56 = arith.addf %49, %55 : vector<16x16x128xf32>
    %57 = vector.extract_strided_slice %42 {offsets = [2, 0, 0], sizes = [16, 16, 128], strides = [1, 1, 1]} : vector<18x16x128xf32> to vector<16x16x128xf32>
    %58 = vector.extract_strided_slice %15 {offsets = [2, 1, 0], sizes = [1, 1, 128], strides = [1, 1, 1]} : vector<3x3x128xf32> to vector<1x1x128xf32>
    %59 = vector.shape_cast %58 : vector<1x1x128xf32> to vector<128xf32>
    %60 = vector.shape_cast %59 : vector<128xf32> to vector<1x1x128xf32>
    %61 = vector.broadcast %60 : vector<1x1x128xf32> to vector<16x16x128xf32>
    %62 = arith.mulf %57, %61 : vector<16x16x128xf32>
    %63 = arith.addf %56, %62 : vector<16x16x128xf32>
    %c0_21 = arith.constant 0 : index
    %c2 = arith.constant 2 : index
    %c0_22 = arith.constant 0 : index
    %64 = vector.load %arg10[%c0_21, %c2, %c0_22] : memref<18x18x128xf32, #tpu.memory_space<vmem>>, vector<18x16x128xf32>
    %65 = vector.extract_strided_slice %64 {offsets = [0, 0, 0], sizes = [16, 16, 128], strides = [1, 1, 1]} : vector<18x16x128xf32> to vector<16x16x128xf32>
    %66 = vector.extract_strided_slice %15 {offsets = [0, 2, 0], sizes = [1, 1, 128], strides = [1, 1, 1]} : vector<3x3x128xf32> to vector<1x1x128xf32>
    %67 = vector.shape_cast %66 : vector<1x1x128xf32> to vector<128xf32>
    %68 = vector.shape_cast %67 : vector<128xf32> to vector<1x1x128xf32>
    %69 = vector.broadcast %68 : vector<1x1x128xf32> to vector<16x16x128xf32>
    %70 = arith.mulf %65, %69 : vector<16x16x128xf32>
    %71 = arith.addf %63, %70 : vector<16x16x128xf32>
    %72 = vector.extract_strided_slice %64 {offsets = [1, 0, 0], sizes = [16, 16, 128], strides = [1, 1, 1]} : vector<18x16x128xf32> to vector<16x16x128xf32>
    %73 = vector.extract_strided_slice %15 {offsets = [1, 2, 0], sizes = [1, 1, 128], strides = [1, 1, 1]} : vector<3x3x128xf32> to vector<1x1x128xf32>
    %74 = vector.shape_cast %73 : vector<1x1x128xf32> to vector<128xf32>
    %75 = vector.shape_cast %74 : vector<128xf32> to vector<1x1x128xf32>
    %76 = vector.broadcast %75 : vector<1x1x128xf32> to vector<16x16x128xf32>
    %77 = arith.mulf %72, %76 : vector<16x16x128xf32>
    %78 = arith.addf %71, %77 : vector<16x16x128xf32>
    %79 = vector.extract_strided_slice %64 {offsets = [2, 0, 0], sizes = [16, 16, 128], strides = [1, 1, 1]} : vector<18x16x128xf32> to vector<16x16x128xf32>
    %80 = vector.extract_strided_slice %15 {offsets = [2, 2, 0], sizes = [1, 1, 128], strides = [1, 1, 1]} : vector<3x3x128xf32> to vector<1x1x128xf32>
    %81 = vector.shape_cast %80 : vector<1x1x128xf32> to vector<128xf32>
    %82 = vector.shape_cast %81 : vector<128xf32> to vector<1x1x128xf32>
    %83 = vector.broadcast %82 : vector<1x1x128xf32> to vector<16x16x128xf32>
    %84 = arith.mulf %79, %83 : vector<16x16x128xf32>
    %85 = arith.addf %78, %84 : vector<16x16x128xf32>
    %cst_23 = arith.constant 5.000000e-01 : f32
    %86 = vector.broadcast %cst_23 : f32 to vector<16x16x128xf32>
    %87 = arith.mulf %86, %85 : vector<16x16x128xf32>
    %cst_24 = arith.constant 0.707106769 : f32
    %88 = vector.broadcast %cst_24 : f32 to vector<16x16x128xf32>
    %89 = arith.mulf %85, %88 : vector<16x16x128xf32>
    %90 = math.absf %89 : vector<16x16x128xf32>
    %cst_25 = arith.constant 0.327591091 : f32
    %91 = vector.broadcast %cst_25 : f32 to vector<16x16x128xf32>
    %92 = arith.mulf %91, %90 : vector<16x16x128xf32>
    %cst_26 = arith.constant 1.000000e+00 : f32
    %93 = vector.broadcast %cst_26 : f32 to vector<16x16x128xf32>
    %94 = arith.addf %93, %92 : vector<16x16x128xf32>
    %cst_27 = arith.constant 1.000000e+00 : f32
    %95 = vector.broadcast %cst_27 : f32 to vector<16x16x128xf32>
    %96 = arith.divf %95, %94 : vector<16x16x128xf32>
    %cst_28 = arith.constant 1.06140542 : f32
    %97 = vector.broadcast %cst_28 : f32 to vector<16x16x128xf32>
    %98 = arith.mulf %97, %96 : vector<16x16x128xf32>
    %cst_29 = arith.constant -1.45315206 : f32
    %99 = vector.broadcast %cst_29 : f32 to vector<16x16x128xf32>
    %100 = arith.addf %98, %99 : vector<16x16x128xf32>
    %101 = arith.mulf %100, %96 : vector<16x16x128xf32>
    %cst_30 = arith.constant 1.42141378 : f32
    %102 = vector.broadcast %cst_30 : f32 to vector<16x16x128xf32>
    %103 = arith.addf %101, %102 : vector<16x16x128xf32>
    %104 = arith.mulf %103, %96 : vector<16x16x128xf32>
    %cst_31 = arith.constant -0.284496725 : f32
    %105 = vector.broadcast %cst_31 : f32 to vector<16x16x128xf32>
    %106 = arith.addf %104, %105 : vector<16x16x128xf32>
    %107 = arith.mulf %106, %96 : vector<16x16x128xf32>
    %cst_32 = arith.constant 0.254829586 : f32
    %108 = vector.broadcast %cst_32 : f32 to vector<16x16x128xf32>
    %109 = arith.addf %107, %108 : vector<16x16x128xf32>
    %110 = arith.mulf %109, %96 : vector<16x16x128xf32>
    %cst_33 = arith.constant 0.000000e+00 : f32
    %111 = vector.broadcast %cst_33 : f32 to vector<16x16x128xf32>
    %112 = arith.subf %111, %90 : vector<16x16x128xf32>
    %113 = arith.mulf %112, %90 : vector<16x16x128xf32>
    %114 = math.exp %113 : vector<16x16x128xf32>
    %115 = arith.mulf %110, %114 : vector<16x16x128xf32>
    %cst_34 = arith.constant 1.000000e+00 : f32
    %116 = vector.broadcast %cst_34 : f32 to vector<16x16x128xf32>
    %117 = arith.subf %116, %115 : vector<16x16x128xf32>
    %cst_35 = arith.constant 0.000000e+00 : f32
    %118 = vector.broadcast %cst_35 : f32 to vector<16x16x128xf32>
    %119 = arith.cmpf olt, %89, %118 : vector<16x16x128xf32>
    %cst_36 = arith.constant 0.000000e+00 : f32
    %120 = vector.broadcast %cst_36 : f32 to vector<16x16x128xf32>
    %121 = arith.subf %120, %117 : vector<16x16x128xf32>
    %122 = arith.select %119, %121, %117 : vector<16x16x128xi1>, vector<16x16x128xf32>
    %cst_37 = arith.constant 1.000000e+00 : f32
    %123 = vector.broadcast %cst_37 : f32 to vector<16x16x128xf32>
    %124 = arith.addf %123, %122 : vector<16x16x128xf32>
    %125 = arith.mulf %87, %124 : vector<16x16x128xf32>
    %126 = vector.shape_cast %125 : vector<16x16x128xf32> to vector<256x128xf32>
    %c0_38 = arith.constant 0 : index
    %c0_39 = arith.constant 0 : index
    %127 = vector.load %arg7[%c0_38, %c0_39] : memref<128x128xf32, #tpu.memory_space<vmem>>, vector<128x128xf32>
    %cst_40 = arith.constant dense<0.000000e+00> : vector<256x128xf32>
    %128 = tpu.matmul %126, %127, %cst_40 {dimension_numbers = #tpu.dot_dimension_numbers<[1], [0], [0], [1], [0, 0, 1, 1], [], []>} : vector<256x128xf32>, vector<128x128xf32>, vector<256x128xf32> -> vector<256x128xf32>
    %c0_i32_41 = arith.constant 0 : i32
    %129 = arith.cmpi eq, %arg1, %c0_i32_41 : i32
    %130 = arith.extui %129 : i1 to i32
    %c0_i32_42 = arith.constant 0 : i32
    %131 = arith.cmpi ne, %130, %c0_i32_42 : i32
    scf.if %131 {
      %c0_46 = arith.constant 0 : index
      %c0_47 = arith.constant 0 : index
      %138 = vector.load %arg8[%c0_46, %c0_47] : memref<1x128xf32, #tpu.memory_space<vmem>>, vector<1x128xf32>
      %139 = vector.shape_cast %138 : vector<1x128xf32> to vector<128xf32>
      %140 = vector.shape_cast %139 : vector<128xf32> to vector<1x128xf32>
      %141 = vector.broadcast %140 : vector<1x128xf32> to vector<256x128xf32>
      %c0_48 = arith.constant 0 : index
      %c0_49 = arith.constant 0 : index
      %142 = vector.load %arg11[%c0_48, %c0_49] : memref<256x128xf32, #tpu.memory_space<vmem>>, vector<256x128xf32>
      tpu.vector_store %arg11[%c0_48, %c0_49], %141 {strides = array<i32>} : memref<256x128xf32, #tpu.memory_space<vmem>>, vector<256x128xf32>,
    } else {
    }
    %c1_i32 = arith.constant 1 : i32
    %132 = arith.cmpi slt, %arg1, %c1_i32 : i32
    %133 = arith.extui %132 : i1 to i32
    %c0_i32_43 = arith.constant 0 : i32
    %134 = arith.cmpi ne, %133, %c0_i32_43 : i32
    scf.if %134 {
      %c0_46 = arith.constant 0 : index
      %c0_47 = arith.constant 0 : index
      %138 = vector.load %arg11[%c0_46, %c0_47] : memref<256x128xf32, #tpu.memory_space<vmem>>, vector<256x128xf32>
      %139 = arith.addf %138, %128 : vector<256x128xf32>
      %c0_48 = arith.constant 0 : index
      %c0_49 = arith.constant 0 : index
      %140 = vector.load %arg11[%c0_48, %c0_49] : memref<256x128xf32, #tpu.memory_space<vmem>>, vector<256x128xf32>
      tpu.vector_store %arg11[%c0_48, %c0_49], %139 {strides = array<i32>} : memref<256x128xf32, #tpu.memory_space<vmem>>, vector<256x128xf32>,
    } else {
    }
    %c1_i32_44 = arith.constant 1 : i32
    %135 = arith.cmpi eq, %arg1, %c1_i32_44 : i32
    %136 = arith.extui %135 : i1 to i32
    %c0_i32_45 = arith.constant 0 : i32
    %137 = arith.cmpi ne, %136, %c0_i32_45 : i32
    scf.if %137 {
      %c0_46 = arith.constant 0 : index
      %c0_47 = arith.constant 0 : index
      %138 = vector.load %arg11[%c0_46, %c0_47] : memref<256x128xf32, #tpu.memory_space<vmem>>, vector<256x128xf32>
      %139 = arith.addf %138, %128 : vector<256x128xf32>
      %140 = vector.shape_cast %139 : vector<256x128xf32> to vector<16x16x128xf32>
      %c0_48 = arith.constant 0 : index
      %c0_49 = arith.constant 0 : index
      %c0_50 = arith.constant 0 : index
      %c0_51 = arith.constant 0 : index
      %141 = vector.load %arg9[%c0_48, %c0_49, %c0_50, %c0_51] : memref<1x16x16x128xf32, #tpu.memory_space<vmem>>, vector<1x16x16x128xf32>
      %142 = vector.shape_cast %141 : vector<1x16x16x128xf32> to vector<16x16x128xf32>
      %143 = vector.shape_cast %140 : vector<16x16x128xf32> to vector<1x16x16x128xf32>
      tpu.vector_store %arg9[%c0_48, %c0_49, %c0_50, %c0_51], %143 {strides = array<i32>} : memref<1x16x16x128xf32, #tpu.memory_space<vmem>>, vector<1x16x16x128xf32>,
    } else {
    }
    return
  }
  func.func @transform_0(%arg0: i32, %arg1: i32) -> (i32, i32, i32, i32) {
    %c0_i32 = arith.constant 0 : i32
    %c0_i32_0 = arith.constant 0 : i32
    %c0_i32_1 = arith.constant 0 : i32
    %c0_i32_2 = arith.constant 0 : i32
    return %arg0, %c0_i32, %c0_i32_0, %c0_i32_1 : i32, i32, i32, i32
  }
  func.func @transform_1(%arg0: i32, %arg1: i32) -> (i32, i32) {
    %c0_i32 = arith.constant 0 : i32
    %c0_i32_0 = arith.constant 0 : i32
    return %c0_i32, %arg1 : i32, i32
  }
  func.func @transform_2(%arg0: i32, %arg1: i32) -> (i32, i32) {
    %c0_i32 = arith.constant 0 : i32
    %c0_i32_0 = arith.constant 0 : i32
    return %c0_i32, %arg1 : i32, i32
  }
  func.func @transform_3(%arg0: i32, %arg1: i32) -> (i32, i32, i32) {
    %c0_i32 = arith.constant 0 : i32
    %c0_i32_0 = arith.constant 0 : i32
    %c0_i32_1 = arith.constant 0 : i32
    return %c0_i32, %c0_i32_0, %arg1 : i32, i32, i32
  }
  func.func @transform_4(%arg0: i32, %arg1: i32) -> (i32, i32) {
    %c0_i32 = arith.constant 0 : i32
    %c0_i32_0 = arith.constant 0 : i32
    return %c0_i32, %arg1 : i32, i32
  }
  func.func @transform_5(%arg0: i32, %arg1: i32) -> (i32, i32) {
    %c0_i32 = arith.constant 0 : i32
    %c0_i32_0 = arith.constant 0 : i32
    return %arg1, %c0_i32 : i32, i32
  }
  func.func @transform_6(%arg0: i32, %arg1: i32) -> (i32, i32) {
    %c0_i32 = arith.constant 0 : i32
    %c0_i32_0 = arith.constant 0 : i32
    %c0_i32_1 = arith.constant 0 : i32
    return %c0_i32, %c0_i32_0 : i32, i32
  }
  func.func @transform_7(%arg0: i32, %arg1: i32) -> (i32, i32, i32, i32) {
    %c0_i32 = arith.constant 0 : i32
    %c0_i32_0 = arith.constant 0 : i32
    %c0_i32_1 = arith.constant 0 : i32
    %c0_i32_2 = arith.constant 0 : i32
    return %arg0, %c0_i32, %c0_i32_0, %c0_i32_1 : i32, i32, i32, i32
  }
}

</mosaic_0001>

<bundles_post_ra>
// kernel: tpu_custom_call.1
= control target key start
LH: loop header
LB: loop body
LE: loop exit
PB: predicated region body
PF: predicated region fallthrough
CT: control target
= control target key end

     0   :  { %s5949_s0 = inlined_call_operand.hbm [shape: f32[2,16,16,128], index: 0, kind: input, shape index: {}]   ;;  %s5950_s1 = inlined_call_operand.hbm [shape: f32[128,256], index: 1, kind: input, shape index: {}]   ;;  %s5951_s2 = inlined_call_operand.vmem [shape: f32[1,256], index: 2, kind: input, shape index: {}]   ;;  %s5952_s3 = inlined_call_operand.hbm [shape: f32[3,3,256], index: 3, kind: input, shape index: {}]   ;;  %s5953_s4 = inlined_call_operand.vmem [shape: f32[1,256], index: 4, kind: input, shape index: {}]   ;;  %s5954_s5 = inlined_call_operand.hbm [shape: f32[256,128], index: 5, kind: input, shape index: {}]   ;;  %s5955_s6 = inlined_call_operand.vmem [shape: f32[1,128], index: 6, kind: input, shape index: {}]   ;;  %s5956_s7 = inlined_call_operand.hbm [shape: f32[2,16,16,128], index: 7, kind: output, shape index: {}]  }
   0x1   :  { %5984 = sst [smem:[#allocation35_spill]] %s5949_s0 }
   0x2   :  { %5985 = sst [smem:[#allocation36_spill]] %s5950_s1 }
   0x3   :  { %5986 = sst [smem:[#allocation37_spill]] %s5951_s2 }
   0x4   :  { %5987 = sst [smem:[#allocation38_spill]] %s5953_s4 }
   0x5   :  { %5988 = sst [smem:[#allocation39_spill]] %s5955_s6 }
   0x6   :  { %5989 = sst [smem:[#allocation40_spill]] %s5956_s7 }
   0x7   :  { %12 = vsyncpa [#allocation5], 0 }
   0x8   :  { %14 = vsyncpa [#allocation5 + $0x1], 0 }
   0x9   :  { %15 = vsyncpa [#allocation8], 0 }
   0xa   :  { %17 = vsyncpa [#allocation8 + $0x1], 0 }
   0xb   :  { %18 = vsyncpa [#allocation11], 0 }
   0xc   :  { %20 = vsyncpa [#allocation11 + $0x1], 0 }
   0xd   :  { %21 = vsyncpa [#allocation6], 0 }
   0xe   :  { %23 = vsyncpa [#allocation6 + $0x1], 0  ;;  %s3936_s24 = smov 0   ;;  %s3938_s25 = smov 0  }
   0xf   :  { %s3940_s26 = smov 0   ;;  %s3942_s27 = smov 0  }
  0x10   :  { %s3944_s28 = smov 0   ;;  %s3946_s29 = smov 0  }
  0x11   :  { %s3948_s30 = smov 0   ;;  %s3950_s8 = smov 0  }
  0x12   :  { %s3952_s9 = smov 0   ;;  %s3954_s10 = smov 0  }
  0x13   :  { %s3956_s11 = smov 0  }
  0x14 LB: > { %5990 = sst [smem:[#allocation17_spill]] %s3849_s26  ;;  %p56_p0 = scmp.eq.s32.totalorder %s3881_s11, 0  ;;  %s3881_s11 = sphi %s3956_s11, %s29_s11   ;;  %s3877_s10 = sphi %s3954_s10, %s6052_s10   ;;  %s3873_s9 = sphi %s3952_s9, %s6058_s9   ;;  %s3869_s8 = sphi %s3950_s8, %s6050_s8   ;;  %s3865_s30 = sphi %s3948_s30, %s6057_s30   ;;  %s3861_s29 = sphi %s3946_s29, %s6049_s29   ;;  %s3857_s28 = sphi %s3944_s28, %s6056_s28   ;;  %s3853_s27 = sphi %s3942_s27, %s6055_s27   ;;  %s3849_s26 = sphi %s3940_s26, %s6047_s26   ;;  %s3845_s25 = sphi %s3938_s25, %s6054_s25   ;;  %s3841_s24 = sphi %s3936_s24, %s6053_s24  }
  0x15   : > { %5991 = sst [smem:[#allocation18_spill]] %s3853_s27  ;;  %p81_p1 = scmp.ne.s32.totalorder %s3849_s26, %s3845_s25 }
  0x16   : > { %5992 = sst [smem:[#allocation19_spill]] %s3861_s29  ;;  %p87_p2 = scmp.ne.s32.totalorder %s3845_s25, %s3841_s24 }
  0x17   : > { %5993 = sst [smem:[#allocation20_spill]] %s3869_s8  ;;  %p5964_p3 = scmp.lt.s32.totalorder %s3881_s11, 4 }
  0x18   : > { %5994 = sst [smem:[#allocation21_spill]] %s3877_s10  ;;  %p83_p4 = por %p81_p1, %p56_p0 }
  0x19   : > { %s286_s13 = sand.u32 1, %s3881_s11   ;;  %s4002_s14 = sand.u32 1, %s3849_s26  }
  0x1a   : > { %s5957_s15 = sshll.u32 %s4002_s14, 7  ;;  %s3080_s16 = sshll.u32 %s3873_s9, 7 }
  0x1b   : > { %s5995_s1 = sld [smem:[#allocation36_spill]]  ;;  %s290_s20 = scalar_lea.vmem [#allocation7], %s5957_s15 }
  0x1c   : > { %s296_s21 = sshll.u32 %s290_s20, 4  ;;  %p4013_p5 = pnand %p5964_p3, %p83_p4  ;;  %s297_s21 = int_to_ptr.vmem [resolvable:$true] %s296_s21 }
  0x1d   : > { %p3085_p6 = scmp.ge.s32.totalorder %s3881_s11, 1  ;;  %s4018_s23 = scalar_lea.sflag [#allocation8], %s286_s13 }
  0x1e   : > { %p5963_p7 = pneg %p4013_p5  ;;  %s3654_s12 = scalar_lea.vmem %s297_s21, 2048 }
  0x1f   : > { %p3655_p8 = scmp.ne.s32.totalorder %s297_s21, %s3654_s12 }
  0x21   : > { %s295_s19 = scalar_lea.hbm %s5995_s1, %s3080_s16  ;;  %p3657_p9 = pnand %p3655_p8, %p5963_p7 }
  0x22   : > { %s3883_s16 = smov [#allocation7]  }
  0x23   : > { %p3658_p10 = pneg %p3657_p9  ;;  %s3659_s17 = sshll.u32 %s3883_s16, 4  ;;  %s3660_s17 = int_to_ptr.vmem [resolvable:$false] %s3659_s17 }
  0x24   : > { %s3661_s18 = scalar_lea.vmem %s3660_s17, 4096  ;;  %p3662_p11 = scmp.lt.s32.totalorder %s297_s21, %s3660_s17 }
  0x25   : > { %p3663_p12 = scmp.lt.s32.totalorder %s3661_s18, %s3654_s12 }
  0x27   : > { %p3664_p13 = por %p3663_p12, %p3662_p11 }
  0x29   : > { %p3665_p1 = pnand %p3664_p13, %p3658_p10 }
  0x2b   : > { %3668 = shalt.err (!%p3665_p1)
}
  0x2c   : > { %s3884_s20 = smov 256   ;;  %s5958_s12 = smov 128  }
  0x2d   : > { %s5960_s13 = smov 8   ;;  %p357_p4 = scmp.lt.s32.totalorder %s3881_s11, 5 }
  0x2e   : > { %3379 = dma.hbm_to_vmem [thread:$0]  (!%p4013_p5), %s295_s19, 2048, %s297_s21, %s4018_s23, %s3884_s20, %s5958_s12, %s5960_s13  }
  0x2f   : > { %p4033_p8 = pnand %p3085_p6, %p357_p4  ;;  %s4038_s17 = sadd.s32 4294967295, %s3881_s11  }
  0x30   : > { %s3073_s18 = sadd.s32 4294967294, %s3881_s11   ;;  %s38_s15 = sadd.s32 1, %s3873_s9 }
  0x31   : > { %s41_s1 = sadd.s32 1, %s3877_s10  ;;  %p39_p9 = scmp.ge.s32.totalorder %s38_s15, 2 }
  0x32   : > { %s48_s19 = sadd.s32 1, %s3861_s29  ;;  %p55_p10 = scmp.ne.s32.totalorder %s3861_s29, %s3857_s28 }
  0x33   : > { %p61_p11 = scmp.ne.s32.totalorder %s3857_s28, %s3853_s27  ;;  %s6060_s15 = smov (%p39_p9, %s38_s15), 0 }
  0x34   : > { %5998 = sst [smem:[#allocation22_spill]] %s6060_s15  ;;  %s6062_s1 = smov (!%p39_p9, %s41_s1), %s3877_s10 }
  0x35   : > { %p4056_p6 = por %p56_p0, %p55_p10  ;;  %p62_p12 = scmp.eq.s32.totalorder %s4038_s17, 0 }
  0x36   : > { %p43_p13 = scmp.ge.s32.totalorder %s6062_s1, 2  ;;  %s71_s20 = ssub.s32 %s3873_s9, %s6060_s15 }
  0x37   : > { %p4066_p1 = por %p62_p12, %p61_p11  ;;  %p72_p4 = scmp.eq.s32.totalorder %s71_s20, 0 }
  0x38   : > { %s6064_s1 = smov (%p43_p13, %s6062_s1), 0  ;;  %s6002_s13 = sadd.s32 1, %s3849_s26 }
  0x39   : > { %6001 = sst [smem:[#allocation23_spill]] %s6064_s1  ;;  %s45_s8 = ssub.s32 %s3877_s10, %s6064_s1 }
  0x3a   : > { %s4075_s7 = scalar_select %p72_p4, %s3849_s26, %s6002_s13  }
  0x3b   : > { %p4082_p0 = por %p87_p2, %p62_p12  ;;  %p46_p9 = scmp.eq.s32.totalorder %s45_s8, 0 }
  0x3c   : > { %6003 = sst [smem:[#allocation24_spill]] %s4075_s7  ;;  %p236_p7 = scmp.eq.s32.totalorder %s4038_s17, 3 }
  0x3d   : > { %p242_p3 = scmp.eq.s32.totalorder %s3073_s18, 3  ;;  %s265_s20 = sand.u32 1, %s3861_s29  }
  0x3e   : > { %s4089_s15 = scalar_select %p46_p9, %s3861_s29, %s48_s19  }
  0x3f   : > { %p4094_p13 = por %p236_p7, %p55_p10  ;;  %p4101_p4 = por %p242_p3, %p61_p11 }
  0x40   : > { %6005 = sst [smem:[#allocation25_spill]] %s4089_s15  ;;  %s3076_s1 = sshll.u32 %s265_s20, 8 }
  0x41   : > { %s6006_s13 = scalar_select %p4094_p13, 1, 0 }
  0x42   : > { %s6008_s24 = scalar_select %p4101_p4, 1, 0 }
  0x43   : > { %6007 = sst [smem:[#allocation26_spill]] %s6006_s13  ;;  %s3102_s7 = sshll.u32 %s3877_s10, 12 }
  0x44   : > { %6009 = sst [smem:[#allocation27_spill]] %s6008_s24  ;;  %s269_s18 = scalar_lea.vmem [#allocation4], %s3076_s1 }
  0x45   : > { %s6010_s0 = sld [smem:[#allocation35_spill]]  ;;  %s276_s4 = sshll.u32 %s269_s18, 4  ;;  %s277_s4 = int_to_ptr.vmem [resolvable:$true] %s276_s4 }
  0x46   : > { %p6011_p2 = scmp.lt.s32.totalorder %s3881_s11, 4  ;;  %s3361_s15 = smul.u32 12, %s4002_s14 }
  0x47   : > { %s3081_s29 = sshll.u32 %s3873_s9, 6  ;;  %s266_s13 = scalar_lea.sflag [#allocation5], %s265_s20 }
  0x48   : > { %p4113_p7 = pnand %p6011_p2, %p4056_p6  ;;  %s4122_s10 = scalar_lea.hbm %s5952_s3, %s3081_s29 }
  0x49   : > { %s3682_s1 = scalar_lea.vmem %s277_s4, 4096  ;;  %s3887_s2 = smov [#allocation4]  }
  0x4a   : > { %p3671_p3 = pneg %p4113_p7  ;;  %p3683_p10 = scmp.ne.s32.totalorder %s277_s4, %s3682_s1 }
  0x4b   : > { %s275_s8 = scalar_lea.hbm %s6010_s0, %s3102_s7  ;;  %s3687_s7 = sshll.u32 %s3887_s2, 4  ;;  %s3688_s7 = int_to_ptr.vmem [resolvable:$false] %s3687_s7 }
  0x4c   : > { %p3685_p11 = pnand %p3683_p10, %p3671_p3  ;;  %s3689_s26 = scalar_lea.vmem %s3688_s7, 8192 }
  0x4d   : > { %p3690_p6 = scmp.lt.s32.totalorder %s277_s4, %s3688_s7  ;;  %p3691_p9 = scmp.lt.s32.totalorder %s3689_s26, %s3682_s1 }
  0x4e   : > { %p3686_p12 = pneg %p3685_p11 }
  0x4f   : > { %p3692_p2 = por %p3691_p9, %p3690_p6 }
  0x51   : > { %p3693_p4 = pnand %p3692_p2, %p3686_p12 }
  0x53   : > { %3696 = shalt.err (!%p3693_p4)
}
  0x54   : > { %s6013_s27 = smov 8   ;;  %s6014_s29 = smov 128  }
  0x55   : > { %3376 = dma.hbm_to_vmem [thread:$0]  (!%p4113_p7), %s275_s8, 4096, %s277_s4, %s266_s13, %s6014_s29, %s6014_s29, %s6013_s27  }
  0x56   : > { %s316_s21 = scalar_lea.vmem [#allocation9], %s3361_s15  ;;  %p6015_p10 = pneg %p4013_p5 }
  0x57   : > { %s322_s20 = sshll.u32 %s316_s21, 4  ;;  %s3888_s18 = smov [#allocation9]   ;;  %s323_s20 = int_to_ptr.vmem [resolvable:$true] %s322_s20 }
  0x58   : > { %s3710_s24 = scalar_lea.vmem %s323_s20, 192  ;;  %s3715_s1 = sshll.u32 %s3888_s18, 4  ;;  %s3716_s1 = int_to_ptr.vmem [resolvable:$false] %s3715_s1 }
  0x59   : > { %p3711_p3 = scmp.ne.s32.totalorder %s323_s20, %s3710_s24  ;;  %s3717_s2 = scalar_lea.vmem %s3716_s1, 384 }
  0x5a   : > { %p3718_p4 = scmp.lt.s32.totalorder %s323_s20, %s3716_s1  ;;  %p3719_p12 = scmp.lt.s32.totalorder %s3717_s2, %s3710_s24 }
  0x5b   : > { %p3713_p11 = pnand %p3711_p3, %p6015_p10 }
  0x5c   : > { %p3720_p6 = por %p3719_p12, %p3718_p4 }
  0x5d   : > { %p3714_p13 = pneg %p3713_p11 }
  0x5f   : > { %p3721_p9 = pnand %p3720_p6, %p3714_p13 }
  0x61   : > { %3724 = shalt.err (!%p3721_p9)
}
  0x62   : > { %s3889_s19 = smov 64   ;;  %s3890_s4 = smov 4  }
  0x63   : > { %3382 = dma.hbm_to_vmem [thread:$0]  (!%p4013_p5), %s4122_s10, 192, %s323_s20, %s4018_s23, %s6014_s29, %s3889_s19, %s3890_s4  }
  0x64   : > { %s3103_s15 = sshll.u32 %s3873_s9, 11  ;;  %s6016_s26 = sshll.u32 %s4002_s14, 7 }
  0x65   : > { %s348_s7 = scalar_lea.hbm %s5954_s5, %s3103_s15  ;;  %s342_s21 = scalar_lea.vmem [#allocation10], %s6016_s26 }
  0x66   : > { %s349_s24 = sshll.u32 %s342_s21, 4  ;;  %s339_s18 = scalar_lea.sflag [#allocation11], %s4002_s14  ;;  %s350_s24 = int_to_ptr.vmem [resolvable:$true] %s349_s24 }
  0x67   : > { %s3738_s1 = scalar_lea.vmem %s350_s24, 2048  ;;  %p6017_p7 = pmov %p6015_p10 }
  0x68   : > { %p3739_p13 = scmp.ne.s32.totalorder %s350_s24, %s3738_s1  ;;  %s3891_s2 = smov [#allocation10]  }
  0x69   : > { %s3743_s0 = sshll.u32 %s3891_s2, 4  ;;  %s3744_s0 = int_to_ptr.vmem [resolvable:$false] %s3743_s0 }
  0x6a   : > { %p3741_p2 = pnand %p3739_p13, %p6017_p7  ;;  %s3745_s10 = scalar_lea.vmem %s3744_s0, 4096 }
  0x6b   : > { %p3746_p10 = scmp.lt.s32.totalorder %s350_s24, %s3744_s0  ;;  %p3747_p11 = scmp.lt.s32.totalorder %s3745_s10, %s3738_s1 }
  0x6c   : > { %p3742_p3 = pneg %p3741_p2 }
  0x6d   : > { %p3748_p4 = por %p3747_p11, %p3746_p10 }
  0x6f   : > { %p3749_p12 = pnand %p3748_p4, %p3742_p3 }
  0x71   : > { %3752 = shalt.err (!%p3749_p12)
}
  0x72   : > { %3385 = dma.hbm_to_vmem [thread:$0]  (!%p4013_p5), %s348_s7, 2048, %s350_s24, %s339_s18, %s6014_s29, %s6014_s29, %s6013_s27  }
  0x73   : > { %361 = sbr.rel (%p4033_p8) target bundleno = 1130 (0x46a), region = 48 }
  0x78   : > { %s4157_s14 = sand.u32 1, %s3857_s28  }
  0x79   : > { %s3086_s0 = sshll.u32 %s4157_s14, 8  ;;  %s364_s23 = scalar_lea.sflag [#allocation5], %s4157_s14 }
  0x7a   : > { %s4163_s20 = scalar_lea.vmem [#allocation4], %s3086_s0 }
  0x7b   : > { %3824 = dma.done.wait (%p4066_p1), %s364_s23, 4096  }
  0x7c   : > { %3826 = vsyncadd (%p4066_p1), %s364_s23, 4294963200  ;;  %s372_s22 = sand.u32 1, %s4038_s17   ;;  %s374_s16 = sand.u32 1, %s3845_s25  }
  0x7d   : > { %s3087_s27 = sshll.u32 %s374_s16, 7  ;;  %s373_s29 = scalar_lea.sflag [#allocation8], %s372_s22 }
  0x7e   : > { %s4171_s19 = scalar_lea.vmem [#allocation7], %s3087_s27 }
  0x7f   : > { %3828 = dma.done.wait (%p4082_p0), %s373_s29, 2240  }
  0x80   : > { %3830 = vsyncadd (%p4082_p0), %s373_s29, 4294965056  ;;  %s3362_s4 = smul.u32 12, %s374_s16  ;;  %s391_s12 = scalar_lea.sflag [#allocation11], %s374_s16 }
  0x81   : > { %s4179_s13 = scalar_lea.vmem [#allocation10], %s3087_s27 }
  0x82   : > { %s4177_s15 = scalar_lea.vmem [#allocation9], %s3362_s4 }
  0x83   : > { %3832 = dma.done.wait (%p4082_p0), %s391_s12, 2048  }
  0x84   : > { %3834 = vsyncadd (%p4082_p0), %s391_s12, 4294965248  ;;  %p446_p5 = scmp.lt.s32.totalorder %s3865_s30, 1  ;;  %s6018_s26 = sld [smem:[#allocation38_spill]]  ;;  %v500_v0 = vld [vmem:[%s4171_s19 + $0x78] sm:$0xff]  ;;  %v499_v1 = vld [vmem:[%s4171_s19 + $0x70] sm:$0xff] }
  0x85   : > { %3201 = vmatprep.subr.mxu0 %v500_v0  ;;  %v498_v2 = vld [vmem:[%s4171_s19 + $0x68] sm:$0xff]  ;;  %v497_v3 = vld [vmem:[%s4171_s19 + $0x60] sm:$0xff]  ;;  %v496_v5 = vld [vmem:[%s4171_s19 + $0x58] sm:$0xff]  ;;  %s6019_s18 = sld [smem:[#allocation37_spill]]  ;;  %s4347_s2 = scalar_lea.vmem [#allocation12], %s3086_s0 }
  0x86   : > { %s4187_s17 = scalar_select %p446_p5, %s3865_s30, 1  ;;  %3202 = vmatpush3.msra.mxu0 %v500_v0  ;;  %v453_v4 = vld [vmem:[%s4163_s20] sm:$0xff]  ;;  %v495_v6 = vld [vmem:[%s4171_s19 + $0x50] sm:$0xff]  ;;  %v494_v7 = vld [vmem:[%s4171_s19 + $0x48] sm:$0xff] }
  0x87   : > { %3203 = vmatprep.subr.mxu0 %v499_v1  ;;  %3233 = vmatprep.mubr.f32.mxu0 %v453_v4  ;;  %v493_v8 = vld [vmem:[%s4171_s19 + $0x40] sm:$0xff]  ;;  %v492_v9 = vld [vmem:[%s4171_s19 + $0x38] sm:$0xff]  ;;  %v491_v10 = vld [vmem:[%s4171_s19 + $0x30] sm:$0xff]  ;;  %p3091_p8 = scmp.ne.s32.totalorder %s3865_s30, 0 }
  0x88   : > { %3204 = vmatpush3.msra.mxu0 %v499_v1  ;;  %v490_v11 = vld [vmem:[%s4171_s19 + $0x28] sm:$0xff]  ;;  %v489_v12 = vld [vmem:[%s4171_s19 + $0x20] sm:$0xff]  ;;  %v488_v13 = vld [vmem:[%s4171_s19 + $0x18] sm:$0xff] }
  0x89   : > { %3205 = vmatprep.subr.mxu0 %v498_v2  ;;  %v487_v14 = vld [vmem:[%s4171_s19 + $0x10] sm:$0xff]  ;;  %v486_v15 = vld [vmem:[%s4171_s19 + $0x8] sm:$0xff]  ;;  %v485_v16 = vld [vmem:[%s4171_s19] sm:$0xff] }
  0x8a   : > { %s4193_s21 = scalar_lea.vmem %s6018_s26, %s4187_s17  ;;  %3206 = vmatpush3.msra.mxu0 %v498_v2  ;;  %v454_v17 = vld [vmem:[%s4163_s20 + $0x8] sm:$0xff]  ;;  %v455_v18 = vld [vmem:[%s4163_s20 + $0x10] sm:$0xff]  ;;  %v456_v19 = vld [vmem:[%s4163_s20 + $0x18] sm:$0xff] }
  0x8b   : > { %3207 = vmatprep.subr.mxu0 %v497_v3  ;;  %v457_v20 = vld [vmem:[%s4163_s20 + $0x20] sm:$0xff]  ;;  %v458_v21 = vld [vmem:[%s4163_s20 + $0x28] sm:$0xff]  ;;  %v459_v22 = vld [vmem:[%s4163_s20 + $0x30] sm:$0xff]  ;;  %s448_s1 = scalar_lea.vmem %s6019_s18, %s4187_s17 }
  0x8c   : > { %3208 = vmatpush3.msra.mxu0 %v497_v3  ;;  %v460_v23 = vld [vmem:[%s4163_s20 + $0x38] sm:$0xff]  ;;  %v461_v24 = vld [vmem:[%s4163_s20 + $0x40] sm:$0xff]  ;;  %v462_v25 = vld [vmem:[%s4163_s20 + $0x48] sm:$0xff] }
  0x8d   : > { %3209 = vmatprep.subr.mxu0 %v496_v5  ;;  %v463_v26 = vld [vmem:[%s4163_s20 + $0x50] sm:$0xff]  ;;  %v464_v27 = vld [vmem:[%s4163_s20 + $0x58] sm:$0xff]  ;;  %v465_v28 = vld [vmem:[%s4163_s20 + $0x60] sm:$0xff] }
  0x8e   : > { %3210 = vmatpush3.msra.mxu0 %v496_v5  ;;  %v466_v29 = vld [vmem:[%s4163_s20 + $0x68] sm:$0xff]  ;;  %v467_v30 = vld [vmem:[%s4163_s20 + $0x70] sm:$0xff]  ;;  %v468_v31 = vld [vmem:[%s4163_s20 + $0x78] sm:$0xff] }
  0x8f   : > { %3211 = vmatprep.subr.mxu0 %v495_v6  ;;  %v469_v32 = vld [vmem:[%s4163_s20 + $0x80] sm:$0xff]  ;;  %v470_v33 = vld [vmem:[%s4163_s20 + $0x88] sm:$0xff]  ;;  %v471_v34 = vld [vmem:[%s4163_s20 + $0x90] sm:$0xff] }
  0x90   : > { %3212 = vmatpush3.msra.mxu0 %v495_v6  ;;  %v472_v35 = vld [vmem:[%s4163_s20 + $0x98] sm:$0xff]  ;;  %v473_v36 = vld [vmem:[%s4163_s20 + $0xa0] sm:$0xff]  ;;  %v474_v37 = vld [vmem:[%s4163_s20 + $0xa8] sm:$0xff] }
  0x91   : > { %3213 = vmatprep.subr.mxu0 %v494_v7  ;;  %v475_v38 = vld [vmem:[%s4163_s20 + $0xb0] sm:$0xff]  ;;  %v476_v39 = vld [vmem:[%s4163_s20 + $0xb8] sm:$0xff]  ;;  %v477_v40 = vld [vmem:[%s4163_s20 + $0xc0] sm:$0xff] }
  0x92   : > { %3214 = vmatpush3.msra.mxu0 %v494_v7  ;;  %v478_v41 = vld [vmem:[%s4163_s20 + $0xc8] sm:$0xff]  ;;  %v479_v42 = vld [vmem:[%s4163_s20 + $0xd0] sm:$0xff]  ;;  %v480_v43 = vld [vmem:[%s4163_s20 + $0xd8] sm:$0xff] }
  0x93   : > { %3215 = vmatprep.subr.mxu0 %v493_v8  ;;  %v481_v44 = vld [vmem:[%s4163_s20 + $0xe0] sm:$0xff]  ;;  %v482_v45 = vld [vmem:[%s4163_s20 + $0xe8] sm:$0xff]  ;;  %v483_v46 = vld [vmem:[%s4163_s20 + $0xf0] sm:$0xff] }
  0x94   : > { %3216 = vmatpush3.msra.mxu0 %v493_v8  ;;  %v484_v47 = vld [vmem:[%s4163_s20 + $0xf8] sm:$0xff]  ;;  %v4247_v48 = vld [vmem:[%s448_s1] ss:$0 sm:$0xff] }
  0x95   : > { %3217 = vmatprep.subr.mxu0 %v492_v9 }
  0x96   : > { %3218 = vmatpush3.msra.mxu0 %v492_v9 }
  0x97   : > { %3219 = vmatprep.subr.mxu0 %v491_v10 }
  0x98   : > { %3220 = vmatpush3.msra.mxu0 %v491_v10 }
  0x99   : > { %3221 = vmatprep.subr.mxu0 %v490_v11 }
  0x9a   : > { %3222 = vmatpush3.msra.mxu0 %v490_v11 }
  0x9b   : > { %3223 = vmatprep.subr.mxu0 %v489_v12 }
  0x9c   : > { %3224 = vmatpush3.msra.mxu0 %v489_v12 }
  0x9d   : > { %3225 = vmatprep.subr.mxu0 %v488_v13 }
  0x9e   : > { %3226 = vmatpush3.msra.mxu0 %v488_v13 }
  0x9f   : > { %3227 = vmatprep.subr.mxu0 %v487_v14 }
  0xa0   : > { %3228 = vmatpush3.msra.mxu0 %v487_v14 }
  0xa1   : > { %3229 = vmatprep.subr.mxu0 %v486_v15 }
  0xa2   : > { %3230 = vmatpush3.msra.mxu0 %v486_v15 }
  0xa3   : > { %3231 = vmatprep.subr.mxu0 %v485_v16 }
  0xa4   : > { %3232 = vmatpush3.msra.mxu0 %v485_v16 }
  0xa5   : > { %3234 = vmatmul.mubr.f32.vlgmr.msra.gmra.mxu0 %v454_v17 }
  0xa6   : > { %3236 = vmatprep.mubr.f32.mxu0 %v455_v18 }
  0xa9   : > { %3237 = vmatmul.mubr.f32.gmra.mxu0 %v456_v19 }
  0xaa   : > { %3239 = vmatprep.mubr.f32.mxu0 %v457_v20 }
  0xad   : > { %3240 = vmatmul.mubr.f32.gmra.mxu0 %v458_v21 }
  0xae   : > { %3242 = vmatprep.mubr.f32.mxu0 %v459_v22 }
  0xb1   : > { %3243 = vmatmul.mubr.f32.gmra.mxu0 %v460_v23 }
  0xb2   : > { %3245 = vmatprep.mubr.f32.mxu0 %v461_v24 }
  0xb5   : > { %3246 = vmatmul.mubr.f32.gmra.mxu0 %v462_v25 }
  0xb6   : > { %3248 = vmatprep.mubr.f32.mxu0 %v463_v26 }
  0xb9   : > { %3249 = vmatmul.mubr.f32.gmra.mxu0 %v464_v27 }
  0xba   : > { %3251 = vmatprep.mubr.f32.mxu0 %v465_v28 }
  0xbd   : > { %3252 = vmatmul.mubr.f32.gmra.mxu0 %v466_v29 }
  0xbe   : > { %3254 = vmatprep.mubr.f32.mxu0 %v467_v30 }
  0xc1   : > { %3255 = vmatmul.mubr.f32.gmra.mxu0 %v468_v31 }
  0xc2   : > { %3257 = vmatprep.mubr.f32.mxu0 %v469_v32 }
  0xc5   : > { %3258 = vmatmul.mubr.f32.gmra.mxu0 %v470_v33 }
  0xc6   : > { %3260 = vmatprep.mubr.f32.mxu0 %v471_v34 }
  0xc9   : > { %3261 = vmatmul.mubr.f32.gmra.mxu0 %v472_v35 }
  0xca   : > { %3263 = vmatprep.mubr.f32.mxu0 %v473_v36 }
  0xcd   : > { %3264 = vmatmul.mubr.f32.gmra.mxu0 %v474_v37 }
  0xce   : > { %3266 = vmatprep.mubr.f32.mxu0 %v475_v38 }
  0xd1   : > { %3267 = vmatmul.mubr.f32.gmra.mxu0 %v476_v39 }
  0xd2   : > { %3269 = vmatprep.mubr.f32.mxu0 %v477_v40 }
  0xd5   : > { %3270 = vmatmul.mubr.f32.gmra.mxu0 %v478_v41 }
  0xd6   : > { %3272 = vmatprep.mubr.f32.mxu0 %v479_v42 }
  0xd9   : > { %3273 = vmatmul.mubr.f32.gmra.mxu0 %v480_v43 }
  0xda   : > { %3275 = vmatprep.mubr.f32.mxu0 %v481_v44 }
  0xdd   : > { %3276 = vmatmul.mubr.f32.gmra.mxu0 %v482_v45 }
  0xde   : > { %3278 = vmatprep.mubr.f32.mxu0 %v483_v46 }
  0xe1   : > { %3279 = vmatmul.mubr.f32.gmra.mxu0 %v484_v47 }
 0x165   : > { %v3235_v49 = vpop.f32.mrf.mxu0 }
 0x166   : > { %v4250_v50 = vadd.f32 %v3235_v49, %v4247_v48 }
 0x167   : > { %v574_v51 = vpop.f32.mrf.mxu0 }
 0x168   : > { %v4253_v52 = vadd.f32 %v4247_v48, %v574_v51 }
 0x169   : > { %v3238_v53 = vpop.f32.mrf.mxu0 }
 0x16a   : > { %v4256_v54 = vadd.f32 %v3238_v53, %v4247_v48 }
 0x16b   : > { %v584_v55 = vpop.f32.mrf.mxu0 }
 0x16c   : > { %v4259_v56 = vadd.f32 %v4247_v48, %v584_v55 }
 0x16d   : > { %v3241_v57 = vpop.f32.mrf.mxu0 }
 0x16e   : > { %v4262_v58 = vadd.f32 %v3241_v57, %v4247_v48 }
 0x16f   : > { %v594_v59 = vpop.f32.mrf.mxu0 }
 0x170   : > { %v4265_v60 = vadd.f32 %v4247_v48, %v594_v59 }
 0x171   : > { %v3244_v61 = vpop.f32.mrf.mxu0 }
 0x172   : > { %v4268_v62 = vadd.f32 %v3244_v61, %v4247_v48 }
 0x173   : > { %v604_v63 = vpop.f32.mrf.mxu0 }
 0x174   : > { %6020 = vst [vmem:[#allocation28_spill] sm:$0xff] %v4268_v62  ;;  %v4271_v0 = vadd.f32 %v4247_v48, %v604_v63 }
 0x175   : > { %v3247_v1 = vpop.f32.mrf.mxu0 }
 0x176   : > { %v4274_v2 = vadd.f32 %v3247_v1, %v4247_v48 }
 0x177   : > { %v614_v3 = vpop.f32.mrf.mxu0 }
 0x178   : > { %v4277_v4 = vadd.f32 %v4247_v48, %v614_v3 }
 0x179   : > { %v3250_v5 = vpop.f32.mrf.mxu0 }
 0x17a   : > { %v4280_v6 = vadd.f32 %v3250_v5, %v4247_v48 }
 0x17b   : > { %v624_v7 = vpop.f32.mrf.mxu0 }
 0x17c   : > { %6021 = vst [vmem:[#allocation29_spill] sm:$0xff] %v4280_v6  ;;  %v4283_v8 = vadd.f32 %v4247_v48, %v624_v7 }
 0x17d   : > { %v3253_v9 = vpop.f32.mrf.mxu0 }
 0x17e   : > { %v4286_v10 = vadd.f32 %v3253_v9, %v4247_v48 }
 0x17f   : > { %v634_v11 = vpop.f32.mrf.mxu0 }
 0x180   : > { %v4289_v12 = vadd.f32 %v4247_v48, %v634_v11 }
 0x181   : > { %v3256_v13 = vpop.f32.mrf.mxu0 }
 0x182   : > { %6022 = vst [vmem:[#allocation30_spill] sm:$0xff] %v4289_v12  ;;  %v4292_v14 = vadd.f32 %v3256_v13, %v4247_v48 }
 0x183   : > { %v644_v15 = vpop.f32.mrf.mxu0 }
 0x184   : > { %v4295_v16 = vadd.f32 %v4247_v48, %v644_v15 }
 0x185   : > { %v3259_v17 = vpop.f32.mrf.mxu0 }
 0x186   : > { %v4298_v18 = vadd.f32 %v3259_v17, %v4247_v48 }
 0x187   : > { %v654_v19 = vpop.f32.mrf.mxu0 }
 0x188   : > { %v4301_v20 = vadd.f32 %v4247_v48, %v654_v19 }
 0x189   : > { %v3262_v21 = vpop.f32.mrf.mxu0 }
 0x18a   : > { %v4304_v22 = vadd.f32 %v3262_v21, %v4247_v48 }
 0x18b   : > { %v664_v23 = vpop.f32.mrf.mxu0 }
 0x18c   : > { %v4307_v24 = vadd.f32 %v4247_v48, %v664_v23 }
 0x18d   : > { %v3265_v25 = vpop.f32.mrf.mxu0 }
 0x18e   : > { %v4310_v26 = vadd.f32 %v3265_v25, %v4247_v48 }
 0x18f   : > { %v674_v27 = vpop.f32.mrf.mxu0 }
 0x190   : > { %v4313_v28 = vadd.f32 %v4247_v48, %v674_v27 }
 0x191   : > { %v3268_v29 = vpop.f32.mrf.mxu0 }
 0x192   : > { %v4316_v30 = vadd.f32 %v3268_v29, %v4247_v48 }
 0x193   : > { %v684_v31 = vpop.f32.mrf.mxu0 }
 0x194   : > { %v4319_v32 = vadd.f32 %v4247_v48, %v684_v31 }
 0x195   : > { %v3271_v33 = vpop.f32.mrf.mxu0 }
 0x196   : > { %v4322_v34 = vadd.f32 %v3271_v33, %v4247_v48 }
 0x197   : > { %v694_v35 = vpop.f32.mrf.mxu0 }
 0x198   : > { %v4325_v36 = vadd.f32 %v4247_v48, %v694_v35 }
 0x199   : > { %v3274_v37 = vpop.f32.mrf.mxu0 }
 0x19a   : > { %v4328_v38 = vadd.f32 %v3274_v37, %v4247_v48 }
 0x19b   : > { %v704_v39 = vpop.f32.mrf.mxu0 }
 0x19c   : > { %v4331_v40 = vadd.f32 %v4247_v48, %v704_v39 }
 0x19d   : > { %v3277_v41 = vpop.f32.mrf.mxu0 }
 0x19e   : > { %v4334_v42 = vadd.f32 %v3277_v41, %v4247_v48 }
 0x19f   : > { %v714_v43 = vpop.f32.mrf.mxu0 }
 0x1a0   : > { %v4337_v44 = vadd.f32 %v4247_v48, %v714_v43  ;;  %736 = sbr.rel (%p3091_p8) target bundleno = 443 (0x1bb), region = 68 }
 0x1a1   : > { %v3280_v45 = vpop.f32.mrf.mxu0 }
 0x1a2   : > { %v4340_v46 = vadd.f32 %v3280_v45, %v4247_v48 }
 0x1a3   : > { %v724_v47 = vpop.f32.mrf.mxu0 }
 0x1a4   : > { %v4343_v49 = vadd.f32 %v4247_v48, %v724_v47 }
 0x1a5   : > { %v3892_v51 = vmov 0.0  }
 0x1a6   : > { %737 = vst [vmem:[#allocation2] sm:$0xff] %v3892_v51  ;;  %738 = vst [vmem:[#allocation2 + $0x8] sm:$0xff] %v3892_v51 }
 0x1a7   : > { %739 = vst [vmem:[#allocation2 + $0x10] sm:$0x3] %v3892_v51  ;;  %741 = vst [vmem:[#allocation2 + $0x198] sm:$0xff] %v3892_v51 }
 0x1a8   : > { %742 = vst [vmem:[#allocation2 + $0x1a0] sm:$0xff] %v3892_v51  ;;  %743 = vst [vmem:[#allocation2 + $0x1a8] sm:$0x3] %v3892_v51 }
 0x1a9   : > { %745 = vst [vmem:[#allocation2 + $0x18] sm:$0x1] %v3892_v51  ;;  %746 = vst [vmem:[#allocation2 + $0x30] sm:$0x1] %v3892_v51 }
 0x1aa   : > { %747 = vst [vmem:[#allocation2 + $0x48] sm:$0x1] %v3892_v51  ;;  %748 = vst [vmem:[#allocation2 + $0x60] sm:$0x1] %v3892_v51 }
 0x1ab   : > { %749 = vst [vmem:[#allocation2 + $0x78] sm:$0x1] %v3892_v51  ;;  %750 = vst [vmem:[#allocation2 + $0x90] sm:$0x1] %v3892_v51 }
 0x1ac   : > { %751 = vst [vmem:[#allocation2 + $0xa8] sm:$0x1] %v3892_v51  ;;  %752 = vst [vmem:[#allocation2 + $0xc0] sm:$0x1] %v3892_v51 }
 0x1ad   : > { %753 = vst [vmem:[#allocation2 + $0xd8] sm:$0x1] %v3892_v51  ;;  %754 = vst [vmem:[#allocation2 + $0xf0] sm:$0x1] %v3892_v51 }
 0x1ae   : > { %755 = vst [vmem:[#allocation2 + $0x108] sm:$0x1] %v3892_v51  ;;  %756 = vst [vmem:[#allocation2 + $0x120] sm:$0x1] %v3892_v51 }
 0x1af   : > { %757 = vst [vmem:[#allocation2 + $0x138] sm:$0x1] %v3892_v51  ;;  %758 = vst [vmem:[#allocation2 + $0x150] sm:$0x1] %v3892_v51 }
 0x1b0   : > { %759 = vst [vmem:[#allocation2 + $0x168] sm:$0x1] %v3892_v51  ;;  %760 = vst [vmem:[#allocation2 + $0x180] sm:$0x1] %v3892_v51 }
 0x1b1   : > { %763 = vst [vmem:[#allocation2 + $0x29] sm:$0x1] %v3892_v51  ;;  %764 = vst [vmem:[#allocation2 + $0x41] sm:$0x1] %v3892_v51 }
 0x1b2   : > { %765 = vst [vmem:[#allocation2 + $0x59] sm:$0x1] %v3892_v51  ;;  %766 = vst [vmem:[#allocation2 + $0x71] sm:$0x1] %v3892_v51 }
 0x1b3   : > { %767 = vst [vmem:[#allocation2 + $0x89] sm:$0x1] %v3892_v51  ;;  %768 = vst [vmem:[#allocation2 + $0xa1] sm:$0x1] %v3892_v51 }
 0x1b4   : > { %769 = vst [vmem:[#allocation2 + $0xb9] sm:$0x1] %v3892_v51  ;;  %770 = vst [vmem:[#allocation2 + $0xd1] sm:$0x1] %v3892_v51 }
 0x1b5   : > { %771 = vst [vmem:[#allocation2 + $0xe9] sm:$0x1] %v3892_v51  ;;  %772 = vst [vmem:[#allocation2 + $0x101] sm:$0x1] %v3892_v51 }
 0x1b6   : > { %773 = vst [vmem:[#allocation2 + $0x119] sm:$0x1] %v3892_v51  ;;  %774 = vst [vmem:[#allocation2 + $0x131] sm:$0x1] %v3892_v51 }
 0x1b7   : > { %775 = vst [vmem:[#allocation2 + $0x149] sm:$0x1] %v3892_v51  ;;  %776 = vst [vmem:[#allocation2 + $0x161] sm:$0x1] %v3892_v51 }
 0x1b8   : > { %777 = vst [vmem:[#allocation2 + $0x179] sm:$0x1] %v3892_v51  ;;  %778 = vst [vmem:[#allocation2 + $0x191] sm:$0x1] %v3892_v51 }
 0x1b9   : > { %744 = vst [vmem:[#allocation2] sm:$0x1] %v3892_v51  ;;  %761 = vst [vmem:[#allocation2 + $0x198] sm:$0x1] %v3892_v51 }
 0x1ba   : > { %762 = vst [vmem:[#allocation2 + $0x11] sm:$0x1] %v3892_v51  ;;  %779 = vst [vmem:[#allocation2 + $0x1a9] sm:$0x1] %v3892_v51 }
 0x1bb PF: > { %v2422_v48 = vld [vmem:[%s4179_s13 + $0x78] sm:$0xff]  ;;  %v2421_v53 = vld [vmem:[%s4179_s13 + $0x70] sm:$0xff]  ;;  %781 = vst [vmem:[#allocation2 + $0x19] sm:$0xff] %v4253_v52  ;;  %782 = vst [vmem:[#allocation2 + $0x21] sm:$0xff] %v4250_v50  ;;  %v859_v55 = vlaneseq  ;;  %s6035_s23 = sld [smem:[#allocation39_spill]] (!%p3091_p8) }
 0x1bc   : > { %783 = vst [vmem:[#allocation2 + $0x31] sm:$0xff] %v4259_v56  ;;  %784 = vst [vmem:[#allocation2 + $0x39] sm:$0xff] %v4256_v54  ;;  %3281 = vmatprep.subr.mxu1 %v2422_v48  ;;  %v2420_v57 = vld [vmem:[%s4179_s13 + $0x68] sm:$0xff]  ;;  %v2419_v61 = vld [vmem:[%s4179_s13 + $0x60] sm:$0xff] }
 0x1bd   : > { %785 = vst [vmem:[#allocation2 + $0x49] sm:$0xff] %v4265_v60  ;;  %786 = vst [vmem:[#allocation2 + $0x51] sm:$0xff] %v4262_v58  ;;  %3282 = vmatpush3.msra.mxu1 %v2422_v48  ;;  %v860_v59 = vshrl.u32 %v859_v55, 7  ;;  %v813_v3 = vld [vmem:[%s4177_s15] sm:$0x7]  ;;  %v2418_v9 = vld [vmem:[%s4179_s13 + $0x58] sm:$0xff] }
 0x1be   : > { %787 = vst [vmem:[#allocation2 + $0x61] sm:$0xff] %v4271_v0  ;;  %788 = vst [vmem:[#allocation2 + $0x69] sm:$0xff] %v4268_v62  ;;  %3283 = vmatprep.subr.mxu1 %v2421_v53  ;;  %v814_v5 = vld [vmem:[%s4177_s15 + $0x4] sm:$0x7] }
 0x1bf   : > { %789 = vst [vmem:[#allocation2 + $0x79] sm:$0xff] %v4277_v4  ;;  %790 = vst [vmem:[#allocation2 + $0x81] sm:$0xff] %v4274_v2  ;;  %3284 = vmatpush3.msra.mxu1 %v2421_v53  ;;  %v861_v63 = vsub.s32 0, %v860_v59  ;;  %v1101_v1 = vsub.s32 1, %v860_v59  ;;  %v1341_v7 = vsub.s32 2, %v860_v59  ;;  %v1063_v23 = vld [vmem:[#allocation2 + $0x1] sm:$0xff] }
 0x1c0   : > { %791 = vst [vmem:[#allocation2 + $0x91] sm:$0xff] %v4283_v8  ;;  %792 = vst [vmem:[#allocation2 + $0x99] sm:$0xff] %v4280_v6  ;;  %3285 = vmatprep.subr.mxu1 %v2420_v57  ;;  %v823_v11 = vld [vmem:[#allocation2] sm:$0xff]  ;;  %v2416_v25 = vld [vmem:[%s4179_s13 + $0x48] sm:$0xff] }
 0x1c1   : > { %793 = vst [vmem:[#allocation2 + $0xa9] sm:$0xff] %v4289_v12  ;;  %794 = vst [vmem:[#allocation2 + $0xb1] sm:$0xff] %v4286_v10  ;;  %3286 = vmatpush3.msra.mxu1 %v2420_v57  ;;  %v815_v10 = vld [vmem:[%s4177_s15 + $0x8] sm:$0x7]  ;;  %v4392_v13 = vrot.slane %v813_v3, %v861_v63  ;;  %v4397_v15 = vld [vmem:[%s4193_s21] ss:$0 sm:$0xff]  ;;  %v4401_v19 = vrot.slane %v813_v3, %v1101_v1  ;;  %v4411_v27 = vrot.slane %v813_v3, %v1341_v7 }
 0x1c2   : > { %795 = vst [vmem:[#allocation2 + $0xc1] sm:$0xff] %v4295_v16  ;;  %796 = vst [vmem:[#allocation2 + $0xc9] sm:$0xff] %v4292_v14  ;;  %v4394_v14 = vrot.slane %v814_v5, %v861_v63  ;;  %3287 = vmatprep.subr.mxu1 %v2419_v61  ;;  %v825_v16 = vld [vmem:[#allocation2 + $0x18] sm:$0xff]  ;;  %v1303_v33 = vld [vmem:[#allocation2 + $0x2] sm:$0xff] }
 0x1c3   : > { %797 = vst [vmem:[#allocation2 + $0xd9] sm:$0xff] %v4301_v20  ;;  %798 = vst [vmem:[#allocation2 + $0xe1] sm:$0xff] %v4298_v18  ;;  %v827_v17 = vld [vmem:[#allocation2 + $0x30] sm:$0xff]  ;;  %v4399_v18 = vrot.slane %v815_v10, %v861_v63  ;;  %3288 = vmatpush3.msra.mxu1 %v2419_v61  ;;  %v2417_v20 = vld [vmem:[%s4179_s13 + $0x50] sm:$0xff]  ;;  %v863_v21 = vmul.f32 %v4392_v13, %v823_v11  ;;  %v865_v29 = vmul.f32 %v4392_v13, %v825_v16 }
 0x1c4   : > { %799 = vst [vmem:[#allocation2 + $0xf1] sm:$0xff] %v4307_v24  ;;  %800 = vst [vmem:[#allocation2 + $0xf9] sm:$0xff] %v4304_v22  ;;  %v931_v22 = vmul.f32 %v4394_v14, %v825_v16  ;;  %v4406_v24 = vrot.slane %v814_v5, %v1101_v1  ;;  %3289 = vmatprep.subr.mxu1 %v2418_v9  ;;  %v826_v35 = vld [vmem:[#allocation2 + $0x20] sm:$0xff]  ;;  %v933_v37 = vmul.f32 %v4394_v14, %v827_v17  ;;  %v4438_v45 = vld [vmem:[#allocation2 + $0x32] sm:$0xff] }
 0x1c5   : > { %801 = vst [vmem:[#allocation2 + $0x109] sm:$0xff] %v4313_v28  ;;  %802 = vst [vmem:[#allocation2 + $0x111] sm:$0xff] %v4310_v26  ;;  %v4409_v26 = vrot.slane %v815_v10, %v1101_v1  ;;  %v4413_v28 = vrot.slane %v814_v5, %v1341_v7  ;;  %3290 = vmatpush3.msra.mxu1 %v2418_v9  ;;  %v895_v31 = vadd.f32 %v4397_v15, %v863_v21  ;;  %v1305_v41 = vld [vmem:[#allocation2 + $0x1a] sm:$0xff]  ;;  %v4449_v55 = vld [vmem:[#allocation2 + $0x48] sm:$0xff] }
 0x1c6   : > { %803 = vst [vmem:[#allocation2 + $0x121] sm:$0xff] %v4319_v32  ;;  %804 = vst [vmem:[#allocation2 + $0x129] sm:$0xff] %v4316_v30  ;;  %v4417_v30 = vmul.f32 %v4392_v13, %v827_v17  ;;  %v999_v32 = vmul.f32 %v4399_v18, %v827_v17  ;;  %3291 = vmatprep.subr.mxu1 %v2417_v20  ;;  %v4426_v39 = vmul.f32 %v4401_v19, %v4253_v52  ;;  %v4442_v47 = vld [vmem:[#allocation2 + $0x38] sm:$0xff]  ;;  %v2414_v57 = vld [vmem:[%s4179_s13 + $0x38] sm:$0xff] }
 0x1c7   : > { %805 = vst [vmem:[#allocation2 + $0x139] sm:$0xff] %v4325_v36  ;;  %806 = vst [vmem:[#allocation2 + $0x141] sm:$0xff] %v4322_v34  ;;  %v824_v34 = vld [vmem:[#allocation2 + $0x8] sm:$0xff]  ;;  %3292 = vmatpush3.msra.mxu1 %v2417_v20  ;;  %v1171_v43 = vmul.f32 %v4406_v24, %v4253_v52  ;;  %v1239_v51 = vmul.f32 %v4409_v26, %v4259_v56  ;;  %v1343_v48 = vmul.f32 %v4411_v27, %v1303_v33  ;;  %v2413_v11 = vld [vmem:[%s4179_s13 + $0x30] sm:$0xff] }
 0x1c8   : > { %807 = vst [vmem:[#allocation2 + $0x151] sm:$0xff] %v4331_v40  ;;  %808 = vst [vmem:[#allocation2 + $0x159] sm:$0xff] %v4328_v38  ;;  %v2415_v36 = vld [vmem:[%s4179_s13 + $0x40] sm:$0xff]  ;;  %v1103_v38 = vmul.f32 %v4401_v19, %v1063_v23  ;;  %v4430_v40 = vmul.f32 %v4401_v19, %v4259_v56  ;;  %3293 = vmatprep.subr.mxu1 %v2416_v25  ;;  %v864_v53 = vmul.f32 %v4392_v13, %v824_v34  ;;  %v4471_v20 = vld [vmem:[#allocation2 + $0x3a] sm:$0xff] }
 0x1c9   : > { %809 = vst [vmem:[#allocation2 + $0x169] sm:$0xff] %v4337_v44  ;;  %810 = vst [vmem:[#allocation2 + $0x171] sm:$0xff] %v4334_v42  ;;  %v963_v42 = vadd.f32 %v931_v22, %v895_v31  ;;  %v4436_v44 = vmul.f32 %v4406_v24, %v4259_v56  ;;  %v932_v52 = vmul.f32 %v4394_v14, %v826_v35  ;;  %3294 = vmatpush3.msra.mxu1 %v2416_v25  ;;  %v1304_v9 = vld [vmem:[#allocation2 + $0xa] sm:$0xff] }
 0x1ca   : > { %811 = vst [vmem:[#allocation2 + $0x181] sm:$0xff] %v4343_v49  ;;  %812 = vst [vmem:[#allocation2 + $0x189] sm:$0xff] %v4340_v46  ;;  %v4440_v46 = vrot.slane %v815_v10, %v1341_v7  ;;  %v1064_v49 = vld [vmem:[#allocation2 + $0x9] sm:$0xff]  ;;  %v4453_v61 = vmul.f32 %v4411_v27, %v1305_v41  ;;  %v1411_v63 = vmul.f32 %v4413_v28, %v1305_v41  ;;  %3295 = vmatprep.subr.mxu1 %v2415_v36 }
 0x1cb   : > { %v1031_v59 = vadd.f32 %v999_v32, %v963_v42  ;;  %v4458_v56 = vmul.f32 %v4413_v28, %v4438_v45  ;;  %v896_v3 = vadd.f32 %v4397_v15, %v864_v53  ;;  %v1000_v5 = vmul.f32 %v4399_v18, %v4442_v47  ;;  %v1306_v10 = vld [vmem:[#allocation2 + $0x22] sm:$0xff]  ;;  %3296 = vmatpush3.msra.mxu1 %v2415_v36  ;;  %v4476_v23 = vld [vmem:[#allocation2 + $0x50] sm:$0xff] }
 0x1cc   : > { %v4462_v1 = vmul.f32 %v4440_v46, %v4438_v45  ;;  %v1104_v7 = vmul.f32 %v4401_v19, %v1064_v49  ;;  %v1172_v17 = vmul.f32 %v4406_v24, %v4250_v50  ;;  %v897_v21 = vadd.f32 %v4397_v15, %v865_v29  ;;  %3297 = vmatprep.subr.mxu1 %v2414_v57  ;;  %v4480_v32 = vld [vmem:[#allocation2 + $0x4a] sm:$0xff] }
 0x1cd   : > { %v1135_v16 = vadd.f32 %v1103_v38, %v1031_v59  ;;  %v1001_v22 = vmul.f32 %v4399_v18, %v4449_v55  ;;  %v964_v25 = vadd.f32 %v932_v52, %v896_v3  ;;  %v1240_v31 = vmul.f32 %v4409_v26, %v4256_v54  ;;  %3298 = vmatpush3.msra.mxu1 %v2414_v57  ;;  %v2412_v29 = vld [vmem:[%s4179_s13 + $0x28] sm:$0xff]  ;;  %v4495_v57 = vld [vmem:[#allocation2 + $0x60] sm:$0xff] }
 0x1ce   : > { %v866_v33 = vmul.f32 %v4392_v13, %v826_v35  ;;  %v934_v34 = vmul.f32 %v4394_v14, %v4442_v47  ;;  %v1344_v38 = vmul.f32 %v4411_v27, %v1304_v9  ;;  %v1412_v41 = vmul.f32 %v4413_v28, %v1306_v10  ;;  %3299 = vmatprep.subr.mxu1 %v2413_v11 }
 0x1cf   : > { %v1203_v36 = vadd.f32 %v1171_v43, %v1135_v16  ;;  %v965_v42 = vadd.f32 %v933_v37, %v897_v21  ;;  %v1032_v49 = vadd.f32 %v1000_v5, %v964_v25  ;;  %v4490_v53 = vmul.f32 %v4440_v46, %v4471_v20  ;;  %3300 = vmatpush3.msra.mxu1 %v2413_v11  ;;  %v2411_v43 = vld [vmem:[%s4179_s13 + $0x20] sm:$0xff] }
 0x1d0   : > { %v898_v35 = vadd.f32 %v4397_v15, %v866_v33  ;;  %v1002_v52 = vmul.f32 %v4399_v18, %v4476_v23  ;;  %v1241_v37 = vmul.f32 %v4409_v26, %v4265_v60  ;;  %v4502_v5 = vmul.f32 %v4440_v46, %v4480_v32  ;;  %3301 = vmatprep.subr.mxu1 %v2412_v29 }
 0x1d1   : > { %v1271_v59 = vadd.f32 %v1239_v51, %v1203_v36  ;;  %v1033_v3 = vadd.f32 %v1001_v22, %v965_v42  ;;  %v1136_v9 = vadd.f32 %v1104_v7, %v1032_v49  ;;  %v1106_v21 = vmul.f32 %v4401_v19, %v4250_v50  ;;  %3302 = vmatpush3.msra.mxu1 %v2412_v29  ;;  %v2410_v51 = vld [vmem:[%s4179_s13 + $0x18] sm:$0xff] }
 0x1d2   : > { %v966_v16 = vadd.f32 %v934_v34, %v898_v35  ;;  %v899_v11 = vadd.f32 %v4397_v15, %v4417_v30  ;;  %v935_v33 = vmul.f32 %v4394_v14, %v4449_v55  ;;  %v1003_v36 = vmul.f32 %v4399_v18, %v4495_v57  ;;  %3303 = vmatprep.subr.mxu1 %v2411_v43 }
 0x1d3   : > { %v1375_v22 = vadd.f32 %v1343_v48, %v1271_v59  ;;  %v1137_v25 = vadd.f32 %v4426_v39, %v1033_v3  ;;  %v1204_v7 = vadd.f32 %v1172_v17, %v1136_v9  ;;  %v1174_v50 = vmul.f32 %v4406_v24, %v4256_v54  ;;  %3304 = vmatpush3.msra.mxu1 %v2411_v43  ;;  %v2409_v48 = vld [vmem:[%s4179_s13 + $0x10] sm:$0xff]  ;;  %v2408_v3 = vld [vmem:[%s4179_s13 + $0x8] sm:$0xff]  ;;  %v4529_v9 = vld [vmem:[#allocation2 + $0x68] sm:$0xff] }
 0x1d4   : > { %v1034_v34 = vadd.f32 %v1002_v52, %v966_v16  ;;  %v1242_v30 = vmul.f32 %v4409_v26, %v4262_v58  ;;  %v1346_v42 = vmul.f32 %v4411_v27, %v1306_v10  ;;  %v967_v49 = vadd.f32 %v935_v33, %v899_v11  ;;  %3305 = vmatprep.subr.mxu1 %v2410_v51  ;;  %v2407_v11 = vld [vmem:[%s4179_s13] sm:$0xff] }
 0x1d5   : > { %v1443_v29 = vadd.f32 %v1411_v63, %v1375_v22  ;;  %v1205_v39 = vadd.f32 %v4436_v44, %v1137_v25  ;;  %v1272_v35 = vadd.f32 %v1240_v31, %v1204_v7  ;;  %v1175_v17 = vmul.f32 %v4406_v24, %v4265_v60  ;;  %3306 = vmatpush3.msra.mxu1 %v2410_v51  ;;  %v4541_v51 = vld [vmem:[#allocation2 + $0x52] sm:$0xff] }
 0x1d6   : > { %v1138_v59 = vadd.f32 %v1106_v21, %v1034_v34  ;;  %v868_v52 = vmul.f32 %v4392_v13, %v4442_v47  ;;  %v1035_v44 = vadd.f32 %v1003_v36, %v967_v49  ;;  %6023 = vst [vmem:[#allocation31_spill] sm:$0xff] %v4529_v9  ;;  %v936_v10 = vmul.f32 %v4394_v14, %v4476_v23 }
 0x1d7   : > { %v4527_v43 = vadd.f32 %v4462_v1, %v1443_v29  ;;  %v1273_v63 = vadd.f32 %v1241_v37, %v1205_v39  ;;  %3307 = vmatprep.subr.mxu1 %v2409_v48  ;;  %v1376_v31 = vadd.f32 %v1344_v38, %v1272_v35  ;;  %v1414_v21 = vmul.f32 %v4413_v28, %v4471_v20 }
 0x1d8   : > { %v1206_v16 = vadd.f32 %v1174_v50, %v1138_v59  ;;  %v900_v47 = vadd.f32 %v4397_v15, %v868_v52  ;;  %3308 = vmatpush3.msra.mxu1 %v2409_v48  ;;  %v1139_v22 = vadd.f32 %v4430_v40, %v1035_v44  ;;  %v1243_v38 = vmul.f32 %v4409_v26, %v4271_v0  ;;  %v4563_v59 = vld [vmem:[#allocation2 + $0x62] sm:$0xff] }
 0x1d9   : > { %v4538_v1 = vmul.f32 0.70710677, %v4527_v43  ;;  %v1377_v37 = vadd.f32 %v4453_v61, %v1273_v63  ;;  %3309 = vmatprep.subr.mxu1 %v2408_v3  ;;  %v1444_v25 = vadd.f32 %v1412_v41, %v1376_v31  ;;  %v1004_v7 = vmul.f32 %v4399_v18, %v4529_v9  ;;  %6024 = vst [vmem:[#allocation32_spill] sm:$0xff] %v4563_v59 }
 0x1da   : > { %v1274_v33 = vadd.f32 %v1242_v30, %v1206_v16  ;;  %v968_v36 = vadd.f32 %v936_v10, %v900_v47  ;;  %3310 = vmatpush3.msra.mxu1 %v2408_v3  ;;  %v1207_v61 = vadd.f32 %v1175_v17, %v1139_v22  ;;  %v1347_v40 = vmul.f32 %v4411_v27, %v4438_v45 }
 0x1db   : > { %v1607_v34 = vand.u32 2147483647, %v4538_v1  ;;  %v1445_v50 = vadd.f32 %v4458_v56, %v1377_v37  ;;  %3311 = vmatprep.subr.mxu1 %v2407_v11  ;;  %v4553_v48 = vadd.f32 %v4490_v53, %v1444_v25  ;;  %v1482_v41 = vmul.f32 %v4440_v46, %v4541_v51 }
 0x1dc   : > { %v1378_v29 = vadd.f32 %v1346_v42, %v1274_v33  ;;  %3312 = vmatpush3.msra.mxu1 %v2407_v11  ;;  %v1275_v49 = vadd.f32 %v1243_v38, %v1207_v61  ;;  %v1036_v45 = vadd.f32 %v1004_v7, %v968_v36  ;;  %v1108_v53 = vmul.f32 %v4401_v19, %v4256_v54 }
 0x1dd   : > { %v1639_v30 = vmul.f32 0.3275911, %v1607_v34  ;;  %v4558_v39 = vadd.f32 %v4502_v5, %v1445_v50  ;;  %v4561_v56 = vmul.f32 0.70710677, %v4553_v48  ;;  %v2055_v17 = vsub.f32 0.0, %v1607_v34 }
 0x1de   : > { %v1446_v35 = vadd.f32 %v1414_v21, %v1378_v29  ;;  %v1415_v5 = vmul.f32 %v4413_v28, %v4480_v32  ;;  %v1379_v44 = vadd.f32 %v1347_v40, %v1275_v49  ;;  %v1483_v31 = vmul.f32 %v4440_v46, %v4563_v59 }
 0x1df   : > { %v1671_v42 = vadd.f32 1.0, %v1639_v30  ;;  %v4568_v52 = vmul.f32 0.70710677, %v4558_v39  ;;  %v1608_v3 = vand.u32 2147483647, %v4561_v56  ;;  %v1176_v54 = vmul.f32 %v4406_v24, %v4262_v58 }
 0x1e0   : > { %v4573_v63 = vadd.f32 %v1482_v41, %v1446_v35  ;;  %v1140_v11 = vadd.f32 %v1108_v53, %v1036_v45  ;;  %v2087_v37 = vmul.f32 %v2055_v17, %v1607_v34  ;;  %v1447_v25 = vadd.f32 %v1415_v5, %v1379_v44 }
 0x1e1   : > { %3488 = vrcp.f32 %v1671_v42  ;;  %v1609_v10 = vand.u32 2147483647, %v4568_v52  ;;  %v1640_v16 = vmul.f32 0.3275911, %v1608_v3  ;;  %v2056_v21 = vsub.f32 0.0, %v1608_v3 }
 0x1e2   : > { %v4581_v47 = vmul.f32 0.70710677, %v4573_v63  ;;  %v4584_v40 = vadd.f32 %v1483_v31, %v1447_v25  ;;  %v1208_v30 = vadd.f32 %v1176_v54, %v1140_v11  ;;  %v2119_v49 = vmul.f32 1.442695, %v2087_v37 }
 0x1e3   : > { %v1641_v22 = vmul.f32 0.3275911, %v1609_v10  ;;  %v2057_v38 = vsub.f32 0.0, %v1609_v10  ;;  %v1672_v33 = vadd.f32 1.0, %v1640_v16  ;;  %v2088_v7 = vmul.f32 %v2056_v21, %v1608_v3  ;;  %v4595_v3 = vld [vmem:[#allocation2 + $0x6a] sm:$0xff]  ;;  %v4601_v16 = vld [vmem:[#allocation2 + $0x78] sm:$0xff] }
 0x1e4   : > { %v1610_v36 = vand.u32 2147483647, %v4581_v47  ;;  %v4587_v35 = vmul.f32 0.70710677, %v4584_v40  ;;  %v1244_v53 = vmul.f32 %v4409_v26, %v4268_v62  ;;  %v4592_v42 = vmul.f32 0.5, %v4527_v43 }
 0x1e5   : > { %v1673_v50 = vadd.f32 1.0, %v1641_v22  ;;  %v2089_v61 = vmul.f32 %v2057_v38, %v1609_v10  ;;  %3490 = vrcp.f32 %v1672_v33  ;;  %v2121_v17 = vmul.f32 1.442695, %v2088_v7 }
 0x1e6   : > { %v1642_v29 = vmul.f32 0.3275911, %v1610_v36  ;;  %v2058_v41 = vsub.f32 0.0, %v1610_v36  ;;  %v1611_v5 = vand.u32 2147483647, %v4587_v35  ;;  %v1348_v44 = vmul.f32 %v4411_v27, %v4471_v20 }
 0x1e7   : > { %3492 = vrcp.f32 %v1673_v50  ;;  %v2123_v10 = vmul.f32 1.442695, %v2089_v61  ;;  %v1276_v31 = vadd.f32 %v1244_v53, %v1208_v30  ;;  %v1416_v54 = vmul.f32 %v4413_v28, %v4541_v51 }
 0x1e8   : > { %v1674_v34 = vadd.f32 1.0, %v1642_v29  ;;  %v2090_v45 = vmul.f32 %v2058_v41, %v1610_v36  ;;  %v1643_v21 = vmul.f32 0.3275911, %v1611_v5  ;;  %v2059_v43 = vsub.f32 0.0, %v1611_v5 }
 0x1e9   : > { %v869_v11 = vmul.f32 %v4392_v13, %v4449_v55  ;;  %v1380_v22 = vadd.f32 %v1348_v44, %v1276_v31  ;;  %v1484_v38 = vmul.f32 %v4440_v46, %v4595_v3  ;;  %v937_v20 = vmul.f32 %v4394_v14, %v4495_v57 }
 0x1ea   : > { %3494 = vrcp.f32 %v1674_v34  ;;  %v2125_v37 = vmul.f32 1.442695, %v2090_v45  ;;  %v1675_v25 = vadd.f32 1.0, %v1643_v21  ;;  %v1005_v36 = vmul.f32 %v4399_v18, %v4601_v16 }
 0x1eb   : > { %3496 = vpow2.f32 %v2119_v49  ;;  %v901_v33 = vadd.f32 %v4397_v15, %v869_v11  ;;  %v4615_v50 = vmul.f32 0.5, %v4553_v48  ;;  %v2091_v55 = vmul.f32 %v2059_v43, %v1611_v5  ;;  %v4620_v49 = vld [vmem:[#allocation2 + $0x80] sm:$0xff] }
 0x1ec   : > { %3498 = vpow2.f32 %v2121_v17  ;;  %v1448_v61 = vadd.f32 %v1416_v54, %v1380_v22  ;;  %v1109_v30 = vmul.f32 %v4401_v19, %v4265_v60  ;;  %6025 = vst [vmem:[#allocation33_spill] sm:$0xff] %v4620_v49  ;;  %v4623_v34 = vmul.f32 0.5, %v4558_v39  ;;  %v4644_v11 = vld [vmem:[#allocation2 + $0x7a] sm:$0xff] }
 0x1ed   : > { %3500 = vpow2.f32 %v2123_v10  ;;  %v969_v41 = vadd.f32 %v937_v20, %v901_v33  ;;  %v870_v48 = vmul.f32 %v4392_v13, %v4476_v23  ;;  %v1177_v5 = vmul.f32 %v4406_v24, %v4271_v0  ;;  %6026 = vst [vmem:[#allocation34_spill] sm:$0xff] %v4644_v11 }
 0x1ee   : > { %v4612_v7 = vpop.eup %3488  ;;  %3502 = vrcp.f32 %v1675_v25  ;;  %v4625_v45 = vadd.f32 %v1484_v38, %v1448_v61  ;;  %v938_v44 = vmul.f32 %v4394_v14, %v4529_v9  ;;  %v1245_v39 = vmul.f32 %v4409_v26, %v4277_v4 }
 0x1ef   : > { %v1767_v29 = vmul.f32 1.0614054, %v4612_v7  ;;  %3504 = vpow2.f32 %v2125_v37  ;;  %v1037_v17 = vadd.f32 %v1005_v36, %v969_v41  ;;  %v902_v10 = vadd.f32 %v4397_v15, %v870_v48 }
 0x1f0   : > { %v4634_v60 = vmul.f32 0.70710677, %v4625_v45  ;;  %v1006_v31 = vmul.f32 %v4399_v18, %v4620_v49  ;;  %v2127_v21 = vmul.f32 1.442695, %v2091_v55  ;;  %v1349_v37 = vmul.f32 %v4411_v27, %v4480_v32 }
 0x1f1   : > { %v1799_v53 = vadd.f32 -1.4531521, %v1767_v29  ;;  %v1141_v43 = vadd.f32 %v1109_v30, %v1037_v17  ;;  %v1417_v25 = vmul.f32 %v4413_v28, %v4563_v59  ;;  %v970_v33 = vadd.f32 %v938_v44, %v902_v10 }
 0x1f2   : > { %v4641_v23 = vpop.eup %3490  ;;  %v1612_v20 = vand.u32 2147483647, %v4634_v60  ;;  %v1110_v29 = vmul.f32 %v4401_v19, %v4262_v58  ;;  %v1485_v32 = vmul.f32 %v4440_v46, %v4644_v11  ;;  %v1178_v44 = vmul.f32 %v4406_v24, %v4268_v62 }
 0x1f3   : > { %v1831_v54 = vmul.f32 %v4612_v7, %v1799_v53  ;;  %v1768_v38 = vmul.f32 1.0614054, %v4641_v23  ;;  %v1209_v55 = vadd.f32 %v1177_v5, %v1141_v43  ;;  %v1038_v48 = vadd.f32 %v1006_v31, %v970_v33 }
 0x1f4   : > { %v4648_v22 = vpop.eup %3492  ;;  %v1644_v30 = vmul.f32 0.3275911, %v1612_v20  ;;  %v2060_v43 = vsub.f32 0.0, %v1612_v20  ;;  %vm2247_vm0 = vcmp.lt.f32.partialorder %v4538_v1, 0.0  ;;  %vm2248_vm1 = vcmp.lt.f32.partialorder %v4561_v56, 0.0 }
 0x1f5   : > { %v1863_v36 = vadd.f32 1.4214138, %v1831_v54  ;;  %v1769_v61 = vmul.f32 1.0614054, %v4648_v22  ;;  %v1800_v41 = vadd.f32 -1.4531521, %v1768_v38  ;;  %v1277_v6 = vadd.f32 %v1245_v39, %v1209_v55 }
 0x1f6   : > { %v1676_v54 = vadd.f32 1.0, %v1644_v30  ;;  %v1142_v33 = vadd.f32 %v1110_v29, %v1038_v48  ;;  %v1246_v39 = vmul.f32 %v4409_v26, %v4274_v2  ;;  %v1350_v29 = vmul.f32 %v4411_v27, %v4541_v51 }
 0x1f7   : > { %v4659_v53 = vpop.eup %3494  ;;  %v1895_v17 = vmul.f32 %v4612_v7, %v1863_v36  ;;  %v1801_v12 = vadd.f32 -1.4531521, %v1769_v61  ;;  %v1832_v5 = vmul.f32 %v4641_v23, %v1800_v41  ;;  %v1381_v31 = vadd.f32 %v1349_v37, %v1277_v6 }
 0x1f8   : > { %v3497_v10 = vpop.eup %3496  ;;  %v1770_v58 = vmul.f32 1.0614054, %v4659_v53  ;;  %3506 = vrcp.f32 %v1676_v54  ;;  %v1210_v9 = vadd.f32 %v1178_v44, %v1142_v33  ;;  %v2092_v37 = vmul.f32 %v2060_v43, %v1612_v20  ;;  %v4682_v20 = vld [vmem:[#allocation2 + $0x82] sm:$0xff] }
 0x1f9   : > { %v1927_v38 = vadd.f32 -0.28449672, %v1895_v17  ;;  %v1833_v11 = vmul.f32 %v4648_v22, %v1801_v12  ;;  %v3499_v59 = vpop.eup %3498  ;;  %v1864_v49 = vadd.f32 1.4214138, %v1832_v5  ;;  %v1449_v62 = vadd.f32 %v1417_v25, %v1381_v31 }
 0x1fa   : > { %v1802_v36 = vadd.f32 -1.4531521, %v1770_v58  ;;  %v3501_v61 = vpop.eup %3500  ;;  %3508 = vpow2.f32 %v2127_v21  ;;  %v1278_v54 = vadd.f32 %v1246_v39, %v1210_v9  ;;  %v1418_v51 = vmul.f32 %v4413_v28, %v4595_v3 }
 0x1fb   : > { %v1959_v55 = vmul.f32 %v4612_v7, %v1927_v38  ;;  %v1865_v41 = vadd.f32 1.4214138, %v1833_v11  ;;  %v4670_v30 = vpop.eup %3502  ;;  %v1896_v6 = vmul.f32 %v4641_v23, %v1864_v49  ;;  %v4679_v25 = vadd.f32 %v1485_v32, %v1449_v62 }
 0x1fc   : > { %v1834_v12 = vmul.f32 %v4659_v53, %v1802_v36  ;;  %v3505_v48 = vpop.eup %3504  ;;  %v1771_v11 = vmul.f32 1.0614054, %v4670_v30  ;;  %v1382_v32 = vadd.f32 %v1350_v29, %v1278_v54  ;;  %v2129_v21 = vmul.f32 1.442695, %v2092_v37 }
 0x1fd   : > { %v1991_v17 = vadd.f32 0.2548296, %v1959_v55  ;;  %v1897_v5 = vmul.f32 %v4648_v22, %v1865_v41  ;;  %v1928_v44 = vadd.f32 -0.28449672, %v1896_v6  ;;  %v4689_v62 = vmul.f32 0.70710677, %v4679_v25 }
 0x1fe   : > { %v1866_v58 = vadd.f32 1.4214138, %v1834_v12  ;;  %v1803_v31 = vadd.f32 -1.4531521, %v1771_v11  ;;  %vm2249_vm2 = vcmp.lt.f32.partialorder %v4568_v52, 0.0  ;;  %v1486_v6 = vmul.f32 %v4440_v46, %v4682_v20 }
 0x1ff   : > { %v2023_v49 = vmul.f32 %v4612_v7, %v1991_v17  ;;  %v1929_v38 = vadd.f32 -0.28449672, %v1897_v5  ;;  %v1960_v43 = vmul.f32 %v4641_v23, %v1928_v44  ;;  %v1613_v41 = vand.u32 2147483647, %v4689_v62 }
 0x200   : > { %v1898_v33 = vmul.f32 %v4659_v53, %v1866_v58  ;;  %v1835_v7 = vmul.f32 %v4670_v30, %v1803_v31  ;;  %v4700_v11 = vmul.f32 0.5, %v4573_v63  ;;  %vm2250_vm3 = vcmp.lt.f32.partialorder %v4581_v47, 0.0 }
 0x201   : > { %v2183_v36 = vmul.f32 %v3497_v10, %v2023_v49  ;;  %v1961_v9 = vmul.f32 %v4648_v22, %v1929_v38  ;;  %v1992_v39 = vadd.f32 0.2548296, %v1960_v43  ;;  %v1450_v10 = vadd.f32 %v1418_v51, %v1382_v32 }
 0x202   : > { %v1930_v55 = vadd.f32 -0.28449672, %v1898_v33  ;;  %v1867_v29 = vadd.f32 1.4214138, %v1835_v7  ;;  %v1645_v44 = vmul.f32 0.3275911, %v1613_v41  ;;  %3510 = vpow2.f32 %v2129_v21 }
 0x203   : > { %v2215_v12 = vsub.f32 1.0, %v2183_v36  ;;  %v1993_v17 = vadd.f32 0.2548296, %v1961_v9  ;;  %v2024_v5 = vmul.f32 %v4641_v23, %v1992_v39  ;;  %v2061_v51 = vsub.f32 0.0, %v1613_v41 }
 0x204   : > { %v1962_v37 = vmul.f32 %v4659_v53, %v1930_v55  ;;  %v1899_v49 = vmul.f32 %v4670_v30, %v1867_v29  ;;  %v1677_v43 = vadd.f32 1.0, %v1645_v44  ;;  %v4710_v36 = vadd.f32 %v1486_v6, %v1450_v10 }
 0x205   : > { %v2279_v58 = vsub.f32 0.0, %v2215_v12  ;;  %v2025_v54 = vmul.f32 %v4648_v22, %v1993_v17  ;;  %v2184_v38 = vmul.f32 %v3499_v59, %v2024_v5  ;;  %v4706_v33 = vpop.eup %3506  ;;  %v871_v55 = vmul.f32 %v4392_v13, %v4495_v57 }
 0x206   : > { %v1994_v31 = vadd.f32 0.2548296, %v1962_v37  ;;  %v1931_v32 = vadd.f32 -0.28449672, %v1899_v49  ;;  %v1772_v39 = vmul.f32 1.0614054, %v4706_v33  ;;  %3512 = vrcp.f32 %v1677_v43 }
 0x207   : > { %v2311_v63 = vsel %vm2247_vm0, %v2279_v58, %v2215_v12  ;;  %v2185_v23 = vmul.f32 %v3501_v61, %v2025_v54  ;;  %v2216_v22 = vsub.f32 1.0, %v2184_v38  ;;  %v3509_v6 = vpop.eup %3508  ;;  %vm2251_vm4 = vcmp.lt.f32.partialorder %v4587_v35, 0.0  ;;  %v4759_v35 = vld [vmem:[#allocation2 + $0x92] sm:$0xff] }
 0x208   : > { %v2343_v9 = vadd.f32 1.0, %v2311_v63  ;;  %v2026_v7 = vmul.f32 %v4659_v53, %v1994_v31  ;;  %v1963_v59 = vmul.f32 %v4670_v30, %v1931_v32  ;;  %v1804_v17 = vadd.f32 -1.4531521, %v1772_v39 }
 0x209   : > { %v2217_v21 = vsub.f32 1.0, %v2185_v23  ;;  %v2280_v12 = vsub.f32 0.0, %v2216_v22  ;;  %v4720_v53 = vmul.f32 0.70710677, %v4710_v36  ;;  %v2093_v44 = vmul.f32 %v2061_v51, %v1613_v41 }
 0x20a   : > { %v2375_v1 = vmul.f32 %v2343_v9, %v4592_v42  ;;  %v2186_v61 = vmul.f32 %v3505_v48, %v2026_v7  ;;  %v1995_v10 = vadd.f32 0.2548296, %v1963_v59  ;;  %v1836_v57 = vmul.f32 %v4706_v33, %v1804_v17  ;;  %v4731_v9 = vld [vmem:[#allocation2 + $0x90] sm:$0xff] }
 0x20b   : > { %v2281_v29 = vsub.f32 0.0, %v2217_v21  ;;  %v2312_v5 = vsel %vm2248_vm1, %v2280_v12, %v2216_v22  ;;  %v1614_v54 = vand.u32 2147483647, %v4720_v53  ;;  %v903_v43 = vadd.f32 %v4397_v15, %v871_v55 }
 0x20c   : > { %3313 = vmatprep.mubr.f32.mxu1 %v2375_v1  ;;  %v2218_v37 = vsub.f32 1.0, %v2186_v61  ;;  %v2344_v42 = vadd.f32 1.0, %v2312_v5  ;;  %v2027_v58 = vmul.f32 %v4670_v30, %v1995_v10  ;;  %v1868_v31 = vadd.f32 1.4214138, %v1836_v57 }
 0x20d   : > { %v2313_v48 = vsel %vm2249_vm2, %v2281_v29, %v2217_v21  ;;  %v1646_v23 = vmul.f32 0.3275911, %v1614_v54  ;;  %v2062_v32 = vsub.f32 0.0, %v1614_v54  ;;  %v939_v51 = vmul.f32 %v4394_v14, %v4601_v16 }
 0x20e   : > { %v2345_v49 = vadd.f32 1.0, %v2313_v48  ;;  %v2282_v38 = vsub.f32 0.0, %v2218_v37  ;;  %v2376_v56 = vmul.f32 %v2344_v42, %v4615_v50  ;;  %v2187_v63 = vmul.f32 %v3509_v6, %v2027_v58  ;;  %v4756_v48 = vld [vmem:[#allocation2 + $0x98] sm:$0xff] }
 0x20f   : > { %v1900_v30 = vmul.f32 %v4706_v33, %v1868_v31  ;;  %v1678_v39 = vadd.f32 1.0, %v1646_v23  ;;  %v2094_v50 = vmul.f32 %v2062_v32, %v1614_v54  ;;  %v3511_v21 = vpop.eup %3510  ;;  %v971_v55 = vadd.f32 %v939_v51, %v903_v43  ;;  %v6027_v54 = vld [vmem:[#allocation31_spill] sm:$0xff] }
 0x210   : > { %v2377_v41 = vmul.f32 %v2345_v49, %v4623_v34  ;;  %v2314_v52 = vsel %vm2250_vm3, %v2282_v38, %v2218_v37  ;;  %3314 = vmatmul.mubr.f32.vlgmr.msra.gmra.mxu1 %v2376_v56  ;;  %v2219_v7 = vsub.f32 1.0, %v2187_v63  ;;  %v1007_v34 = vmul.f32 %v4399_v18, %v4731_v9  ;;  %v6028_v49 = vld [vmem:[#allocation33_spill] sm:$0xff]  ;;  %v6029_v63 = vld [vmem:[#allocation32_spill] sm:$0xff] }
 0x211   : > { %v2346_v22 = vadd.f32 1.0, %v2314_v52  ;;  %v1932_v59 = vadd.f32 -0.28449672, %v1900_v30  ;;  %v1111_v47 = vmul.f32 %v4401_v19, %v4271_v0  ;;  %v2131_v61 = vmul.f32 1.442695, %v2093_v44 }
 0x212   : > { %3316 = vmatprep.mubr.f32.mxu1 %v2377_v41  ;;  %v2283_v12 = vsub.f32 0.0, %v2219_v7  ;;  %3514 = vrcp.f32 %v1678_v39  ;;  %v1547_v17 = vmul.f32 0.5, %v4584_v40  ;;  %v1039_v29 = vadd.f32 %v1007_v34, %v971_v55  ;;  %v4778_v34 = vld [vmem:[#allocation2 + $0xa8] sm:$0xff] }
 0x213   : > { %v2378_v1 = vmul.f32 %v2346_v22, %v4700_v11  ;;  %v1964_v6 = vmul.f32 %v4706_v33, %v1932_v59  ;;  %v1179_v10 = vmul.f32 %v4406_v24, %v4277_v4  ;;  %v1548_v37 = vmul.f32 0.5, %v4625_v45  ;;  %v4752_v11 = vpop.eup %3512  ;;  %v6030_v22 = vld [vmem:[#allocation34_spill] sm:$0xff]  ;;  %v6031_v59 = vld [vmem:[#allocation28_spill] sm:$0xff] }
 0x214   : > { %v2315_v5 = vsel %vm2251_vm4, %v2283_v12, %v2219_v7  ;;  %vm2252_vm5 = vcmp.lt.f32.partialorder %v4634_v60, 0.0  ;;  %v2133_v0 = vmul.f32 1.442695, %v2094_v50  ;;  %v1143_v40 = vadd.f32 %v1111_v47, %v1039_v29  ;;  %v6032_v29 = vld [vmem:[#allocation29_spill] sm:$0xff] }
 0x215   : > { %3317 = vmatmul.mubr.f32.gmra.mxu1 %v2378_v1  ;;  %v2347_v57 = vadd.f32 1.0, %v2315_v5  ;;  %v1996_v44 = vadd.f32 0.2548296, %v1964_v6  ;;  %v1247_v42 = vmul.f32 %v4409_v26, %v4283_v8  ;;  %v1773_v58 = vmul.f32 1.0614054, %v4752_v11  ;;  %v4788_v5 = vld [vmem:[#allocation2 + $0x9a] sm:$0xff] }
 0x216   : > { %3516 = vpow2.f32 %v2131_v61  ;;  %v872_v45 = vmul.f32 %v4392_v13, %v6027_v54  ;;  %v940_v38 = vmul.f32 %v4394_v14, %v6028_v49  ;;  %v1211_v56 = vadd.f32 %v1179_v10, %v1143_v40 }
 0x217   : > { %v2379_v31 = vmul.f32 %v2347_v57, %v1547_v17  ;;  %v2028_v43 = vmul.f32 %v4706_v33, %v1996_v44  ;;  %v1351_v23 = vmul.f32 %v4411_v27, %v6029_v63  ;;  %v1805_v32 = vadd.f32 -1.4531521, %v1773_v58 }
 0x218   : > { %3518 = vpow2.f32 %v2133_v0  ;;  %v904_v41 = vadd.f32 %v4397_v15, %v872_v45  ;;  %v1008_v52 = vmul.f32 %v4399_v18, %v4756_v48  ;;  %v1279_v51 = vadd.f32 %v1247_v42, %v1211_v56 }
 0x219   : > { %3319 = vmatprep.mubr.f32.mxu1 %v2379_v31  ;;  %v2188_v30 = vmul.f32 %v3511_v21, %v2028_v43  ;;  %v1419_v7 = vmul.f32 %v4413_v28, %v6030_v22  ;;  %v1487_v33 = vmul.f32 %v4440_v46, %v4759_v35  ;;  %v1837_v39 = vmul.f32 %v4752_v11, %v1805_v32 }
 0x21a   : > { %v972_v50 = vadd.f32 %v940_v38, %v904_v41  ;;  %v1112_v55 = vmul.f32 %v4401_v19, %v6031_v59  ;;  %v873_v47 = vmul.f32 %v4392_v13, %v4601_v16  ;;  %v1383_v21 = vadd.f32 %v1351_v23, %v1279_v51 }
 0x21b   : > { %v2220_v1 = vsub.f32 1.0, %v2188_v30  ;;  %v1180_v12 = vmul.f32 %v4406_v24, %v4274_v2  ;;  %v941_v61 = vmul.f32 %v4394_v14, %v4731_v9  ;;  %v1869_v17 = vadd.f32 1.4214138, %v1837_v39  ;;  %v4817_v39 = vld [vmem:[#allocation2 + $0xb0] sm:$0xff] }
 0x21c   : > { %v1040_v6 = vadd.f32 %v1008_v52, %v972_v50  ;;  %v1248_v10 = vmul.f32 %v4409_v26, %v6032_v29  ;;  %v905_v0 = vadd.f32 %v4397_v15, %v873_v47  ;;  %v1451_v44 = vadd.f32 %v1419_v7, %v1383_v21  ;;  %v6033_v47 = vld [vmem:[#allocation30_spill] sm:$0xff] }
 0x21d   : > { %v2284_v57 = vsub.f32 0.0, %v2220_v1  ;;  %v1352_v16 = vmul.f32 %v4411_v27, %v4595_v3  ;;  %v1009_v2 = vmul.f32 %v4399_v18, %v4778_v34  ;;  %v1901_v40 = vmul.f32 %v4752_v11, %v1869_v17 }
 0x21e   : > { %v1144_v42 = vadd.f32 %v1112_v55, %v1040_v6  ;;  %v1420_v58 = vmul.f32 %v4413_v28, %v4682_v20  ;;  %v973_v54 = vadd.f32 %v941_v61, %v905_v0  ;;  %v4802_v31 = vadd.f32 %v1487_v33, %v1451_v44  ;;  %v4831_v44 = vld [vmem:[#allocation2 + $0xaa] sm:$0xff] }
 0x21f   : > { %v4798_v45 = vpop.eup %3514  ;;  %v2316_v38 = vsel %vm2252_vm5, %v2284_v57, %v2220_v1  ;;  %v1488_v3 = vmul.f32 %v4440_v46, %v4788_v5  ;;  %v1113_v43 = vmul.f32 %v4401_v19, %v4277_v4  ;;  %v1933_v63 = vadd.f32 -0.28449672, %v1901_v40 }
 0x220   : > { %v2348_v56 = vadd.f32 1.0, %v2316_v38  ;;  %v1774_v23 = vmul.f32 1.0614054, %v4798_v45  ;;  %v1212_v32 = vadd.f32 %v1180_v12, %v1144_v42  ;;  %v4810_v41 = vmul.f32 0.70710677, %v4802_v31 }
 0x221   : > { %v1041_v52 = vadd.f32 %v1009_v2, %v973_v54  ;;  %v1181_v60 = vmul.f32 %v4406_v24, %v4283_v8  ;;  %v874_v30 = vmul.f32 %v4392_v13, %v6028_v49  ;;  %v1965_v7 = vmul.f32 %v4752_v11, %v1933_v63  ;;  %v3616_v54 = vld [vmem:[#allocation2 + $0x81] sm:$0xff] }
 0x222   : > { %v2380_v51 = vmul.f32 %v2348_v56, %v1548_v37  ;;  %v1806_v33 = vadd.f32 -1.4531521, %v1774_v23  ;;  %v1280_v4 = vadd.f32 %v1248_v10, %v1212_v32  ;;  %v1615_v59 = vand.u32 2147483647, %v4810_v41  ;;  %v4841_v23 = vld [vmem:[#allocation2 + $0x99] sm:$0xff] }
 0x223   : > { %v3517_v50 = vpop.eup %3516  ;;  %v1145_v55 = vadd.f32 %v1113_v43, %v1041_v52  ;;  %v1249_v1 = vmul.f32 %v4409_v26, %v6033_v47  ;;  %v906_v21 = vadd.f32 %v4397_v15, %v874_v30  ;;  %v1997_v8 = vadd.f32 0.2548296, %v1965_v7  ;;  %v4849_v7 = vld [vmem:[#allocation2 + $0xb1] sm:$0xff] }
 0x224   : > { %3320 = vmatmul.mubr.f32.gmra.mxu1 %v2380_v51  ;;  %v1838_v49 = vmul.f32 %v4798_v45, %v1806_v33  ;;  %v1384_v37 = vadd.f32 %v1352_v16, %v1280_v4  ;;  %v942_v12 = vmul.f32 %v4394_v14, %v4756_v48  ;;  %v1647_v17 = vmul.f32 0.3275911, %v1615_v59 }
 0x225   : > { %v3519_v61 = vpop.eup %3518  ;;  %v1213_v6 = vadd.f32 %v1181_v60, %v1145_v55  ;;  %v1353_v29 = vmul.f32 %v4411_v27, %v6030_v22  ;;  %v1010_v10 = vmul.f32 %v4399_v18, %v4817_v39  ;;  %v2029_v0 = vmul.f32 %v4752_v11, %v1997_v8 }
 0x226   : > { %v1870_v15 = vadd.f32 1.4214138, %v1838_v49  ;;  %v1452_v57 = vadd.f32 %v1420_v58, %v1384_v37  ;;  %v974_v2 = vadd.f32 %v942_v12, %v906_v21  ;;  %v1679_v16 = vadd.f32 1.0, %v1647_v17 }
 0x227   : > { %v1281_v40 = vadd.f32 %v1249_v1, %v1213_v6  ;;  %v1421_v42 = vmul.f32 %v4413_v28, %v4759_v35  ;;  %v1114_v38 = vmul.f32 %v3616_v54, %v4401_v19  ;;  %v2189_v43 = vmul.f32 %v3517_v50, %v2029_v0  ;;  %v4860_v6 = vld [vmem:[#allocation2 + $0xb2] sm:$0xff] }
 0x228   : > { %v1902_v22 = vmul.f32 %v4798_v45, %v1870_v15  ;;  %v4837_v56 = vadd.f32 %v1488_v3, %v1452_v57  ;;  %v1042_v63 = vadd.f32 %v1010_v10, %v974_v2  ;;  %3520 = vrcp.f32 %v1679_v16 }
 0x229   : > { %v1385_v11 = vadd.f32 %v1353_v29, %v1281_v40  ;;  %v1489_v58 = vmul.f32 %v4440_v46, %v4831_v44  ;;  %v1182_v32 = vmul.f32 %v4841_v23, %v4406_v24  ;;  %v2221_v52 = vsub.f32 1.0, %v2189_v43 }
 0x22a   : > { %v1934_v60 = vadd.f32 -0.28449672, %v1902_v22  ;;  %v4846_v30 = vmul.f32 0.70710677, %v4837_v56  ;;  %vm2253_vm6 = vcmp.lt.f32.partialorder %v4689_v62, 0.0  ;;  %v1146_v51 = vadd.f32 %v1114_v38, %v1042_v63  ;;  %v4872_v38 = vld [vmem:[#allocation2 + $0xc0] sm:$0xff] }
 0x22b   : > { %v1453_v3 = vadd.f32 %v1421_v42, %v1385_v11  ;;  %v1250_v33 = vmul.f32 %v4849_v7, %v4409_v26  ;;  %v2285_v4 = vsub.f32 0.0, %v2221_v52  ;;  %v2063_v55 = vsub.f32 0.0, %v1615_v59 }
 0x22c   : > { %v1966_v50 = vmul.f32 %v4798_v45, %v1934_v60  ;;  %v1616_v47 = vand.u32 2147483647, %v4846_v30  ;;  %v1549_v1 = vmul.f32 0.5, %v4679_v25  ;;  %v1214_v8 = vadd.f32 %v1182_v32, %v1146_v51  ;;  %v4880_v32 = vld [vmem:[%s4193_s21] ss:$0 sm:$0xff] }
 0x22d   : > { %v4856_v21 = vadd.f32 %v1489_v58, %v1453_v3  ;;  %v1354_v62 = vmul.f32 %v4411_v27, %v4682_v20  ;;  %v2317_v49 = vsel %vm2253_vm6, %v2285_v4, %v2221_v52  ;;  %v1422_v25 = vmul.f32 %v4413_v28, %v4788_v5 }
 0x22e   : > { %v1998_v37 = vadd.f32 0.2548296, %v1966_v50  ;;  %v1648_v12 = vmul.f32 0.3275911, %v1616_v47  ;;  %v2064_v17 = vsub.f32 0.0, %v1616_v47  ;;  %v2349_v29 = vadd.f32 1.0, %v2317_v49 }
 0x22f   : > { %v4863_v10 = vmul.f32 0.70710677, %v4856_v21  ;;  %v1282_v0 = vadd.f32 %v1250_v33, %v1214_v8  ;;  %v1550_v15 = vmul.f32 0.5, %v4710_v36  ;;  %v2095_v2 = vmul.f32 %v2063_v55, %v1615_v59 }
 0x230   : > { %v2030_v57 = vmul.f32 %v4798_v45, %v1998_v37  ;;  %v1680_v20 = vadd.f32 1.0, %v1648_v12  ;;  %v2381_v16 = vmul.f32 %v2349_v29, %v1549_v1  ;;  %v1490_v54 = vmul.f32 %v4440_v46, %v4860_v6  ;;  %v3621_v29 = vld [vmem:[#allocation2 + $0xa9] sm:$0xff] }
 0x231   : > { %v1617_v40 = vand.u32 2147483647, %v4863_v10  ;;  %v1386_v42 = vadd.f32 %v1354_v62, %v1282_v0  ;;  %v2096_v22 = vmul.f32 %v2064_v17, %v1616_v47  ;;  %v875_v36 = vmul.f32 %v4392_v13, %v4731_v9  ;;  %v3620_v47 = vld [vmem:[#allocation2 + $0x91] sm:$0xff] }
 0x232   : > { %v2190_v43 = vmul.f32 %v3519_v61, %v2030_v57  ;;  %3522 = vrcp.f32 %v1680_v20  ;;  %3322 = vmatprep.mubr.f32.mxu1 %v2381_v16  ;;  %v943_v11 = vmul.f32 %v4394_v14, %v4778_v34  ;;  %vm2254_vm7 = vcmp.lt.f32.partialorder %v4720_v53, 0.0  ;;  %v4904_v20 = vld [vmem:[#allocation2 + $0xc1] sm:$0xff] }
 0x233   : > { %v1649_v45 = vmul.f32 0.3275911, %v1617_v40  ;;  %v2065_v59 = vsub.f32 0.0, %v1617_v40  ;;  %v1454_v63 = vadd.f32 %v1422_v25, %v1386_v42  ;;  %v907_v52 = vadd.f32 %v4880_v32, %v875_v36  ;;  %v4908_v16 = vld [vmem:[#allocation2 + $0xc8] sm:$0xff] }
 0x234   : > { %v2222_v58 = vsub.f32 1.0, %v2190_v43  ;;  %v1011_v61 = vmul.f32 %v4399_v18, %v4872_v38  ;;  %v2135_v60 = vmul.f32 1.442695, %v2095_v2  ;;  %v2137_v50 = vmul.f32 1.442695, %v2096_v22 }
 0x235   : > { %v1681_v3 = vadd.f32 1.0, %v1649_v45  ;;  %v2097_v9 = vmul.f32 %v2065_v59, %v1617_v40  ;;  %v4885_v51 = vadd.f32 %v1490_v54, %v1454_v63  ;;  %v4887_v33 = vpop.eup %3520  ;;  %v975_v55 = vadd.f32 %v943_v11, %v907_v52  ;;  %v4911_v54 = vld [vmem:[#allocation2 + $0xc2] sm:$0xff] }
 0x236   : > { %v2286_v4 = vsub.f32 0.0, %v2222_v58  ;;  %v1115_v1 = vmul.f32 %v3620_v47, %v4401_v19  ;;  %v4891_v8 = vmul.f32 0.5, %v4802_v31  ;;  %v1775_v62 = vmul.f32 1.0614054, %v4887_v33 }
 0x237   : > { %v4895_v49 = vmul.f32 0.5, %v4837_v56  ;;  %3524 = vrcp.f32 %v1681_v3  ;;  %v4900_v12 = vmul.f32 0.70710677, %v4885_v51  ;;  %v1043_v17 = vadd.f32 %v1011_v61, %v975_v55 }
 0x238   : > { %v2318_v37 = vsel %vm2254_vm7, %v2286_v4, %v2222_v58  ;;  %v1183_v0 = vmul.f32 %v3621_v29, %v4406_v24  ;;  %v1807_v57 = vadd.f32 -1.4531521, %v1775_v62  ;;  %3526 = vpow2.f32 %v2135_v60  ;;  %v4934_v62 = vld [vmem:[#allocation2 + $0xd8] sm:$0xff] }
 0x239   : > { %v2350_v25 = vadd.f32 1.0, %v2318_v37  ;;  %v2139_v31 = vmul.f32 1.442695, %v2097_v9  ;;  %3528 = vpow2.f32 %v2137_v50  ;;  %v1618_v2 = vand.u32 2147483647, %v4900_v12 }
 0x23a   : > { %v1147_v56 = vadd.f32 %v1115_v1, %v1043_v17  ;;  %v1251_v53 = vmul.f32 %v4904_v20, %v4409_v26  ;;  %v1839_v42 = vmul.f32 %v4887_v33, %v1807_v57  ;;  %v876_v43 = vmul.f32 %v4392_v13, %v4756_v48 }
 0x23b   : > { %v2382_v40 = vmul.f32 %v2350_v25, %v1550_v15  ;;  %v944_v22 = vmul.f32 %v4394_v14, %v4817_v39  ;;  %v1650_v36 = vmul.f32 0.3275911, %v1618_v2  ;;  %v2066_v45 = vsub.f32 0.0, %v1618_v2 }
 0x23c   : > { %v1215_v59 = vadd.f32 %v1183_v0, %v1147_v56  ;;  %v1355_v63 = vmul.f32 %v4411_v27, %v4759_v35  ;;  %v1871_v11 = vadd.f32 1.4214138, %v1839_v42  ;;  %3530 = vpow2.f32 %v2139_v31  ;;  %v4936_v0 = vld [vmem:[#allocation2 + $0xc9] sm:$0xff] }
 0x23d   : > { %3323 = vmatmul.mubr.f32.gmra.mxu1 %v2382_v40  ;;  %v908_v15 = vadd.f32 %v4880_v32, %v876_v43  ;;  %v1012_v58 = vmul.f32 %v4399_v18, %v4908_v16  ;;  %v1682_v52 = vadd.f32 1.0, %v1650_v36  ;;  %v1423_v48 = vmul.f32 %v4413_v28, %v4831_v44 }
 0x23e   : > { %v1283_v61 = vadd.f32 %v1251_v53, %v1215_v59  ;;  %v1491_v60 = vmul.f32 %v4440_v46, %v4911_v54  ;;  %v1903_v35 = vmul.f32 %v4887_v33, %v1871_v11  ;;  %v1116_v4 = vmul.f32 %v4841_v23, %v4401_v19 }
 0x23f   : > { %v4926_v3 = vpop.eup %3522  ;;  %v976_v9 = vadd.f32 %v944_v22, %v908_v15  ;;  %v1184_v50 = vmul.f32 %v4849_v7, %v4406_v24  ;;  %3532 = vrcp.f32 %v1682_v52  ;;  %v2098_v47 = vmul.f32 %v2066_v45, %v1618_v2  ;;  %v4960_v15 = vld [vmem:[#allocation2 + $0xca] sm:$0xff] }
 0x240   : > { %v1776_v55 = vmul.f32 1.0614054, %v4926_v3  ;;  %v1387_v1 = vadd.f32 %v1355_v63, %v1283_v61  ;;  %v1935_v37 = vadd.f32 -0.28449672, %v1903_v35  ;;  %v1252_v25 = vmul.f32 %v4936_v0, %v4409_v26 }
 0x241   : > { %v1044_v17 = vadd.f32 %v1012_v58, %v976_v9  ;;  %v877_v23 = vmul.f32 %v4392_v13, %v4778_v34  ;;  %v1356_v56 = vmul.f32 %v4411_v27, %v4788_v5  ;;  %v945_v2 = vmul.f32 %v4394_v14, %v4872_v38 }
 0x242   : > { %v1808_v57 = vadd.f32 -1.4531521, %v1776_v55  ;;  %v1455_v31 = vadd.f32 %v1423_v48, %v1387_v1  ;;  %v1967_v53 = vmul.f32 %v4887_v33, %v1935_v37  ;;  %v1013_v43 = vmul.f32 %v4399_v18, %v4934_v62 }
 0x243   : > { %v1148_v40 = vadd.f32 %v1116_v4, %v1044_v17  ;;  %v909_v42 = vadd.f32 %v4880_v32, %v877_v23  ;;  %vm2255_vm8 = vcmp.lt.f32.partialorder %v4810_v41, 0.0  ;;  %v1424_v5 = vmul.f32 %v4413_v28, %v4860_v6 }
 0x244   : > { %v4950_v22 = vpop.eup %3524  ;;  %v1840_v34 = vmul.f32 %v4926_v3, %v1808_v57  ;;  %v4954_v36 = vadd.f32 %v1491_v60, %v1455_v31  ;;  %v1117_v45 = vmul.f32 %v3621_v29, %v4401_v19  ;;  %v1999_v59 = vadd.f32 0.2548296, %v1967_v53 }
 0x245   : > { %v1777_v63 = vmul.f32 1.0614054, %v4950_v22  ;;  %v1216_v11 = vadd.f32 %v1184_v50, %v1148_v40  ;;  %v977_v58 = vadd.f32 %v945_v2, %v909_v42  ;;  %v3527_v52 = vpop.eup %3526  ;;  %v2141_v48 = vmul.f32 1.442695, %v2098_v47  ;;  %v4972_v47 = vld [vmem:[#allocation2 + $0xd9] sm:$0xff] }
 0x246   : > { %v1872_v61 = vadd.f32 1.4214138, %v1840_v34  ;;  %v4963_v35 = vmul.f32 0.70710677, %v4954_v36  ;;  %v1185_v60 = vmul.f32 %v4904_v20, %v4406_v24  ;;  %v3529_v9 = vpop.eup %3528  ;;  %v2031_v4 = vmul.f32 %v4887_v33, %v1999_v59 }
 0x247   : > { %v1809_v29 = vadd.f32 -1.4531521, %v1777_v63  ;;  %v1284_v55 = vadd.f32 %v1252_v25, %v1216_v11  ;;  %v1045_v1 = vadd.f32 %v1013_v43, %v977_v58  ;;  %v1492_v17 = vmul.f32 %v4440_v46, %v4960_v15 }
 0x248   : > { %v1904_v50 = vmul.f32 %v4926_v3, %v1872_v61  ;;  %v1619_v37 = vand.u32 2147483647, %v4963_v35  ;;  %v1253_v23 = vmul.f32 %v4972_v47, %v4409_v26  ;;  %v2191_v57 = vmul.f32 %v3527_v52, %v2031_v4 }
 0x249   : > { %v1841_v31 = vmul.f32 %v4950_v22, %v1809_v29  ;;  %v1388_v2 = vadd.f32 %v1356_v56, %v1284_v55  ;;  %v1149_v33 = vadd.f32 %v1117_v45, %v1045_v1  ;;  %v3531_v53 = vpop.eup %3530  ;;  %3534 = vpow2.f32 %v2141_v48  ;;  %v4985_v55 = vld [vmem:[#allocation2 + $0xda] sm:$0xff] }
 0x24a   : > { %v1936_v25 = vadd.f32 -0.28449672, %v1904_v50  ;;  %v1651_v40 = vmul.f32 0.3275911, %v1619_v37  ;;  %v2067_v42 = vsub.f32 0.0, %v1619_v37  ;;  %v2223_v43 = vsub.f32 1.0, %v2191_v57 }
 0x24b   : > { %v1873_v34 = vadd.f32 1.4214138, %v1841_v31  ;;  %v1456_v59 = vadd.f32 %v1424_v5, %v1388_v2  ;;  %v1217_v63 = vadd.f32 %v1185_v60, %v1149_v33  ;;  %v1357_v52 = vmul.f32 %v4411_v27, %v4831_v44 }
 0x24c   : > { %v1968_v11 = vmul.f32 %v4926_v3, %v1936_v25  ;;  %v1683_v58 = vadd.f32 1.0, %v1651_v40  ;;  %v2099_v61 = vmul.f32 %v2067_v42, %v1619_v37  ;;  %v4980_v4 = vpop.eup %3532  ;;  %v2287_v56 = vsub.f32 0.0, %v2223_v43 }
 0x24d   : > { %v1905_v45 = vmul.f32 %v4950_v22, %v1873_v34  ;;  %v4983_v29 = vadd.f32 %v1492_v17, %v1456_v59  ;;  %v1285_v48 = vadd.f32 %v1253_v23, %v1217_v63  ;;  %vm2256_vm9 = vcmp.lt.f32.partialorder %v4846_v30, 0.0 }
 0x24e   : > { %v2000_v1 = vadd.f32 0.2548296, %v1968_v11  ;;  %v1778_v5 = vmul.f32 1.0614054, %v4980_v4  ;;  %3536 = vrcp.f32 %v1683_v58  ;;  %v2319_v60 = vsel %vm2255_vm8, %v2287_v56, %v2223_v43  ;;  %v5005_v58 = vld [vmem:[#allocation2 + $0xe0] sm:$0xff] }
 0x24f   : > { %v1937_v44 = vadd.f32 -0.28449672, %v1905_v45  ;;  %v4992_v50 = vmul.f32 0.70710677, %v4983_v29  ;;  %v1425_v37 = vmul.f32 %v4413_v28, %v4911_v54  ;;  %v2351_v17 = vadd.f32 1.0, %v2319_v60 }
 0x250   : > { %v2032_v23 = vmul.f32 %v4926_v3, %v2000_v1  ;;  %v1810_v57 = vadd.f32 -1.4531521, %v1778_v5  ;;  %v1493_v31 = vmul.f32 %v4440_v46, %v4985_v55  ;;  %v2143_v33 = vmul.f32 1.442695, %v2099_v61 }
 0x251   : > { %v1969_v2 = vmul.f32 %v4950_v22, %v1937_v44  ;;  %v1620_v41 = vand.u32 2147483647, %v4992_v50  ;;  %v1389_v25 = vadd.f32 %v1357_v52, %v1285_v48  ;;  %v2383_v40 = vmul.f32 %v2351_v17, %v4891_v8 }
 0x252   : > { %v2192_v42 = vmul.f32 %v3529_v9, %v2032_v23  ;;  %v1842_v43 = vmul.f32 %v4980_v4, %v1810_v57  ;;  %v878_v34 = vmul.f32 %v4392_v13, %v4817_v39  ;;  %v946_v8 = vmul.f32 %v4394_v14, %v4908_v16 }
 0x253   : > { %v2001_v59 = vadd.f32 0.2548296, %v1969_v2  ;;  %v1652_v3 = vmul.f32 0.3275911, %v1620_v41  ;;  %v2068_v63 = vsub.f32 0.0, %v1620_v41  ;;  %v1457_v11 = vadd.f32 %v1425_v37, %v1389_v25  ;;  %3325 = vmatprep.mubr.f32.mxu1 %v2383_v40 }
 0x254   : > { %v2224_v56 = vsub.f32 1.0, %v2192_v42  ;;  %v1874_v61 = vadd.f32 1.4214138, %v1842_v43  ;;  %v910_v45 = vadd.f32 %v4880_v32, %v878_v34  ;;  %v1014_v44 = vmul.f32 %v4399_v18, %v5005_v58 }
 0x255   : > { %v2033_v9 = vmul.f32 %v4950_v22, %v2001_v59  ;;  %v1684_v52 = vadd.f32 1.0, %v1652_v3  ;;  %v2100_v48 = vmul.f32 %v2068_v63, %v1620_v41  ;;  %v5011_v1 = vadd.f32 %v1493_v31, %v1457_v11  ;;  %v5032_v63 = vld [vmem:[#allocation2 + $0xe1] sm:$0xff] }
 0x256   : > { %v2288_v39 = vsub.f32 0.0, %v2224_v56  ;;  %v1906_v5 = vmul.f32 %v4980_v4, %v1874_v61  ;;  %v978_v60 = vadd.f32 %v946_v8, %v910_v45  ;;  %v3535_v37 = vpop.eup %3534  ;;  %v1553_v17 = vmul.f32 0.5, %v4856_v21 }
 0x257   : > { %v2193_v23 = vmul.f32 %v3531_v53, %v2033_v9  ;;  %vm2257_vm10 = vcmp.lt.f32.partialorder %v4863_v10, 0.0  ;;  %3538 = vrcp.f32 %v1684_v52  ;;  %v5021_v31 = vmul.f32 0.70710677, %v5011_v1 }
 0x258   : > { %v2320_v22 = vsel %vm2256_vm9, %v2288_v39, %v2224_v56  ;;  %v1938_v57 = vadd.f32 -0.28449672, %v1906_v5  ;;  %v1046_v2 = vadd.f32 %v1014_v44, %v978_v60  ;;  %3540 = vpow2.f32 %v2143_v33 }
 0x259   : > { %v2352_v41 = vadd.f32 1.0, %v2320_v22  ;;  %v2225_v25 = vsub.f32 1.0, %v2193_v23  ;;  %v1118_v40 = vmul.f32 %v4849_v7, %v4401_v19  ;;  %v2145_v53 = vmul.f32 1.442695, %v2100_v48  ;;  %v5036_v7 = vld [vmem:[#allocation2 + $0xe2] sm:$0xff] }
 0x25a   : > { %v1970_v21 = vmul.f32 %v4980_v4, %v1938_v57  ;;  %v1621_v42 = vand.u32 2147483647, %v5021_v31  ;;  %v1186_v30 = vmul.f32 %v4936_v0, %v4406_v24  ;;  %v1254_v33 = vmul.f32 %v5032_v63, %v4409_v26 }
 0x25b   : > { %v5029_v43 = vpop.eup %3536  ;;  %v2384_v34 = vmul.f32 %v2352_v41, %v4895_v49  ;;  %v2289_v59 = vsub.f32 0.0, %v2225_v25  ;;  %v1150_v3 = vadd.f32 %v1118_v40, %v1046_v2  ;;  %v1358_v45 = vmul.f32 %v4411_v27, %v4860_v6  ;;  %v5048_v6 = vld [vmem:[#allocation2 + $0xf0] sm:$0xff] }
 0x25c   : > { %v2002_v11 = vadd.f32 0.2548296, %v1970_v21  ;;  %v1779_v56 = vmul.f32 1.0614054, %v5029_v43  ;;  %v1653_v61 = vmul.f32 0.3275911, %v1621_v42  ;;  %v1426_v52 = vmul.f32 %v4413_v28, %v4960_v15 }
 0x25d   : > { %3326 = vmatmul.mubr.f32.gmra.mxu1 %v2384_v34  ;;  %v2321_v49 = vsel %vm2257_vm10, %v2289_v59, %v2225_v25  ;;  %v2069_v8 = vsub.f32 0.0, %v1621_v42  ;;  %v1218_v9 = vadd.f32 %v1186_v30, %v1150_v3  ;;  %v1494_v22 = vmul.f32 %v4440_v46, %v5036_v7 }
 0x25e   : > { %v2353_v48 = vadd.f32 1.0, %v2321_v49  ;;  %v2034_v39 = vmul.f32 %v4980_v4, %v2002_v11  ;;  %v1811_v5 = vadd.f32 -1.4531521, %v1779_v56  ;;  %v1685_v60 = vadd.f32 1.0, %v1653_v61 }
 0x25f   : > { %v2101_v44 = vmul.f32 %v2069_v8, %v1621_v42  ;;  %v1286_v23 = vadd.f32 %v1254_v33, %v1218_v9  ;;  %v879_v10 = vmul.f32 %v4392_v13, %v4872_v38  ;;  %v947_v21 = vmul.f32 %v4394_v14, %v4934_v62  ;;  %v5070_v8 = vld [vmem:[#allocation2 + $0xf1] sm:$0xff] }
 0x260   : > { %v2385_v57 = vmul.f32 %v2353_v48, %v1553_v17  ;;  %v2194_v2 = vmul.f32 %v3535_v37, %v2034_v39  ;;  %v1843_v41 = vmul.f32 %v5029_v43, %v1811_v5  ;;  %3542 = vrcp.f32 %v1685_v60  ;;  %v5081_v60 = vld [vmem:[#allocation2 + $0xf8] sm:$0xff] }
 0x261   : > { %v2147_v25 = vmul.f32 1.442695, %v2101_v44  ;;  %v1390_v40 = vadd.f32 %v1358_v45, %v1286_v23  ;;  %v911_v4 = vadd.f32 %v4880_v32, %v879_v10  ;;  %v1554_v42 = vmul.f32 0.5, %v4885_v51 }
 0x262   : > { %3328 = vmatprep.mubr.f32.mxu1 %v2385_v57  ;;  %v2226_v30 = vsub.f32 1.0, %v2194_v2  ;;  %v1875_v34 = vadd.f32 1.4214138, %v1843_v41  ;;  %v1015_v38 = vmul.f32 %v4399_v18, %v5048_v6  ;;  %vm2258_vm11 = vcmp.lt.f32.partialorder %v4900_v12, 0.0 }
 0x263   : > { %3544 = vpow2.f32 %v2145_v53  ;;  %v1458_v37 = vadd.f32 %v1426_v52, %v1390_v40  ;;  %v979_v17 = vadd.f32 %v947_v21, %v911_v4  ;;  %v1119_v11 = vmul.f32 %v4904_v20, %v4401_v19 }
 0x264   : > { %v5060_v59 = vpop.eup %3538  ;;  %v2290_v3 = vsub.f32 0.0, %v2226_v30  ;;  %v1907_v33 = vmul.f32 %v5029_v43, %v1875_v34  ;;  %3546 = vpow2.f32 %v2147_v25  ;;  %v1187_v12 = vmul.f32 %v4972_v47, %v4406_v24 }
 0x265   : > { %v1780_v51 = vmul.f32 1.0614054, %v5060_v59  ;;  %v5066_v56 = vadd.f32 %v1494_v22, %v1458_v37  ;;  %v1047_v61 = vadd.f32 %v1015_v38, %v979_v17  ;;  %v3541_v53 = vpop.eup %3540  ;;  %v1255_v9 = vmul.f32 %v5070_v8, %v4409_v26  ;;  %v5084_v22 = vld [vmem:[#allocation2 + $0xf2] sm:$0xff] }
 0x266   : > { %v2322_v45 = vsel %vm2258_vm11, %v2290_v3, %v2226_v30  ;;  %v1939_v49 = vadd.f32 -0.28449672, %v1907_v33  ;;  %v880_v52 = vmul.f32 %v4392_v13, %v4908_v16  ;;  %v1359_v5 = vmul.f32 %v4411_v27, %v4911_v54 }
 0x267   : > { %v2354_v20 = vadd.f32 1.0, %v2322_v45  ;;  %v1812_v48 = vadd.f32 -1.4531521, %v1780_v51  ;;  %v5077_v39 = vmul.f32 0.70710677, %v5066_v56  ;;  %v1151_v23 = vadd.f32 %v1119_v11, %v1047_v61  ;;  %v5105_v45 = vld [vmem:[#allocation2 + $0xf9] sm:$0xff] }
 0x268   : > { %v1971_v44 = vmul.f32 %v5029_v43, %v1939_v49  ;;  %v912_v10 = vadd.f32 %v4880_v32, %v880_v52  ;;  %v948_v16 = vmul.f32 %v4394_v14, %v5005_v58  ;;  %v1427_v54 = vmul.f32 %v4413_v28, %v4985_v55 }
 0x269   : > { %v2386_v57 = vmul.f32 %v2354_v20, %v1554_v42  ;;  %v1844_v2 = vmul.f32 %v5060_v59, %v1812_v48  ;;  %v1622_v41 = vand.u32 2147483647, %v5077_v39  ;;  %v1219_v40 = vadd.f32 %v1187_v12, %v1151_v23 }
 0x26a   : > { %v2003_v25 = vadd.f32 0.2548296, %v1971_v44  ;;  %v980_v4 = vadd.f32 %v948_v16, %v912_v10  ;;  %v1016_v21 = vmul.f32 %v4399_v18, %v5081_v60  ;;  %v1495_v38 = vmul.f32 %v4440_v46, %v5084_v22 }
 0x26b   : > { %3329 = vmatmul.mubr.f32.gmra.mxu1 %v2386_v57  ;;  %v1876_v30 = vadd.f32 1.4214138, %v1844_v2  ;;  %v1654_v34 = vmul.f32 0.3275911, %v1622_v41  ;;  %v1120_v42 = vmul.f32 %v4936_v0, %v4401_v19  ;;  %v1287_v17 = vadd.f32 %v1255_v9, %v1219_v40  ;;  %v5112_v2 = vld [vmem:[#allocation2 + $0xfa] sm:$0xff] }
 0x26c   : > { %v2035_v37 = vmul.f32 %v5029_v43, %v2003_v25  ;;  %v1048_v3 = vadd.f32 %v1016_v21, %v980_v4  ;;  %v1188_v33 = vmul.f32 %v5032_v63, %v4406_v24  ;;  %v2070_v12 = vsub.f32 0.0, %v1622_v41  ;;  %v5121_v4 = vld [vmem:[#allocation2 + $0x108] sm:$0xff] }
 0x26d   : > { %v5102_v11 = vpop.eup %3542  ;;  %v1908_v51 = vmul.f32 %v5060_v59, %v1876_v30  ;;  %v1686_v61 = vadd.f32 1.0, %v1654_v34  ;;  %v1256_v49 = vmul.f32 %v5105_v45, %v4409_v26  ;;  %v1391_v43 = vadd.f32 %v1359_v5, %v1287_v17 }
 0x26e   : > { %v2195_v52 = vmul.f32 %v3541_v53, %v2035_v37  ;;  %v1781_v0 = vmul.f32 1.0614054, %v5102_v11  ;;  %v1152_v9 = vadd.f32 %v1120_v42, %v1048_v3  ;;  %v1555_v20 = vmul.f32 0.5, %v4954_v36 }
 0x26f   : > { %vm2259_vm12 = vcmp.lt.f32.partialorder %v4963_v35, 0.0  ;;  %v1940_v48 = vadd.f32 -0.28449672, %v1908_v51  ;;  %3548 = vrcp.f32 %v1686_v61  ;;  %v1459_v16 = vadd.f32 %v1427_v54, %v1391_v43 }
 0x270   : > { %v3545_v44 = vpop.eup %3544  ;;  %v2227_v23 = vsub.f32 1.0, %v2195_v52  ;;  %v1813_v10 = vadd.f32 -1.4531521, %v1781_v0  ;;  %v1220_v57 = vadd.f32 %v1188_v33, %v1152_v9  ;;  %v2102_v40 = vmul.f32 %v2070_v12, %v1622_v41 }
 0x271   : > { %v5114_v25 = vpop.eup %3546  ;;  %v1972_v53 = vmul.f32 %v5060_v59, %v1940_v48  ;;  %v1360_v5 = vmul.f32 %v4411_v27, %v4960_v15  ;;  %v1428_v36 = vmul.f32 %v4413_v28, %v5036_v7  ;;  %v5124_v54 = vadd.f32 %v1495_v38, %v1459_v16 }
 0x272   : > { %v2291_v21 = vsub.f32 0.0, %v2227_v23  ;;  %v1845_v30 = vmul.f32 %v5102_v11, %v1813_v10  ;;  %v1288_v34 = vadd.f32 %v1256_v49, %v1220_v57  ;;  %v1496_v37 = vmul.f32 %v4440_v46, %v5112_v2 }
 0x273   : > { %v2004_v42 = vadd.f32 0.2548296, %v1972_v53  ;;  %v881_v41 = vmul.f32 %v4392_v13, %v4934_v62  ;;  %v949_v15 = vmul.f32 %v4394_v14, %v5048_v6  ;;  %v5135_v33 = vmul.f32 0.70710677, %v5124_v54 }
 0x274   : > { %v2323_v17 = vsel %vm2259_vm12, %v2291_v21, %v2227_v23  ;;  %v1877_v3 = vadd.f32 1.4214138, %v1845_v30  ;;  %v1017_v38 = vmul.f32 %v4399_v18, %v5121_v4  ;;  %v1392_v12 = vadd.f32 %v1360_v5, %v1288_v34 }
 0x275   : > { %v2355_v51 = vadd.f32 1.0, %v2323_v17  ;;  %v2036_v61 = vmul.f32 %v5060_v59, %v2004_v42  ;;  %v913_v49 = vadd.f32 %v4880_v32, %v881_v41  ;;  %v2149_v52 = vmul.f32 1.442695, %v2102_v40 }
 0x276   : > { %v1909_v62 = vmul.f32 %v5102_v11, %v1877_v3  ;;  %v1623_v0 = vand.u32 2147483647, %v5135_v33  ;;  %v1121_v35 = vmul.f32 %v4972_v47, %v4401_v19  ;;  %v1460_v48 = vadd.f32 %v1428_v36, %v1392_v12  ;;  %v5164_v12 = vld [vmem:[#allocation2 + $0x10a] sm:$0xff] }
 0x277   : > { %v2387_v43 = vmul.f32 %v2355_v51, %v1555_v20  ;;  %v2196_v9 = vmul.f32 %v3545_v44, %v2036_v61  ;;  %v981_v23 = vadd.f32 %v949_v15, %v913_v49  ;;  %vm2260_vm13 = vcmp.lt.f32.partialorder %v4992_v50, 0.0 }
 0x278   : > { %v1941_v10 = vadd.f32 -0.28449672, %v1909_v62  ;;  %v1655_v16 = vmul.f32 0.3275911, %v1623_v0  ;;  %v2071_v59 = vsub.f32 0.0, %v1623_v0  ;;  %v5145_v53 = vadd.f32 %v1496_v37, %v1460_v48  ;;  %v5157_v37 = vld [vmem:[#allocation2 + $0x109] sm:$0xff] }
 0x279   : > { %3331 = vmatprep.mubr.f32.mxu1 %v2387_v43  ;;  %v2228_v57 = vsub.f32 1.0, %v2196_v9  ;;  %v1049_v5 = vadd.f32 %v1017_v38, %v981_v23  ;;  %v1189_v47 = vmul.f32 %v5070_v8, %v4406_v24  ;;  %3550 = vpow2.f32 %v2149_v52  ;;  %v5170_v43 = vld [vmem:[#allocation2 + $0x110] sm:$0xff] }
 0x27a   : > { %v1973_v40 = vmul.f32 %v5102_v11, %v1941_v10  ;;  %v1687_v21 = vadd.f32 1.0, %v1655_v16  ;;  %v5152_v44 = vmul.f32 0.70710677, %v5145_v53  ;;  %v1556_v34 = vmul.f32 0.5, %v4983_v29 }
 0x27b   : > { %v2292_v20 = vsub.f32 0.0, %v2228_v57  ;;  %v1153_v36 = vadd.f32 %v1121_v35, %v1049_v5  ;;  %v1257_v50 = vmul.f32 %v5157_v37, %v4409_v26  ;;  %v2103_v17 = vmul.f32 %v2071_v59, %v1623_v0 }
 0x27c   : > { %v5154_v30 = vpop.eup %3548  ;;  %v2005_v42 = vadd.f32 0.2548296, %v1973_v40  ;;  %3552 = vrcp.f32 %v1687_v21  ;;  %v1624_v3 = vand.u32 2147483647, %v5152_v44  ;;  %v1361_v29 = vmul.f32 %v4411_v27, %v4985_v55 }
 0x27d   : > { %v2324_v41 = vsel %vm2260_vm13, %v2292_v20, %v2228_v57  ;;  %v1782_v15 = vmul.f32 1.0614054, %v5154_v30  ;;  %v1221_v61 = vadd.f32 %v1189_v47, %v1153_v36  ;;  %v1429_v35 = vmul.f32 %v4413_v28, %v5084_v22 }
 0x27e   : > { %v2356_v38 = vadd.f32 1.0, %v2324_v41  ;;  %v2037_v51 = vmul.f32 %v5102_v11, %v2005_v42  ;;  %v1656_v62 = vmul.f32 0.3275911, %v1624_v3  ;;  %v2072_v52 = vsub.f32 0.0, %v1624_v3 }
 0x27f   : > { %v1814_v49 = vadd.f32 -1.4531521, %v1782_v15  ;;  %v1289_v48 = vadd.f32 %v1257_v50, %v1221_v61  ;;  %v882_v11 = vmul.f32 %v4392_v13, %v5005_v58  ;;  %v1497_v55 = vmul.f32 %v4440_v46, %v5164_v12 }
 0x280   : > { %v2388_v0 = vmul.f32 %v2356_v38, %v1556_v34  ;;  %v2197_v9 = vmul.f32 %v5114_v25, %v2037_v51  ;;  %v1688_v10 = vadd.f32 1.0, %v1656_v62  ;;  %v950_v16 = vmul.f32 %v4394_v14, %v5081_v60  ;;  %v5195_v51 = vld [vmem:[#allocation2 + $0x120] sm:$0xff]  ;;  %v5202_v62 = vld [vmem:[#allocation2 + $0x111] sm:$0xff] }
 0x281   : > { %v1846_v23 = vmul.f32 %v5154_v30, %v1814_v49  ;;  %v1393_v59 = vadd.f32 %v1361_v29, %v1289_v48  ;;  %v914_v5 = vadd.f32 %v4880_v32, %v882_v11  ;;  %v1018_v25 = vmul.f32 %v4399_v18, %v5170_v43 }
 0x282   : > { %3332 = vmatmul.mubr.f32.gmra.mxu1 %v2388_v0  ;;  %v2229_v57 = vsub.f32 1.0, %v2197_v9  ;;  %vm2261_vm14 = vcmp.lt.f32.partialorder %v5021_v31, 0.0  ;;  %3554 = vrcp.f32 %v1688_v10  ;;  %v2104_v40 = vmul.f32 %v2072_v52, %v1624_v3 }
 0x283   : > { %v1878_v58 = vadd.f32 1.4214138, %v1846_v23  ;;  %v1461_v47 = vadd.f32 %v1429_v35, %v1393_v59  ;;  %v982_v20 = vadd.f32 %v950_v16, %v914_v5  ;;  %v1122_v36 = vmul.f32 %v5032_v63, %v4401_v19  ;;  %v5219_v59 = vld [vmem:[#allocation2 + $0x112] sm:$0xff] }
 0x284   : > { %v2293_v21 = vsub.f32 0.0, %v2229_v57  ;;  %v1557_v34 = vmul.f32 0.5, %v5011_v1  ;;  %v5188_v42 = vmul.f32 0.5, %v5066_v56  ;;  %v2151_v41 = vmul.f32 1.442695, %v2103_v17 }
 0x285   : > { %v1910_v50 = vmul.f32 %v5154_v30, %v1878_v58  ;;  %v5191_v38 = vadd.f32 %v1497_v55, %v1461_v47  ;;  %v1050_v31 = vadd.f32 %v1018_v25, %v982_v20  ;;  %v1190_v3 = vmul.f32 %v5105_v45, %v4406_v24 }
 0x286   : > { %v2325_v15 = vsel %vm2261_vm14, %v2293_v21, %v2229_v57  ;;  %v2153_v63 = vmul.f32 1.442695, %v2104_v40  ;;  %v883_v1 = vmul.f32 %v4392_v13, %v5048_v6  ;;  %v3551_v56 = vpop.eup %3550  ;;  %v1258_v52 = vmul.f32 %v5202_v62, %v4409_v26 }
 0x287   : > { %v2357_v61 = vadd.f32 1.0, %v2325_v15  ;;  %v1942_v29 = vadd.f32 -0.28449672, %v1910_v50  ;;  %v5200_v49 = vmul.f32 0.70710677, %v5191_v38  ;;  %v1154_v17 = vadd.f32 %v1122_v36, %v1050_v31 }
 0x288   : > { %v951_v35 = vmul.f32 %v4394_v14, %v5121_v4  ;;  %v915_v6 = vadd.f32 %v4880_v32, %v883_v1  ;;  %v1019_v11 = vmul.f32 %v4399_v18, %v5195_v51  ;;  %vm2262_vm15 = vcmp.lt.f32.partialorder %v5077_v39, 0.0 }
 0x289   : > { %v5208_v0 = vpop.eup %3552  ;;  %v2389_v9 = vmul.f32 %v2357_v61, %v1557_v34  ;;  %v1974_v48 = vmul.f32 %v5154_v30, %v1942_v29  ;;  %v1625_v10 = vand.u32 2147483647, %v5200_v49  ;;  %v1222_v55 = vadd.f32 %v1190_v3, %v1154_v17  ;;  %v5231_v61 = vld [vmem:[#allocation2 + $0x121] sm:$0xff] }
 0x28a   : > { %v1783_v23 = vmul.f32 1.0614054, %v5208_v0  ;;  %v1362_v16 = vmul.f32 %v4411_v27, %v5036_v7  ;;  %3556 = vpow2.f32 %v2151_v41  ;;  %v983_v5 = vadd.f32 %v951_v35, %v915_v6 }
 0x28b   : > { %3334 = vmatprep.mubr.f32.mxu1 %v2389_v9  ;;  %v2006_v57 = vadd.f32 0.2548296, %v1974_v48  ;;  %v1123_v25 = vmul.f32 %v5070_v8, %v4401_v19  ;;  %v1657_v40 = vmul.f32 0.3275911, %v1625_v10  ;;  %v1290_v21 = vadd.f32 %v1258_v52, %v1222_v55  ;;  %v5242_v48 = vld [vmem:[#allocation2 + $0x128] sm:$0xff] }
 0x28c   : > { %v1815_v58 = vadd.f32 -1.4531521, %v1783_v23  ;;  %v1430_v47 = vmul.f32 %v4413_v28, %v5112_v2  ;;  %3558 = vpow2.f32 %v2153_v63  ;;  %v1051_v36 = vadd.f32 %v1019_v11, %v983_v5 }
 0x28d   : > { %v2038_v20 = vmul.f32 %v5154_v30, %v2006_v57  ;;  %v1191_v7 = vmul.f32 %v5157_v37, %v4406_v24  ;;  %v1689_v50 = vadd.f32 1.0, %v1657_v40  ;;  %v1394_v41 = vadd.f32 %v1362_v16, %v1290_v21 }
 0x28e   : > { %v1847_v34 = vmul.f32 %v5208_v0, %v1815_v58  ;;  %v1498_v8 = vmul.f32 %v4440_v46, %v5219_v59  ;;  %v2073_v31 = vsub.f32 0.0, %v1625_v10  ;;  %v1155_v3 = vadd.f32 %v1123_v25, %v1051_v36 }
 0x28f   : > { %v2198_v15 = vmul.f32 %v3551_v56, %v2038_v20  ;;  %v1259_v30 = vmul.f32 %v5231_v61, %v4409_v26  ;;  %v5235_v29 = vpop.eup %3554  ;;  %3560 = vrcp.f32 %v1689_v50  ;;  %v1462_v1 = vadd.f32 %v1430_v47, %v1394_v41  ;;  %v5240_v56 = vld [vmem:[#allocation2 + $0x122] sm:$0xff] }
 0x290   : > { %v1879_v63 = vadd.f32 1.4214138, %v1847_v34  ;;  %v1363_v17 = vmul.f32 %v4411_v27, %v5084_v22  ;;  %v1784_v35 = vmul.f32 1.0614054, %v5235_v29  ;;  %v1223_v9 = vadd.f32 %v1191_v7, %v1155_v3 }
 0x291   : > { %v2230_v52 = vsub.f32 1.0, %v2198_v15  ;;  %v884_v6 = vmul.f32 %v4392_v13, %v5081_v60  ;;  %v5247_v23 = vadd.f32 %v1498_v8, %v1462_v1  ;;  %v1431_v55 = vmul.f32 %v4413_v28, %v5164_v12 }
 0x292   : > { %v1911_v11 = vmul.f32 %v5208_v0, %v1879_v63  ;;  %v952_v22 = vmul.f32 %v4394_v14, %v5170_v43  ;;  %v1816_v57 = vadd.f32 -1.4531521, %v1784_v35  ;;  %v1291_v5 = vadd.f32 %v1259_v30, %v1223_v9 }
 0x293   : > { %v2294_v16 = vsub.f32 0.0, %v2230_v52  ;;  %v916_v25 = vadd.f32 %v4880_v32, %v884_v6  ;;  %v5255_v40 = vmul.f32 0.70710677, %v5247_v23  ;;  %v1499_v60 = vmul.f32 %v4440_v46, %v5240_v56 }
 0x294   : > { %v1943_v58 = vadd.f32 -0.28449672, %v1911_v11  ;;  %v1020_v21 = vmul.f32 %v4399_v18, %v5242_v48  ;;  %v1848_v20 = vmul.f32 %v5235_v29, %v1816_v57  ;;  %v1395_v36 = vadd.f32 %v1363_v17, %v1291_v5 }
 0x295   : > { %v2326_v47 = vsel %vm2262_vm15, %v2294_v16, %v2230_v52  ;;  %v984_v7 = vadd.f32 %v952_v22, %v916_v25  ;;  %v2105_v41 = vmul.f32 %v2073_v31, %v1625_v10  ;;  %v1626_v8 = vand.u32 2147483647, %v5255_v40  ;;  %v5275_v16 = vld [vmem:[#allocation2 + $0x129] sm:$0xff] }
 0x296   : > { %v2358_v34 = vadd.f32 1.0, %v2326_v47  ;;  %v1975_v50 = vmul.f32 %v5208_v0, %v1943_v58  ;;  %v1880_v15 = vadd.f32 1.4214138, %v1848_v20  ;;  %v1463_v3 = vadd.f32 %v1431_v55, %v1395_v36 }
 0x297   : > { %v1052_v30 = vadd.f32 %v1020_v21, %v984_v7  ;;  %v1124_v63 = vmul.f32 %v5105_v45, %v4401_v19  ;;  %v3557_v1 = vpop.eup %3556  ;;  %v1658_v35 = vmul.f32 0.3275911, %v1626_v8  ;;  %v2074_v9 = vsub.f32 0.0, %v1626_v8  ;;  %v5290_v7 = vld [vmem:[#allocation2 + $0x12a] sm:$0xff] }
 0x298   : > { %v2390_v39 = vmul.f32 %v2358_v34, %v5188_v42  ;;  %v2007_v52 = vadd.f32 0.2548296, %v1975_v50  ;;  %v1912_v17 = vmul.f32 %v5235_v29, %v1880_v15  ;;  %v5270_v6 = vadd.f32 %v1499_v60, %v1463_v3 }
 0x299   : > { %v1156_v11 = vadd.f32 %v1124_v63, %v1052_v30  ;;  %v1192_v10 = vmul.f32 %v5202_v62, %v4406_v24  ;;  %v3559_v31 = vpop.eup %3558  ;;  %v2155_v22 = vmul.f32 1.442695, %v2105_v41  ;;  %v1690_v45 = vadd.f32 1.0, %v1658_v35 }
 0x29a   : > { %3335 = vmatmul.mubr.f32.gmra.mxu1 %v2390_v39  ;;  %v2039_v55 = vmul.f32 %v5208_v0, %v2007_v52  ;;  %v1260_v42 = vmul.f32 %v5275_v16, %v4409_v26  ;;  %v1559_v57 = vmul.f32 0.5, %v5124_v54  ;;  %v1944_v5 = vadd.f32 -0.28449672, %v1912_v17 }
 0x29b   : > { %v5281_v25 = vmul.f32 0.70710677, %v5270_v6  ;;  %v1224_v58 = vadd.f32 %v1192_v10, %v1156_v11  ;;  %vm2263_vm0 = vcmp.lt.f32.partialorder %v5135_v33, 0.0  ;;  %3562 = vrcp.f32 %v1690_v45  ;;  %v5300_v11 = vld [vmem:[#allocation2 + $0x138] sm:$0xff] }
 0x29c   : > { %v2199_v60 = vmul.f32 %v3557_v1, %v2039_v55  ;;  %v1364_v0 = vmul.f32 %v4411_v27, %v5112_v2  ;;  %v5286_v21 = vpop.eup %3560  ;;  %v1976_v47 = vmul.f32 %v5235_v29, %v1944_v5  ;;  %v2106_v20 = vmul.f32 %v2074_v9, %v1626_v8 }
 0x29d   : > { %v1627_v36 = vand.u32 2147483647, %v5281_v25  ;;  %v1292_v54 = vadd.f32 %v1260_v42, %v1224_v58  ;;  %v1785_v50 = vmul.f32 1.0614054, %v5286_v21  ;;  %3564 = vpow2.f32 %v2155_v22 }
 0x29e   : > { %v2231_v34 = vsub.f32 1.0, %v2199_v60  ;;  %v1432_v41 = vmul.f32 %v4413_v28, %v5219_v59  ;;  %v2008_v15 = vadd.f32 0.2548296, %v1976_v47  ;;  %v1500_v8 = vmul.f32 %v4440_v46, %v5290_v7 }
 0x29f   : > { %v1659_v3 = vmul.f32 0.3275911, %v1627_v36  ;;  %v2075_v2 = vsub.f32 0.0, %v1627_v36  ;;  %v1396_v30 = vadd.f32 %v1364_v0, %v1292_v54  ;;  %v1817_v1 = vadd.f32 -1.4531521, %v1785_v50 }
 0x2a0   : > { %v2295_v63 = vsub.f32 0.0, %v2231_v34  ;;  %v885_v39 = vmul.f32 %v4392_v13, %v5121_v4  ;;  %v2040_v52 = vmul.f32 %v5235_v29, %v2008_v15  ;;  %v2157_v35 = vmul.f32 1.442695, %v2106_v20 }
 0x2a1   : > { %v1691_v9 = vadd.f32 1.0, %v1659_v3  ;;  %v1464_v17 = vadd.f32 %v1432_v41, %v1396_v30  ;;  %v1849_v55 = vmul.f32 %v5286_v21, %v1817_v1  ;;  %v953_v45 = vmul.f32 %v4394_v14, %v5195_v51 }
 0x2a2   : > { %v2327_v10 = vsel %vm2263_vm0, %v2295_v63, %v2231_v34  ;;  %v917_v22 = vadd.f32 %v4880_v32, %v885_v39  ;;  %v2200_v5 = vmul.f32 %v3559_v31, %v2040_v52  ;;  %v2107_v4 = vmul.f32 %v2075_v2, %v1627_v36 }
 0x2a3   : > { %v2359_v42 = vadd.f32 1.0, %v2327_v10  ;;  %3566 = vrcp.f32 %v1691_v9  ;;  %v1881_v29 = vadd.f32 1.4214138, %v1849_v55  ;;  %v5308_v58 = vadd.f32 %v1500_v8, %v1464_v17  ;;  %v5337_v9 = vld [vmem:[#allocation2 + $0x140] sm:$0xff] }
 0x2a4   : > { %v985_v60 = vadd.f32 %v953_v45, %v917_v22  ;;  %v1021_v0 = vmul.f32 %v4399_v18, %v5300_v11  ;;  %v1560_v47 = vmul.f32 0.5, %v5145_v53  ;;  %v2232_v20 = vsub.f32 1.0, %v2200_v5  ;;  %v5340_v22 = vld [vmem:[%s4193_s21] ss:$0 sm:$0xff] }
 0x2a5   : > { %v2391_v33 = vmul.f32 %v2359_v42, %v1559_v57  ;;  %v1125_v32 = vmul.f32 %v5157_v37, %v4401_v19  ;;  %vm2264_vm1 = vcmp.lt.f32.partialorder %v5152_v44, 0.0  ;;  %v1913_v31 = vmul.f32 %v5286_v21, %v1881_v29  ;;  %v5323_v37 = vld [vmem:[#allocation2 + $0x139] sm:$0xff] }
 0x2a6   : > { %v5318_v36 = vmul.f32 0.70710677, %v5308_v58  ;;  %v1053_v54 = vadd.f32 %v1021_v0, %v985_v60  ;;  %v2296_v34 = vsub.f32 0.0, %v2232_v20  ;;  %3568 = vpow2.f32 %v2157_v35  ;;  %v5345_v29 = vld [vmem:[#allocation2 + $0x13a] sm:$0xff] }
 0x2a7   : > { %3337 = vmatprep.mubr.f32.mxu1 %v2391_v33  ;;  %v2159_v50 = vmul.f32 1.442695, %v2107_v4  ;;  %v1193_v57 = vmul.f32 %v5231_v61, %v4406_v24  ;;  %v1945_v53 = vadd.f32 -0.28449672, %v1913_v31  ;;  %v1261_v44 = vmul.f32 %v5323_v37, %v4409_v26 }
 0x2a8   : > { %v1628_v41 = vand.u32 2147483647, %v5318_v36  ;;  %v1157_v15 = vadd.f32 %v1125_v32, %v1053_v54  ;;  %v5327_v3 = vpop.eup %3562  ;;  %v2328_v2 = vsel %vm2264_vm1, %v2296_v34, %v2232_v20  ;;  %v1365_v30 = vmul.f32 %v4411_v27, %v5164_v12 }
 0x2a9   : > { %v1433_v63 = vmul.f32 %v4413_v28, %v5240_v56  ;;  %v886_v1 = vmul.f32 %v4392_v13, %v5170_v43  ;;  %v2360_v8 = vadd.f32 1.0, %v2328_v2  ;;  %v1977_v39 = vmul.f32 %v5286_v21, %v1945_v53 }
 0x2aa   : > { %v1786_v52 = vmul.f32 1.0614054, %v5327_v3  ;;  %v1660_v35 = vmul.f32 0.3275911, %v1628_v41  ;;  %v3565_v17 = vpop.eup %3564  ;;  %v2076_v10 = vsub.f32 0.0, %v1628_v41  ;;  %v1225_v55 = vadd.f32 %v1193_v57, %v1157_v15 }
 0x2ab   : > { %v918_v12 = vadd.f32 %v5340_v22, %v886_v1  ;;  %v954_v45 = vmul.f32 %v4394_v14, %v5242_v48  ;;  %v2392_v42 = vmul.f32 %v2360_v8, %v1560_v47  ;;  %v2009_v43 = vadd.f32 0.2548296, %v1977_v39 }
 0x2ac   : > { %v1818_v5 = vadd.f32 -1.4531521, %v1786_v52  ;;  %v1692_v4 = vadd.f32 1.0, %v1660_v35  ;;  %v2108_v60 = vmul.f32 %v2076_v10, %v1628_v41  ;;  %v1293_v0 = vadd.f32 %v1261_v44, %v1225_v55  ;;  %v5369_v55 = vld [vmem:[#allocation2 + $0x150] sm:$0xff] }
 0x2ad   : > { %v986_v33 = vadd.f32 %v954_v45, %v918_v12  ;;  %v1022_v20 = vmul.f32 %v4399_v18, %v5337_v9  ;;  %3338 = vmatmul.mubr.f32.gmra.mxu1 %v2392_v42  ;;  %v2041_v32 = vmul.f32 %v5286_v21, %v2009_v43  ;;  %v1126_v47 = vmul.f32 %v5202_v62, %v4401_v19  ;;  %v5373_v43 = vld [vmem:[#allocation2 + $0x142] sm:$0xff] }
 0x2ae   : > { %v1850_v31 = vmul.f32 %v5327_v3, %v1818_v5  ;;  %3570 = vrcp.f32 %v1692_v4  ;;  %v1397_v54 = vadd.f32 %v1365_v30, %v1293_v0  ;;  %v1501_v34 = vmul.f32 %v4440_v46, %v5345_v29  ;;  %v5362_v30 = vld [vmem:[#allocation2 + $0x141] sm:$0xff] }
 0x2af   : > { %v1054_v57 = vadd.f32 %v1022_v20, %v986_v33  ;;  %v1194_v53 = vmul.f32 %v5275_v16, %v4406_v24  ;;  %v1561_v15 = vmul.f32 0.5, %v5191_v38  ;;  %v2201_v44 = vmul.f32 %v3565_v17, %v2041_v32 }
 0x2b0   : > { %v5357_v41 = vpop.eup %3566  ;;  %vm2265_vm2 = vcmp.lt.f32.partialorder %v5200_v49, 0.0  ;;  %v1882_v21 = vadd.f32 1.4214138, %v1850_v31  ;;  %v1465_v1 = vadd.f32 %v1433_v63, %v1397_v54  ;;  %v1262_v8 = vmul.f32 %v5362_v30, %v4409_v26 }
 0x2b1   : > { %v1787_v2 = vmul.f32 1.0614054, %v5357_v41  ;;  %v1158_v62 = vadd.f32 %v1126_v47, %v1054_v57  ;;  %v2233_v39 = vsub.f32 1.0, %v2201_v44  ;;  %3572 = vpow2.f32 %v2159_v50 }
 0x2b2   : > { %v1914_v52 = vmul.f32 %v5327_v3, %v1882_v21  ;;  %v2161_v35 = vmul.f32 1.442695, %v2108_v60  ;;  %v5367_v38 = vadd.f32 %v1501_v34, %v1465_v1  ;;  %v887_v63 = vmul.f32 %v4392_v13, %v5195_v51 }
 0x2b3   : > { %v1819_v10 = vadd.f32 -1.4531521, %v1787_v2  ;;  %v1226_v17 = vadd.f32 %v1194_v53, %v1158_v62  ;;  %v3569_v12 = vpop.eup %3568  ;;  %v2297_v45 = vsub.f32 0.0, %v2233_v39  ;;  %v1366_v5 = vmul.f32 %v4411_v27, %v5219_v59 }
 0x2b4   : > { %v1946_v42 = vadd.f32 -0.28449672, %v1914_v52  ;;  %v955_v50 = vmul.f32 %v4394_v14, %v5300_v11  ;;  %v5381_v60 = vmul.f32 0.70710677, %v5367_v38  ;;  %v1434_v51 = vmul.f32 %v4413_v28, %v5290_v7 }
 0x2b5   : > { %v1851_v4 = vmul.f32 %v5357_v41, %v1819_v10  ;;  %v1294_v0 = vadd.f32 %v1262_v8, %v1226_v17  ;;  %v2329_v33 = vsel %vm2265_vm2, %v2297_v45, %v2233_v39  ;;  %v919_v32 = vadd.f32 %v5340_v22, %v887_v63 }
 0x2b6   : > { %v1978_v20 = vmul.f32 %v5327_v3, %v1946_v42  ;;  %v1023_v59 = vmul.f32 %v4399_v18, %v5369_v55  ;;  %v2361_v31 = vadd.f32 1.0, %v2329_v33  ;;  %v1629_v54 = vand.u32 2147483647, %v5381_v60 }
 0x2b7   : > { %v1883_v47 = vadd.f32 1.4214138, %v1851_v4  ;;  %v1502_v34 = vmul.f32 %v4440_v46, %v5373_v43  ;;  %v1398_v53 = vadd.f32 %v1366_v5, %v1294_v0  ;;  %v987_v44 = vadd.f32 %v955_v50, %v919_v32  ;;  %v5408_v50 = vld [vmem:[#allocation2 + $0x151] sm:$0xff] }
 0x2b8   : > { %v2010_v57 = vadd.f32 0.2548296, %v1978_v20  ;;  %v1127_v49 = vmul.f32 %v5231_v61, %v4401_v19  ;;  %v2393_v21 = vmul.f32 %v2361_v31, %v1561_v15  ;;  %v1562_v2 = vmul.f32 0.5, %v5247_v23  ;;  %v5412_v4 = vld [vmem:[#allocation2 + $0x152] sm:$0xff] }
 0x2b9   : > { %v1915_v1 = vmul.f32 %v5357_v41, %v1883_v47  ;;  %v1661_v62 = vmul.f32 0.3275911, %v1629_v54  ;;  %v2077_v39 = vsub.f32 0.0, %v1629_v54  ;;  %v1466_v52 = vadd.f32 %v1434_v51, %v1398_v53 }
 0x2ba   : > { %v2042_v8 = vmul.f32 %v5327_v3, %v2010_v57  ;;  %v1055_v10 = vadd.f32 %v1023_v59, %v987_v44  ;;  %3340 = vmatprep.mubr.f32.mxu1 %v2393_v21  ;;  %3574 = vpow2.f32 %v2161_v35  ;;  %v1195_v61 = vmul.f32 %v5323_v37, %v4406_v24  ;;  %v5427_v21 = vld [vmem:[#allocation2 + $0x158] sm:$0xff] }
 0x2bb   : > { %v5399_v17 = vpop.eup %3570  ;;  %v1947_v63 = vadd.f32 -0.28449672, %v1915_v1  ;;  %v1693_v45 = vadd.f32 1.0, %v1661_v62  ;;  %v5404_v42 = vadd.f32 %v1502_v34, %v1466_v52  ;;  %vm2266_vm3 = vcmp.lt.f32.partialorder %v5255_v40, 0.0 }
 0x2bc   : > { %v2202_v15 = vmul.f32 %v3569_v12, %v2042_v8  ;;  %v1788_v23 = vmul.f32 1.0614054, %v5399_v17  ;;  %v1159_v5 = vadd.f32 %v1127_v49, %v1055_v10  ;;  %v1263_v35 = vmul.f32 %v5408_v50, %v4409_v26 }
 0x2bd   : > { %v1979_v3 = vmul.f32 %v5357_v41, %v1947_v63  ;;  %3576 = vrcp.f32 %v1693_v45  ;;  %vm2267_vm4 = vcmp.lt.f32.partialorder %v5281_v25, 0.0  ;;  %v2109_v51 = vmul.f32 %v2077_v39, %v1629_v54 }
 0x2be   : > { %v2234_v0 = vsub.f32 1.0, %v2202_v15  ;;  %v1820_v12 = vadd.f32 -1.4531521, %v1788_v23  ;;  %v5416_v33 = vmul.f32 0.70710677, %v5404_v42  ;;  %v3573_v20 = vpop.eup %3572  ;;  %v1227_v59 = vadd.f32 %v1195_v61, %v1159_v5 }
 0x2bf   : > { %v2011_v32 = vadd.f32 0.2548296, %v1979_v3  ;;  %v1367_v31 = vmul.f32 %v4411_v27, %v5240_v56  ;;  %v1435_v47 = vmul.f32 %v4413_v28, %v5345_v29  ;;  %v1503_v54 = vmul.f32 %v4440_v46, %v5412_v4 }
 0x2c0   : > { %v2298_v34 = vsub.f32 0.0, %v2234_v0  ;;  %v1852_v57 = vmul.f32 %v5399_v17, %v1820_v12  ;;  %v1630_v53 = vand.u32 2147483647, %v5416_v33  ;;  %v1295_v49 = vadd.f32 %v1263_v35, %v1227_v59 }
 0x2c1   : > { %v2043_v44 = vmul.f32 %v5357_v41, %v2011_v32  ;;  %v888_v1 = vmul.f32 %v4392_v13, %v5242_v48  ;;  %v956_v56 = vmul.f32 %v4394_v14, %v5337_v9  ;;  %v2163_v15 = vmul.f32 1.442695, %v2109_v51 }
 0x2c2   : > { %v2330_v62 = vsel %vm2266_vm3, %v2298_v34, %v2234_v0  ;;  %v1884_v8 = vadd.f32 1.4214138, %v1852_v57  ;;  %v1662_v39 = vmul.f32 0.3275911, %v1630_v53  ;;  %v2078_v52 = vsub.f32 0.0, %v1630_v53 }
 0x2c3   : > { %v2362_v10 = vadd.f32 1.0, %v2330_v62  ;;  %v2203_v63 = vmul.f32 %v3573_v20, %v2043_v44  ;;  %v1399_v45 = vadd.f32 %v1367_v31, %v1295_v49  ;;  %v920_v41 = vadd.f32 %v5340_v22, %v888_v1  ;;  %v5455_v44 = vld [vmem:[#allocation2 + $0x159] sm:$0xff] }
 0x2c4   : > { %v1916_v61 = vmul.f32 %v5399_v17, %v1884_v8  ;;  %v1694_v23 = vadd.f32 1.0, %v1662_v39  ;;  %v1024_v48 = vmul.f32 %v4399_v18, %v5427_v21  ;;  %v2110_v12 = vmul.f32 %v2078_v52, %v1630_v53  ;;  %v5465_v52 = vld [vmem:[#allocation2 + $0x15a] sm:$0xff] }
 0x2c5   : > { %v2394_v5 = vmul.f32 %v2362_v10, %v1562_v2  ;;  %v2235_v3 = vsub.f32 1.0, %v2203_v63  ;;  %v1467_v35 = vadd.f32 %v1435_v47, %v1399_v45  ;;  %v988_v40 = vadd.f32 %v956_v56, %v920_v41  ;;  %v5469_v63 = vld [vmem:[#allocation2 + $0x168] sm:$0xff] }
 0x2c6   : > { %v1948_v0 = vadd.f32 -0.28449672, %v1916_v61  ;;  %3578 = vrcp.f32 %v1694_v23  ;;  %v1128_v20 = vmul.f32 %v5275_v16, %v4401_v19  ;;  %v1196_v51 = vmul.f32 %v5362_v30, %v4406_v24 }
 0x2c7   : > { %3341 = vmatmul.mubr.f32.gmra.mxu1 %v2394_v5  ;;  %v2299_v32 = vsub.f32 0.0, %v2235_v3  ;;  %v5441_v59 = vadd.f32 %v1503_v54, %v1467_v35  ;;  %v1056_v31 = vadd.f32 %v1024_v48, %v988_v40  ;;  %v3575_v34 = vpop.eup %3574  ;;  %v1563_v2 = vmul.f32 0.5, %v5270_v6 }
 0x2c8   : > { %v5447_v47 = vmul.f32 0.5, %v5308_v58  ;;  %v1980_v57 = vmul.f32 %v5399_v17, %v1948_v0  ;;  %3580 = vpow2.f32 %v2163_v15  ;;  %v1264_v49 = vmul.f32 %v5455_v44, %v4409_v26 }
 0x2c9   : > { %v2331_v16 = vsel %vm2267_vm4, %v2299_v32, %v2235_v3  ;;  %v5453_v53 = vmul.f32 0.70710677, %v5441_v59  ;;  %v1160_v54 = vadd.f32 %v1128_v20, %v1056_v31  ;;  %v2165_v56 = vmul.f32 1.442695, %v2110_v12 }
 0x2ca   : > { %v5459_v1 = vpop.eup %3576  ;;  %v2363_v6 = vadd.f32 1.0, %v2331_v16  ;;  %v2012_v58 = vadd.f32 0.2548296, %v1980_v57  ;;  %v1368_v62 = vmul.f32 %v4411_v27, %v5290_v7  ;;  %v1436_v10 = vmul.f32 %v4413_v28, %v5373_v43 }
 0x2cb   : > { %v1789_v25 = vmul.f32 1.0614054, %v5459_v1  ;;  %v1631_v8 = vand.u32 2147483647, %v5453_v53  ;;  %v1228_v39 = vadd.f32 %v1196_v51, %v1160_v54  ;;  %v889_v61 = vmul.f32 %v4392_v13, %v5300_v11 }
 0x2cc   : > { %v2395_v45 = vmul.f32 %v2363_v6, %v1563_v2  ;;  %v2044_v41 = vmul.f32 %v5399_v17, %v2012_v58  ;;  %v957_v7 = vmul.f32 %v4394_v14, %v5369_v55  ;;  %v1504_v35 = vmul.f32 %v4440_v46, %v5465_v52  ;;  %v5489_v6 = vld [vmem:[#allocation2 + $0x169] sm:$0xff] }
 0x2cd   : > { %v1821_v15 = vadd.f32 -1.4531521, %v1789_v25  ;;  %v1663_v23 = vmul.f32 0.3275911, %v1631_v8  ;;  %v2079_v48 = vsub.f32 0.0, %v1631_v8  ;;  %v1296_v5 = vadd.f32 %v1264_v49, %v1228_v39 }
 0x2ce   : > { %3343 = vmatprep.mubr.f32.mxu1 %v2395_v45  ;;  %v2204_v3 = vmul.f32 %v3575_v34, %v2044_v41  ;;  %v921_v40 = vadd.f32 %v5340_v22, %v889_v61  ;;  %v1025_v17 = vmul.f32 %v4399_v18, %v5469_v63  ;;  %3582 = vpow2.f32 %v2165_v56  ;;  %v5503_v41 = vld [vmem:[#allocation2 + $0x16a] sm:$0xff] }
 0x2cf   : > { %v1853_v0 = vmul.f32 %v5459_v1, %v1821_v15  ;;  %v1695_v11 = vadd.f32 1.0, %v1663_v23  ;;  %v2111_v12 = vmul.f32 %v2079_v48, %v1631_v8  ;;  %v1400_v20 = vadd.f32 %v1368_v62, %v1296_v5 }
 0x2d0   : > { %v2236_v32 = vsub.f32 1.0, %v2204_v3  ;;  %v989_v31 = vadd.f32 %v957_v7, %v921_v40  ;;  %v1129_v51 = vmul.f32 %v5323_v37, %v4401_v19  ;;  %v5484_v34 = vpop.f32.mrf.mxu1  ;;  %vm2268_vm5 = vcmp.lt.f32.partialorder %v5318_v36, 0.0  ;;  %v5514_v3 = vld [vmem:[#allocation2 + $0x170] sm:$0xff] }
 0x2d1   : > { %v1885_v2 = vadd.f32 1.4214138, %v1853_v0  ;;  %3584 = vrcp.f32 %v1695_v11  ;;  %v1468_v57 = vadd.f32 %v1436_v10, %v1400_v20  ;;  %v1197_v49 = vmul.f32 %v5408_v50, %v4406_v24 }
 0x2d2   : > { %v2300_v16 = vsub.f32 0.0, %v2236_v32  ;;  %v1057_v54 = vadd.f32 %v1025_v17, %v989_v31  ;;  %v1265_v58 = vmul.f32 %v5489_v6, %v4409_v26  ;;  %v5493_v56 = vpop.f32.mrf.mxu1  ;;  %v2167_v36 = vmul.f32 1.442695, %v2111_v12 }
 0x2d3   : > { %v5495_v37 = vpop.eup %3578  ;;  %v1917_v62 = vmul.f32 %v5459_v1, %v1885_v2  ;;  %v5498_v25 = vadd.f32 %v1504_v35, %v1468_v57  ;;  %v1369_v8 = vmul.f32 %v4411_v27, %v5345_v29  ;;  %v890_v61 = vmul.f32 %v4392_v13, %v5337_v9 }
 0x2d4   : > { %v2332_v39 = vsel %vm2268_vm5, %v2300_v16, %v2236_v32  ;;  %v1790_v10 = vmul.f32 1.0614054, %v5495_v37  ;;  %v1161_v45 = vadd.f32 %v1129_v51, %v1057_v54  ;;  %v1437_v29 = vmul.f32 %v4413_v28, %v5412_v4 }
 0x2d5   : > { %v5507_v7 = vpop.f32.mrf.mxu1  ;;  %v3581_v15 = vpop.eup %3580  ;;  %v2364_v23 = vadd.f32 1.0, %v2332_v39  ;;  %v1949_v48 = vadd.f32 -0.28449672, %v1917_v62  ;;  %v5510_v5 = vmul.f32 0.70710677, %v5498_v25  ;;  %v922_v17 = vadd.f32 %v5340_v22, %v890_v61 }
 0x2d6   : > { %v1822_v35 = vadd.f32 -1.4531521, %v1790_v10  ;;  %v1229_v40 = vadd.f32 %v1197_v49, %v1161_v45  ;;  %v958_v9 = vmul.f32 %v4394_v14, %v5427_v21  ;;  %v1505_v32 = vmul.f32 %v4440_v46, %v5503_v41 }
 0x2d7   : > { %v5519_v0 = vpop.f32.mrf.mxu1  ;;  %v2396_v11 = vmul.f32 %v2364_v23, %v5447_v47  ;;  %v1981_v12 = vmul.f32 %v5459_v1, %v1949_v48  ;;  %v1632_v20 = vand.u32 2147483647, %v5510_v5  ;;  %v1026_v57 = vmul.f32 %v4399_v18, %v5514_v3 }
 0x2d8   : > { %v1854_v31 = vmul.f32 %v5495_v37, %v1822_v35  ;;  %v1297_v51 = vadd.f32 %v1265_v58, %v1229_v40  ;;  %v990_v2 = vadd.f32 %v958_v9, %v922_v17  ;;  %v1130_v47 = vmul.f32 %v5362_v30, %v4401_v19  ;;  %v5535_v17 = vld [vmem:[#allocation2 + $0x171] sm:$0xff] }
 0x2d9   : > { %3344 = vmatmul.mubr.f32.gmra.mxu1 %v2396_v11  ;;  %v2013_v16 = vadd.f32 0.2548296, %v1981_v12  ;;  %v1664_v54 = vmul.f32 0.3275911, %v1632_v20  ;;  %v2080_v49 = vsub.f32 0.0, %v1632_v20  ;;  %v1198_v45 = vmul.f32 %v5455_v44, %v4406_v24 }
 0x2da   : > { %v1886_v62 = vadd.f32 1.4214138, %v1854_v31  ;;  %v1401_v39 = vadd.f32 %v1369_v8, %v1297_v51  ;;  %v1058_v10 = vadd.f32 %v1026_v57, %v990_v2  ;;  %3586 = vpow2.f32 %v2167_v36  ;;  %v5548_v57 = vld [vmem:[#allocation2 + $0x172] sm:$0xff] }
 0x2db   : > { %v2045_v61 = vmul.f32 %v5459_v1, %v2013_v16  ;;  %v1696_v58 = vadd.f32 1.0, %v1664_v54  ;;  %v2112_v23 = vmul.f32 %v2080_v49, %v1632_v20  ;;  %v1266_v30 = vmul.f32 %v5535_v17, %v4409_v26  ;;  %v3583_v9 = vpop.eup %3582  ;;  %v5558_v49 = vld [vmem:[#allocation2 + $0x180] sm:$0xff] }
 0x2dc   : > { %v1918_v48 = vmul.f32 %v5495_v37, %v1886_v62  ;;  %v1469_v35 = vadd.f32 %v1437_v29, %v1401_v39  ;;  %v1162_v40 = vadd.f32 %v1130_v47, %v1058_v10  ;;  %v1565_v8 = vmul.f32 0.5, %v5367_v38 }
 0x2dd   : > { %v2205_v11 = vmul.f32 %v3581_v15, %v2045_v61  ;;  %vm2269_vm6 = vcmp.lt.f32.partialorder %v5381_v60, 0.0  ;;  %3588 = vrcp.f32 %v1696_v58  ;;  %v1370_v29 = vmul.f32 %v4411_v27, %v5373_v43 }
 0x2de   : > { %v5541_v1 = vpop.eup %3584  ;;  %v1950_v36 = vadd.f32 -0.28449672, %v1918_v48  ;;  %v5543_v12 = vadd.f32 %v1505_v32, %v1469_v35  ;;  %v1230_v20 = vadd.f32 %v1198_v45, %v1162_v40  ;;  %v2169_v2 = vmul.f32 1.442695, %v2112_v23 }
 0x2df   : > { %v2237_v31 = vsub.f32 1.0, %v2205_v11  ;;  %v1791_v51 = vmul.f32 1.0614054, %v5541_v1  ;;  %v891_v38 = vmul.f32 %v4392_v13, %v5369_v55  ;;  %v1438_v54 = vmul.f32 %v4413_v28, %v5465_v52 }
 0x2e0   : > { %v1982_v15 = vmul.f32 %v5495_v37, %v1950_v36  ;;  %v5554_v16 = vmul.f32 0.70710677, %v5543_v12  ;;  %v1298_v32 = vadd.f32 %v1266_v30, %v1230_v20  ;;  %v959_v39 = vmul.f32 %v4394_v14, %v5469_v63 }
 0x2e1   : > { %v2301_v43 = vsub.f32 0.0, %v2237_v31  ;;  %v1823_v47 = vadd.f32 -1.4531521, %v1791_v51  ;;  %v923_v62 = vadd.f32 %v5340_v22, %v891_v38  ;;  %v1506_v61 = vmul.f32 %v4440_v46, %v5548_v57 }
 0x2e2   : > { %v2014_v10 = vadd.f32 0.2548296, %v1982_v15  ;;  %v1633_v55 = vand.u32 2147483647, %v5554_v16  ;;  %v1402_v45 = vadd.f32 %v1370_v29, %v1298_v32  ;;  %v1027_v35 = vmul.f32 %v4399_v18, %v5558_v49 }
 0x2e3   : > { %v2333_v58 = vsel %vm2269_vm6, %v2301_v43, %v2237_v31  ;;  %v1855_v23 = vmul.f32 %v5541_v1, %v1823_v47  ;;  %v991_v48 = vadd.f32 %v959_v39, %v923_v62  ;;  %v1131_v60 = vmul.f32 %v5408_v50, %v4401_v19  ;;  %v5584_v50 = vld [vmem:[#allocation2 + $0x181] sm:$0xff] }
 0x2e4   : > { %v2365_v40 = vadd.f32 1.0, %v2333_v58  ;;  %v2046_v30 = vmul.f32 %v5495_v37, %v2014_v10  ;;  %v1665_v11 = vmul.f32 0.3275911, %v1633_v55  ;;  %v2081_v36 = vsub.f32 0.0, %v1633_v55  ;;  %v5572_v20 = vpop.f32.mrf.mxu1 }
 0x2e5   : > { %6034 = vst [vmem:[#allocation31_spill] sm:$0xff] %v5572_v20  ;;  %v1887_v29 = vadd.f32 1.4214138, %v1855_v23  ;;  %v1470_v51 = vadd.f32 %v1438_v54, %v1402_v45  ;;  %v1059_v38 = vadd.f32 %v1027_v35, %v991_v48  ;;  %v1199_v10 = vmul.f32 %v5489_v6, %v4406_v24  ;;  %v5592_v23 = vld [vmem:[#allocation2 + $0x182] sm:$0xff] }
 0x2e6   : > { %v2397_v31 = vmul.f32 %v2365_v40, %v1565_v8  ;;  %v2206_v15 = vmul.f32 %v3583_v9, %v2046_v30  ;;  %v1697_v32 = vadd.f32 1.0, %v1665_v11  ;;  %v2113_v43 = vmul.f32 %v2081_v36, %v1633_v55  ;;  %v5576_v47 = vpop.f32.mrf.mxu1 }
 0x2e7   : > { %v1919_v62 = vmul.f32 %v5541_v1, %v1887_v29  ;;  %v5579_v39 = vadd.f32 %v1506_v61, %v1470_v51  ;;  %v1163_v37 = vadd.f32 %v1131_v60, %v1059_v38  ;;  %v3587_v58 = vpop.eup %3586  ;;  %v1566_v54 = vmul.f32 0.5, %v5404_v42  ;;  %v5605_v60 = vld [vmem:[#allocation2 + $0x188] sm:$0xff] }
 0x2e8   : > { %3346 = vmatprep.mubr.f32.mxu1 %v2397_v31  ;;  %v2238_v45 = vsub.f32 1.0, %v2206_v15  ;;  %3590 = vrcp.f32 %v1697_v32  ;;  %v1267_v9 = vmul.f32 %v5584_v50, %v4409_v26  ;;  %vm2270_vm7 = vcmp.lt.f32.partialorder %v5416_v33, 0.0 }
 0x2e9   : > { %v1951_v8 = vadd.f32 -0.28449672, %v1919_v62  ;;  %v5590_v55 = vmul.f32 0.70710677, %v5579_v39  ;;  %v1231_v61 = vadd.f32 %v1199_v10, %v1163_v37  ;;  %3592 = vpow2.f32 %v2169_v2 }
 0x2ea   : > { %v5594_v48 = vpop.eup %3588  ;;  %v2302_v35 = vsub.f32 0.0, %v2238_v45  ;;  %v2171_v42 = vmul.f32 1.442695, %v2113_v43  ;;  %v1371_v40 = vmul.f32 %v4411_v27, %v5412_v4  ;;  %v1439_v36 = vmul.f32 %v4413_v28, %v5503_v41 }
 0x2eb   : > { %v1983_v30 = vmul.f32 %v5541_v1, %v1951_v8  ;;  %v1792_v11 = vmul.f32 1.0614054, %v5594_v48  ;;  %v1634_v33 = vand.u32 2147483647, %v5590_v55  ;;  %v1299_v51 = vadd.f32 %v1267_v9, %v1231_v61 }
 0x2ec   : > { %v2334_v29 = vsel %vm2270_vm7, %v2302_v35, %v2238_v45  ;;  %v1507_v38 = vmul.f32 %v4440_v46, %v5592_v23  ;;  %v892_v2 = vmul.f32 %v4392_v13, %v5427_v21  ;;  %v960_v10 = vmul.f32 %v4394_v14, %v5514_v3 }
 0x2ed   : > { %v2366_v4 = vadd.f32 1.0, %v2334_v29  ;;  %v2015_v31 = vadd.f32 0.2548296, %v1983_v30  ;;  %v1824_v15 = vadd.f32 -1.4531521, %v1792_v11  ;;  %v2082_v32 = vsub.f32 0.0, %v1634_v33 }
 0x2ee   : > { %v1666_v43 = vmul.f32 0.3275911, %v1634_v33  ;;  %v1403_v62 = vadd.f32 %v1371_v40, %v1299_v51  ;;  %v924_v37 = vadd.f32 %v5340_v22, %v892_v2  ;;  %v1028_v30 = vmul.f32 %v4399_v18, %v5605_v60 }
 0x2ef   : > { %v2398_v45 = vmul.f32 %v2366_v4, %v1566_v54  ;;  %v2047_v9 = vmul.f32 %v5541_v1, %v2015_v31  ;;  %v1856_v8 = vmul.f32 %v5594_v48, %v1824_v15  ;;  %v2114_v61 = vmul.f32 %v2082_v32, %v1634_v33  ;;  %v5630_v15 = vld [vmem:[#allocation2 + $0x189] sm:$0xff] }
 0x2f0   : > { %v1698_v35 = vadd.f32 1.0, %v1666_v43  ;;  %v1471_v20 = vadd.f32 %v1439_v36, %v1403_v62  ;;  %v992_v21 = vadd.f32 %v960_v10, %v924_v37  ;;  %v1132_v29 = vmul.f32 %v5455_v44, %v4401_v19  ;;  %v5634_v32 = vld [vmem:[#allocation2 + $0x18a] sm:$0xff] }
 0x2f1   : > { %3347 = vmatmul.mubr.f32.gmra.mxu1 %v2398_v45  ;;  %v2207_v11 = vmul.f32 %v3587_v58, %v2047_v9  ;;  %v1888_v40 = vadd.f32 1.4214138, %v1856_v8  ;;  %v1200_v1 = vmul.f32 %v5535_v17, %v4406_v24  ;;  %v1567_v33 = vmul.f32 0.5, %v5441_v59  ;;  %v857_v45 = vld [vmem:[#allocation2 + $0x198] sm:$0xff] }
 0x2f2   : > { %3594 = vrcp.f32 %v1698_v35  ;;  %v5618_v51 = vadd.f32 %v1507_v38, %v1471_v20  ;;  %v1060_v54 = vadd.f32 %v1028_v30, %v992_v21  ;;  %vm2271_vm8 = vcmp.lt.f32.partialorder %v5453_v53, 0.0 }
 0x2f3   : > { %v2239_v36 = vsub.f32 1.0, %v2207_v11  ;;  %v1920_v2 = vmul.f32 %v5594_v48, %v1888_v40  ;;  %3596 = vpow2.f32 %v2171_v42  ;;  %v2173_v58 = vmul.f32 1.442695, %v2114_v61 }
 0x2f4   : > { %v5626_v4 = vmul.f32 0.70710677, %v5618_v51  ;;  %v1164_v44 = vadd.f32 %v1132_v29, %v1060_v54  ;;  %v1268_v59 = vmul.f32 %v5630_v15, %v4409_v26  ;;  %v1372_v43 = vmul.f32 %v4411_v27, %v5465_v52 }
 0x2f5   : > { %v5628_v31 = vpop.eup %3590  ;;  %v2303_v20 = vsub.f32 0.0, %v2239_v36  ;;  %v1952_v38 = vadd.f32 -0.28449672, %v1920_v2  ;;  %v1440_v10 = vmul.f32 %v4413_v28, %v5548_v57  ;;  %v893_v35 = vmul.f32 %v4392_v13, %v5469_v63 }
 0x2f6   : > { %v1793_v42 = vmul.f32 1.0614054, %v5628_v31  ;;  %v1635_v62 = vand.u32 2147483647, %v5626_v4  ;;  %v1232_v37 = vadd.f32 %v1200_v1, %v1164_v44  ;;  %v3593_v9 = vpop.eup %3592  ;;  %v961_v52 = vmul.f32 %v4394_v14, %v5558_v49 }
 0x2f7   : > { %v2335_v8 = vsel %vm2271_vm8, %v2303_v20, %v2239_v36  ;;  %v1984_v61 = vmul.f32 %v5594_v48, %v1952_v38  ;;  %v1508_v40 = vmul.f32 %v4440_v46, %v5634_v32  ;;  %v925_v1 = vadd.f32 %v5340_v22, %v893_v35 }
 0x2f8   : > { %v2367_v21 = vadd.f32 1.0, %v2335_v8  ;;  %v1825_v30 = vadd.f32 -1.4531521, %v1793_v42  ;;  %v1667_v11 = vmul.f32 0.3275911, %v1635_v62  ;;  %v1300_v54 = vadd.f32 %v1268_v59, %v1232_v37  ;;  %v1097_v37 = vld [vmem:[#allocation2 + $0x199] sm:$0xff] }
 0x2f9   : > { %v2016_v29 = vadd.f32 0.2548296, %v1984_v61  ;;  %v1029_v53 = vmul.f32 %v4399_v18, %v857_v45  ;;  %v2083_v63 = vsub.f32 0.0, %v1635_v62  ;;  %v993_v38 = vadd.f32 %v961_v52, %v925_v1 }
 0x2fa   : > { %v2399_v36 = vmul.f32 %v2367_v21, %v1567_v33  ;;  %v1857_v2 = vmul.f32 %v5628_v31, %v1825_v30  ;;  %v1699_v44 = vadd.f32 1.0, %v1667_v11  ;;  %v1404_v49 = vadd.f32 %v1372_v43, %v1300_v54 }
 0x2fb   : > { %v2048_v20 = vmul.f32 %v5594_v48, %v2016_v29  ;;  %v1133_v42 = vmul.f32 %v5489_v6, %v4401_v19  ;;  %v1568_v8 = vmul.f32 0.5, %v5498_v25  ;;  %v1061_v33 = vadd.f32 %v1029_v53, %v993_v38 }
 0x2fc   : > { %3349 = vmatprep.mubr.f32.mxu1 %v2399_v36  ;;  %v1889_v59 = vadd.f32 1.4214138, %v1857_v2  ;;  %3598 = vrcp.f32 %v1699_v44  ;;  %v1472_v45 = vadd.f32 %v1440_v10, %v1404_v49  ;;  %v1201_v35 = vmul.f32 %v5584_v50, %v4406_v24 }
 0x2fd   : > { %v2208_v61 = vmul.f32 %v3593_v9, %v2048_v20  ;;  %v5660_v21 = vpop.f32.mrf.mxu1  ;;  %vm2272_vm9 = vcmp.lt.f32.partialorder %v5510_v5, 0.0  ;;  %3600 = vpow2.f32 %v2173_v58  ;;  %v2115_v6 = vmul.f32 %v2083_v63, %v1635_v62  ;;  %v858_v9 = vld [vmem:[#allocation2 + $0x1a0] sm:$0xff] }
 0x2fe   : > { %v1921_v48 = vmul.f32 %v5628_v31, %v1889_v59  ;;  %v5666_v52 = vadd.f32 %v1508_v40, %v1472_v45  ;;  %v1165_v30 = vadd.f32 %v1133_v42, %v1061_v33  ;;  %v1269_v10 = vmul.f32 %v4409_v26, %v1097_v37  ;;  %v1337_v63 = vld [vmem:[#allocation2 + $0x19a] sm:$0xff] }
 0x2ff   : > { %v5664_v43 = vpop.eup %3594  ;;  %v2240_v25 = vsub.f32 1.0, %v2208_v61  ;;  %v5669_v11 = vpop.f32.mrf.mxu1  ;;  %v894_v54 = vmul.f32 %v4392_v13, %v5514_v3  ;;  %v962_v58 = vmul.f32 %v4394_v14, %v5605_v60  ;;  %v1373_v36 = vmul.f32 %v4411_v27, %v5503_v41  ;;  %v1098_v45 = vld [vmem:[#allocation2 + $0x1a1] sm:$0xff] }
 0x300   : > { %v1953_v50 = vadd.f32 -0.28449672, %v1921_v48  ;;  %v1794_v29 = vmul.f32 1.0614054, %v5664_v43  ;;  %v3597_v62 = vpop.eup %3596  ;;  %v5677_v40 = vmul.f32 0.70710677, %v5666_v52  ;;  %v1233_v53 = vadd.f32 %v1201_v35, %v1165_v30 }
 0x301   : > { %v2304_v1 = vsub.f32 0.0, %v2240_v25  ;;  %v926_v20 = vadd.f32 %v5340_v22, %v894_v54  ;;  %v1030_v13 = vmul.f32 %v4399_v18, %v858_v9  ;;  %v1441_v49 = vmul.f32 %v4413_v28, %v5592_v23 }
 0x302   : > { %v1985_v2 = vmul.f32 %v5628_v31, %v1953_v50  ;;  %v1826_v44 = vadd.f32 -1.4531521, %v1794_v29  ;;  %v1636_v3 = vand.u32 2147483647, %v5677_v40  ;;  %v1301_v60 = vadd.f32 %v1269_v10, %v1233_v53  ;;  %v1338_v53 = vld [vmem:[#allocation2 + $0x1a2] sm:$0xff] }
 0x303   : > { %v2336_v14 = vsel %vm2272_vm9, %v2304_v1, %v2240_v25  ;;  %v994_v59 = vadd.f32 %v962_v58, %v926_v20  ;;  %v1509_v22 = vmul.f32 %v4440_v46, %v1337_v63  ;;  %v1134_v18 = vmul.f32 %v5535_v17, %v4401_v19 }
 0x304   : > { %v2368_v38 = vadd.f32 1.0, %v2336_v14  ;;  %v2017_v42 = vadd.f32 0.2548296, %v1985_v2  ;;  %v1858_v41 = vmul.f32 %v5664_v43, %v1826_v44  ;;  %v1668_v37 = vmul.f32 0.3275911, %v1636_v3 }
 0x305   : > { %v1405_v61 = vadd.f32 %v1373_v36, %v1301_v60  ;;  %v1062_v48 = vadd.f32 %v1030_v13, %v994_v59  ;;  %v2175_v25 = vmul.f32 1.442695, %v2115_v6  ;;  %v1202_v10 = vmul.f32 %v5630_v15, %v4406_v24 }
 0x306   : > { %v2400_v5 = vmul.f32 %v2368_v38, %v1568_v8  ;;  %v2049_v33 = vmul.f32 %v5628_v31, %v2017_v42  ;;  %v1890_v35 = vadd.f32 1.4214138, %v1858_v41  ;;  %v1700_v23 = vadd.f32 1.0, %v1668_v37 }
 0x307   : > { %v1473_v30 = vadd.f32 %v1441_v49, %v1405_v61  ;;  %v1166_v29 = vadd.f32 %v1134_v18, %v1062_v48  ;;  %v1270_v54 = vmul.f32 %v4409_v26, %v1098_v45  ;;  %v1374_v17 = vmul.f32 %v4411_v27, %v5548_v57 }
 0x308   : > { %3350 = vmatmul.mubr.f32.gmra.mxu1 %v2400_v5  ;;  %v2209_v9 = vmul.f32 %v3597_v62, %v2049_v33  ;;  %v1922_v50 = vmul.f32 %v5664_v43, %v1890_v35  ;;  %3602 = vrcp.f32 %v1700_v23  ;;  %vm2273_vm10 = vcmp.lt.f32.partialorder %v5554_v16, 0.0 }
 0x309   : > { %v3599_v58 = vpop.eup %3598  ;;  %v5698_v19 = vadd.f32 %v1509_v22, %v1473_v30  ;;  %v1234_v1 = vadd.f32 %v1202_v10, %v1166_v29  ;;  %3604 = vpow2.f32 %v2175_v25  ;;  %v1442_v26 = vmul.f32 %v4413_v28, %v5634_v32 }
 0x30a   : > { %v2241_v31 = vsub.f32 1.0, %v2209_v9  ;;  %v1954_v8 = vadd.f32 -0.28449672, %v1922_v50  ;;  %v1795_v6 = vmul.f32 1.0614054, %v3599_v58  ;;  %v3601_v24 = vpop.eup %3600  ;;  %v1569_v57 = vmul.f32 0.5, %v5543_v12 }
 0x30b   : > { %v5704_v15 = vmul.f32 0.70710677, %v5698_v19  ;;  %v1302_v27 = vadd.f32 %v1270_v54, %v1234_v1  ;;  %v2084_v44 = vsub.f32 0.0, %v1636_v3  ;;  %v1510_v20 = vmul.f32 %v4440_v46, %v1338_v53 }
 0x30c   : > { %v2305_v62 = vsub.f32 0.0, %v2241_v31  ;;  %v1986_v36 = vmul.f32 %v5664_v43, %v1954_v8  ;;  %v1827_v2 = vadd.f32 -1.4531521, %v1795_v6  ;;  %vm2274_vm11 = vcmp.lt.f32.partialorder %v5590_v55, 0.0 }
 0x30d   : > { %v1637_v63 = vand.u32 2147483647, %v5704_v15  ;;  %v1406_v60 = vadd.f32 %v1374_v17, %v1302_v27  ;;  %v2116_v59 = vmul.f32 %v2084_v44, %v1636_v3  ;;  %v1570_v48 = vmul.f32 0.5, %v5579_v39 }
 0x30e   : > { %v2337_v16 = vsel %vm2273_vm10, %v2305_v62, %v2241_v31  ;;  %v2018_v13 = vadd.f32 0.2548296, %v1986_v36  ;;  %v1859_v14 = vmul.f32 %v3599_v58, %v1827_v2  ;;  %vm2275_vm12 = vcmp.lt.f32.partialorder %v5626_v4, 0.0 }
 0x30f   : > { %v2369_v49 = vadd.f32 1.0, %v2337_v16  ;;  %v1669_v38 = vmul.f32 0.3275911, %v1637_v63  ;;  %v1474_v42 = vadd.f32 %v1442_v26, %v1406_v60  ;;  %v2177_v5 = vmul.f32 1.442695, %v2116_v59 }
 0x310   : > { %v2050_v28 = vmul.f32 %v5664_v43, %v2018_v13  ;;  %v1891_v32 = vadd.f32 1.4214138, %v1859_v14  ;;  %v2085_v23 = vsub.f32 0.0, %v1637_v63  ;;  %vm2276_vm13 = vcmp.lt.f32.partialorder %v5677_v40, 0.0 }
 0x311   : > { %v2401_v41 = vmul.f32 %v2369_v49, %v1569_v57  ;;  %v1701_v37 = vadd.f32 1.0, %v1669_v38  ;;  %v5713_v22 = vadd.f32 %v1510_v20, %v1474_v42  ;;  %v1571_v57 = vmul.f32 0.5, %v5618_v51 }
 0x312   : > { %v2210_v61 = vmul.f32 %v3601_v24, %v2050_v28  ;;  %v1923_v12 = vmul.f32 %v3599_v58, %v1891_v32  ;;  %v2117_v6 = vmul.f32 %v2085_v23, %v1637_v63  ;;  %vm2277_vm14 = vcmp.lt.f32.partialorder %v5704_v15, 0.0 }
 0x313   : > { %3352 = vmatprep.mubr.f32.mxu1 %v2401_v41  ;;  %3606 = vrcp.f32 %v1701_v37  ;;  %v5716_v18 = vmul.f32 0.70710677, %v5713_v22 }
 0x314   : > { %v2242_v46 = vsub.f32 1.0, %v2210_v61  ;;  %v1955_v45 = vadd.f32 -0.28449672, %v1923_v12  ;;  %3608 = vpow2.f32 %v2177_v5  ;;  %v2179_v62 = vmul.f32 1.442695, %v2117_v6 }
 0x315   : > { %v3603_v43 = vpop.eup %3602  ;;  %v1638_v3 = vand.u32 2147483647, %v5716_v18  ;;  %v1573_v6 = vmul.f32 0.5, %v5698_v19  ;;  %vm2278_vm15 = vcmp.lt.f32.partialorder %v5716_v18, 0.0 }
 0x316   : > { %v2306_v33 = vsub.f32 0.0, %v2242_v46  ;;  %v1987_v35 = vmul.f32 %v3599_v58, %v1955_v45  ;;  %v1796_v25 = vmul.f32 1.0614054, %v3603_v43  ;;  %v3605_v30 = vpop.eup %3604 }
 0x317   : > { %v1670_v50 = vmul.f32 0.3275911, %v1638_v3 }
 0x318   : > { %v2338_v10 = vsel %vm2274_vm11, %v2306_v33, %v2242_v46  ;;  %v2019_v9 = vadd.f32 0.2548296, %v1987_v35  ;;  %v1828_v54 = vadd.f32 -1.4531521, %v1796_v25 }
 0x319   : > { %v2370_v29 = vadd.f32 1.0, %v2338_v10  ;;  %v1702_v31 = vadd.f32 1.0, %v1670_v50 }
 0x31a   : > { %v2051_v17 = vmul.f32 %v3599_v58, %v2019_v9  ;;  %v1860_v8 = vmul.f32 %v3603_v43, %v1828_v54  ;;  %v2086_v58 = vsub.f32 0.0, %v1638_v3 }
 0x31b   : > { %v2402_v55 = vmul.f32 %v2370_v29, %v1570_v48  ;;  %3610 = vrcp.f32 %v1702_v31 }
 0x31c   : > { %v2211_v1 = vmul.f32 %v3605_v30, %v2051_v17  ;;  %v1892_v53 = vadd.f32 1.4214138, %v1860_v8  ;;  %3612 = vpow2.f32 %v2179_v62  ;;  %v2118_v60 = vmul.f32 %v2086_v58, %v1638_v3 }
 0x31d   : > { %3353 = vmatmul.mubr.f32.gmra.mxu1 %v2402_v55  ;;  %v5721_v24 = vpop.f32.mrf.mxu1 }
 0x31e   : > { %v2243_v39 = vsub.f32 1.0, %v2211_v1  ;;  %v1924_v26 = vmul.f32 %v3603_v43, %v1892_v53  ;;  %v2181_v41 = vmul.f32 1.442695, %v2118_v60 }
 0x31f   : > { %v5724_v36 = vpop.f32.mrf.mxu1 }
 0x320   : > { %v3607_v2 = vpop.eup %3606  ;;  %v2307_v27 = vsub.f32 0.0, %v2243_v39  ;;  %v1956_v44 = vadd.f32 -0.28449672, %v1924_v26  ;;  %3614 = vpow2.f32 %v2181_v41 }
 0x321   : > { %v1797_v63 = vmul.f32 1.0614054, %v3607_v2  ;;  %v3609_v28 = vpop.eup %3608 }
 0x322   : > { %v2339_v20 = vsel %vm2275_vm12, %v2307_v27, %v2243_v39  ;;  %v1988_v13 = vmul.f32 %v3603_v43, %v1956_v44 }
 0x323   : > { %v2371_v16 = vadd.f32 1.0, %v2339_v20  ;;  %v1829_v14 = vadd.f32 -1.4531521, %v1797_v63 }
 0x324   : > { %v2020_v38 = vadd.f32 0.2548296, %v1988_v13 }
 0x325   : > { %v2403_v49 = vmul.f32 %v2371_v16, %v1571_v57  ;;  %v1861_v4 = vmul.f32 %v3607_v2, %v1829_v14  ;;  %v1574_v57 = vmul.f32 0.5, %v5713_v22 }
 0x326   : > { %v2052_v32 = vmul.f32 %v3603_v43, %v2020_v38  ;;  %v1572_v43 = vmul.f32 0.5, %v5666_v52 }
 0x327   : > { %3355 = vmatprep.mubr.f32.mxu1 %v2403_v49  ;;  %v1893_v42 = vadd.f32 1.4214138, %v1861_v4 }
 0x328   : > { %v3611_v59 = vpop.eup %3610  ;;  %v2212_v37 = vmul.f32 %v3609_v28, %v2052_v32 }
 0x329   : > { %v1925_v61 = vmul.f32 %v3607_v2, %v1893_v42  ;;  %v1798_v51 = vmul.f32 1.0614054, %v3611_v59  ;;  %v3613_v30 = vpop.eup %3612 }
 0x32a   : > { %v2244_v12 = vsub.f32 1.0, %v2212_v37 }
 0x32b   : > { %v1957_v46 = vadd.f32 -0.28449672, %v1925_v61  ;;  %v5727_v45 = vpop.f32.mrf.mxu1  ;;  %v1830_v5 = vadd.f32 -1.4531521, %v1798_v51 }
 0x32c   : > { %v2308_v33 = vsub.f32 0.0, %v2244_v12 }
 0x32d   : > { %v1989_v35 = vmul.f32 %v3607_v2, %v1957_v46  ;;  %v5730_v3 = vpop.f32.mrf.mxu1  ;;  %v1862_v48 = vmul.f32 %v3611_v59, %v1830_v5  ;;  %v3615_v1 = vpop.eup %3614 }
 0x32e   : > { %v2340_v25 = vsel %vm2276_vm13, %v2308_v33, %v2244_v12 }
 0x32f   : > { %v2021_v23 = vadd.f32 0.2548296, %v1989_v35  ;;  %v2372_v10 = vadd.f32 1.0, %v2340_v25  ;;  %v1894_v9 = vadd.f32 1.4214138, %v1862_v48 }
 0x331   : > { %v2053_v50 = vmul.f32 %v3607_v2, %v2021_v23  ;;  %v2404_v29 = vmul.f32 %v2372_v10, %v1572_v43  ;;  %v1926_v54 = vmul.f32 %v3611_v59, %v1894_v9 }
 0x333   : > { %v2213_v17 = vmul.f32 %v3613_v30, %v2053_v50  ;;  %3356 = vmatmul.mubr.f32.gmra.mxu1 %v2404_v29  ;;  %v1958_v40 = vadd.f32 -0.28449672, %v1926_v54 }
 0x335   : > { %v2245_v31 = vsub.f32 1.0, %v2213_v17  ;;  %v1990_v55 = vmul.f32 %v3611_v59, %v1958_v40 }
 0x337   : > { %v2309_v8 = vsub.f32 0.0, %v2245_v31  ;;  %v2022_v52 = vadd.f32 0.2548296, %v1990_v55 }
 0x339   : > { %v2341_v53 = vsel %vm2277_vm14, %v2309_v8, %v2245_v31  ;;  %v2054_v26 = vmul.f32 %v3611_v59, %v2022_v52 }
 0x33a   : > { %v2373_v39 = vadd.f32 1.0, %v2341_v53 }
 0x33b   : > { %v2214_v27 = vmul.f32 %v3615_v1, %v2054_v26 }
 0x33c   : > { %v2405_v62 = vmul.f32 %v2373_v39, %v1573_v6 }
 0x33d   : > { %v2246_v2 = vsub.f32 1.0, %v2214_v27 }
 0x33e   : > { %3358 = vmatprep.mubr.f32.mxu1 %v2405_v62 }
 0x33f   : > { %v2310_v58 = vsub.f32 0.0, %v2246_v2 }
 0x341   : > { %v2342_v44 = vsel %vm2278_vm15, %v2310_v58, %v2246_v2 }
 0x342   : > { %v5737_v15 = vpop.f32.mrf.mxu1  ;;  %v2374_v63 = vadd.f32 1.0, %v2342_v44 }
 0x344   : > { %v5739_v20 = vpop.f32.mrf.mxu1  ;;  %v2406_v19 = vmul.f32 %v2374_v63, %v1574_v57 }
 0x346   : > { %3359 = vmatmul.mubr.f32.gmra.mxu1 %v2406_v19 }
 0x35a   : > { %v5741_v16 = vpop.f32.mrf.mxu1 }
 0x35c   : > { %v5743_v13 = vpop.f32.mrf.mxu1 }
 0x36d   : > { %v5745_v14 = vpop.f32.mrf.mxu1 }
 0x36f   : > { %v5747_v60 = vpop.f32.mrf.mxu1 }
 0x387   : > { %v5749_v18 = vpop.f32.mrf.mxu1 }
 0x389   : > { %v5751_v49 = vpop.f32.mrf.mxu1 }
 0x399   : > { %v5753_v22 = vpop.f32.mrf.mxu1 }
 0x39b   : > { %v5755_v38 = vpop.f32.mrf.mxu1 }
 0x3b1   : > { %v5757_v4 = vpop.f32.mrf.mxu1 }
 0x3b3   : > { %v5759_v28 = vpop.f32.mrf.mxu1 }
 0x3c8   : > { %v5761_v32 = vpop.f32.mrf.mxu1 }
 0x3ca   : > { %v5763_v42 = vpop.f32.mrf.mxu1 }
 0x3dd   : > { %v5765_v41 = vpop.f32.mrf.mxu1 }
 0x3df   : > { %v5767_v59 = vpop.f32.mrf.mxu1 }
 0x3f3   : > { %v5769_v37 = vpop.f32.mrf.mxu1 }
 0x3f5   : > { %v5771_v61 = vpop.f32.mrf.mxu1 }
 0x404   : > { %2650 = sbr.rel (%p3091_p8) target bundleno = 1050 (0x41a), region = 72 }
 0x406   : > { %v5773_v51 = vpop.f32.mrf.mxu1 }
 0x408   : > { %v5775_v12 = vpop.f32.mrf.mxu1 }
 0x409   : > { %v3094_v46 = vld [vmem:[%s6035_s23] ss:$0 sm:$0xff] }
 0x40a   : > { %2658 = vst [vmem:[#allocation3 + $0xb0] sm:$0xff] %v3094_v46  ;;  %2659 = vst [vmem:[#allocation3] sm:$0xff] %v3094_v46 }
 0x40b   : > { %2660 = vst [vmem:[#allocation3 + $0xd8] sm:$0xff] %v3094_v46  ;;  %2661 = vst [vmem:[#allocation3 + $0x18] sm:$0xff] %v3094_v46 }
 0x40c   : > { %2662 = vst [vmem:[#allocation3 + $0x50] sm:$0xff] %v3094_v46  ;;  %2663 = vst [vmem:[#allocation3 + $0x68] sm:$0xff] %v3094_v46 }
 0x40d   : > { %2664 = vst [vmem:[#allocation3 + $0x30] sm:$0xff] %v3094_v46  ;;  %2665 = vst [vmem:[#allocation3 + $0x48] sm:$0xff] %v3094_v46 }
 0x40e   : > { %2666 = vst [vmem:[#allocation3 + $0x80] sm:$0xff] %v3094_v46  ;;  %2667 = vst [vmem:[#allocation3 + $0x88] sm:$0xff] %v3094_v46 }
 0x40f   : > { %2668 = vst [vmem:[#allocation3 + $0xe8] sm:$0xff] %v3094_v46  ;;  %2669 = vst [vmem:[#allocation3 + $0xb8] sm:$0xff] %v3094_v46 }
 0x410   : > { %2670 = vst [vmem:[#allocation3 + $0x60] sm:$0xff] %v3094_v46  ;;  %2671 = vst [vmem:[#allocation3 + $0xf0] sm:$0xff] %v3094_v46 }
 0x411   : > { %2672 = vst [vmem:[#allocation3 + $0x8] sm:$0xff] %v3094_v46  ;;  %2673 = vst [vmem:[#allocation3 + $0x78] sm:$0xff] %v3094_v46 }
 0x412   : > { %2674 = vst [vmem:[#allocation3 + $0x38] sm:$0xff] %v3094_v46  ;;  %2675 = vst [vmem:[#allocation3 + $0x58] sm:$0xff] %v3094_v46 }
 0x413   : > { %2676 = vst [vmem:[#allocation3 + $0x40] sm:$0xff] %v3094_v46  ;;  %2677 = vst [vmem:[#allocation3 + $0xc8] sm:$0xff] %v3094_v46 }
 0x414   : > { %2678 = vst [vmem:[#allocation3 + $0xe0] sm:$0xff] %v3094_v46  ;;  %2679 = vst [vmem:[#allocation3 + $0x90] sm:$0xff] %v3094_v46 }
 0x415   : > { %2680 = vst [vmem:[#allocation3 + $0x70] sm:$0xff] %v3094_v46  ;;  %2681 = vst [vmem:[#allocation3 + $0xc0] sm:$0xff] %v3094_v46 }
 0x416   : > { %2682 = vst [vmem:[#allocation3 + $0xa8] sm:$0xff] %v3094_v46  ;;  %2683 = vst [vmem:[#allocation3 + $0xd0] sm:$0xff] %v3094_v46 }
 0x417   : > { %2684 = vst [vmem:[#allocation3 + $0x10] sm:$0xff] %v3094_v46  ;;  %2685 = vst [vmem:[#allocation3 + $0x28] sm:$0xff] %v3094_v46 }
 0x418   : > { %2686 = vst [vmem:[#allocation3 + $0xa0] sm:$0xff] %v3094_v46  ;;  %2687 = vst [vmem:[#allocation3 + $0xf8] sm:$0xff] %v3094_v46 }
 0x419   : > { %2688 = vst [vmem:[#allocation3 + $0x20] sm:$0xff] %v3094_v46  ;;  %2689 = vst [vmem:[#allocation3 + $0x98] sm:$0xff] %v3094_v46 }
 0x41a PF: > { %p3095_p1 = scmp.ge.s32.totalorder %s3865_s30, 1 }
 0x41c   : > { %2693 = sbr.rel (%p3095_p1) target bundleno = 1076 (0x434), region = 76 }
 0x421   : > { %v2694_v5 = vld [vmem:[#allocation3 + $0xb0] sm:$0xff]  ;;  %v2695_v33 = vld [vmem:[#allocation3] sm:$0xff]  ;;  %v2696_v35 = vld [vmem:[#allocation3 + $0xd8] sm:$0xff] }
 0x422   : > { %v2726_v43 = vadd.f32 %v2694_v5, %v5493_v56  ;;  %v2727_v48 = vadd.f32 %v5484_v34, %v2695_v33  ;;  %v2728_v25 = vadd.f32 %v2696_v35, %v5519_v0  ;;  %v2697_v23 = vld [vmem:[#allocation3 + $0x18] sm:$0xff]  ;;  %v2698_v30 = vld [vmem:[#allocation3 + $0x50] sm:$0xff]  ;;  %v2699_v10 = vld [vmem:[#allocation3 + $0x68] sm:$0xff] }
 0x423   : > { %v2729_v9 = vadd.f32 %v5507_v7, %v2697_v23  ;;  %v2730_v50 = vadd.f32 %v2698_v30, %v5576_v47  ;;  %v6036_v29 = vld [vmem:[#allocation31_spill] sm:$0xff]  ;;  %v2701_v40 = vld [vmem:[#allocation3 + $0x48] sm:$0xff]  ;;  %v2702_v31 = vld [vmem:[#allocation3 + $0x80] sm:$0xff] }
 0x424   : > { %v2731_v54 = vadd.f32 %v6036_v29, %v2699_v10  ;;  %v2700_v17 = vld [vmem:[#allocation3 + $0x30] sm:$0xff]  ;;  %2758 = vst [vmem:[#allocation3 + $0xb0] sm:$0xff] %v2726_v43  ;;  %2759 = vst [vmem:[#allocation3] sm:$0xff] %v2727_v48  ;;  %v2733_v8 = vadd.f32 %v5660_v21, %v2701_v40  ;;  %v2734_v6 = vadd.f32 %v2702_v31, %v5724_v36  ;;  %v2703_v52 = vld [vmem:[#allocation3 + $0x88] sm:$0xff] }
 0x425   : > { %2760 = vst [vmem:[#allocation3 + $0xd8] sm:$0xff] %v2728_v25  ;;  %v2732_v55 = vadd.f32 %v2700_v17, %v5669_v11  ;;  %v2704_v1 = vld [vmem:[#allocation3 + $0xe8] sm:$0xff]  ;;  %v2705_v53 = vld [vmem:[#allocation3 + $0xb8] sm:$0xff]  ;;  %2761 = vst [vmem:[#allocation3 + $0x18] sm:$0xff] %v2729_v9  ;;  %v2735_v39 = vadd.f32 %v5721_v24, %v2703_v52 }
 0x426   : > { %2762 = vst [vmem:[#allocation3 + $0x50] sm:$0xff] %v2730_v50  ;;  %2763 = vst [vmem:[#allocation3 + $0x68] sm:$0xff] %v2731_v54  ;;  %v2736_v26 = vadd.f32 %v2704_v1, %v5730_v3  ;;  %v2737_v62 = vadd.f32 %v5727_v45, %v2705_v53  ;;  %v2706_v27 = vld [vmem:[#allocation3 + $0x60] sm:$0xff]  ;;  %v2707_v2 = vld [vmem:[#allocation3 + $0xf0] sm:$0xff] }
 0x427   : > { %v2708_v58 = vld [vmem:[#allocation3 + $0x8] sm:$0xff]  ;;  %2764 = vst [vmem:[#allocation3 + $0x30] sm:$0xff] %v2732_v55  ;;  %2765 = vst [vmem:[#allocation3 + $0x48] sm:$0xff] %v2733_v8  ;;  %v2738_v57 = vadd.f32 %v2706_v27, %v5739_v20  ;;  %v2739_v44 = vadd.f32 %v5737_v15, %v2707_v2  ;;  %v2709_v19 = vld [vmem:[#allocation3 + $0x78] sm:$0xff] }
 0x428   : > { %2766 = vst [vmem:[#allocation3 + $0x80] sm:$0xff] %v2734_v6  ;;  %v2740_v63 = vadd.f32 %v2708_v58, %v5743_v13  ;;  %v2710_v46 = vld [vmem:[#allocation3 + $0x38] sm:$0xff]  ;;  %2767 = vst [vmem:[#allocation3 + $0x88] sm:$0xff] %v2735_v39  ;;  %v2741_v33 = vadd.f32 %v5741_v16, %v2709_v19  ;;  %v2712_v48 = vld [vmem:[#allocation3 + $0x40] sm:$0xff] }
 0x429   : > { %v2711_v5 = vld [vmem:[#allocation3 + $0x58] sm:$0xff]  ;;  %2768 = vst [vmem:[#allocation3 + $0xe8] sm:$0xff] %v2736_v26  ;;  %2769 = vst [vmem:[#allocation3 + $0xb8] sm:$0xff] %v2737_v62  ;;  %v2742_v35 = vadd.f32 %v2710_v46, %v5747_v60  ;;  %v2713_v25 = vld [vmem:[#allocation3 + $0xc8] sm:$0xff]  ;;  %v2744_v30 = vadd.f32 %v2712_v48, %v5751_v49 }
 0x42a   : > { %v2743_v43 = vadd.f32 %v5745_v14, %v2711_v5  ;;  %v2714_v23 = vld [vmem:[#allocation3 + $0xe0] sm:$0xff]  ;;  %2770 = vst [vmem:[#allocation3 + $0x60] sm:$0xff] %v2738_v57  ;;  %2771 = vst [vmem:[#allocation3 + $0xf0] sm:$0xff] %v2739_v44  ;;  %v2745_v10 = vadd.f32 %v5749_v18, %v2713_v25  ;;  %v2715_v50 = vld [vmem:[#allocation3 + $0x90] sm:$0xff] }
 0x42b   : > { %2772 = vst [vmem:[#allocation3 + $0x8] sm:$0xff] %v2740_v63  ;;  %v2746_v9 = vadd.f32 %v2714_v23, %v5755_v38  ;;  %v2716_v29 = vld [vmem:[#allocation3 + $0x70] sm:$0xff]  ;;  %v2717_v54 = vld [vmem:[#allocation3 + $0xc0] sm:$0xff]  ;;  %2773 = vst [vmem:[#allocation3 + $0x78] sm:$0xff] %v2741_v33  ;;  %v2747_v17 = vadd.f32 %v5753_v22, %v2715_v50 }
 0x42c   : > { %2774 = vst [vmem:[#allocation3 + $0x38] sm:$0xff] %v2742_v35  ;;  %2775 = vst [vmem:[#allocation3 + $0x58] sm:$0xff] %v2743_v43  ;;  %v2748_v40 = vadd.f32 %v2716_v29, %v5759_v28  ;;  %v2749_v31 = vadd.f32 %v5757_v4, %v2717_v54  ;;  %v2718_v55 = vld [vmem:[#allocation3 + $0xa8] sm:$0xff]  ;;  %v2719_v8 = vld [vmem:[#allocation3 + $0xd0] sm:$0xff] }
 0x42d   : > { %v2720_v6 = vld [vmem:[#allocation3 + $0x10] sm:$0xff]  ;;  %2776 = vst [vmem:[#allocation3 + $0x40] sm:$0xff] %v2744_v30  ;;  %2777 = vst [vmem:[#allocation3 + $0xc8] sm:$0xff] %v2745_v10  ;;  %v2750_v52 = vadd.f32 %v2718_v55, %v5763_v42  ;;  %v2751_v1 = vadd.f32 %v5761_v32, %v2719_v8  ;;  %v2721_v39 = vld [vmem:[#allocation3 + $0x28] sm:$0xff] }
 0x42e   : > { %2778 = vst [vmem:[#allocation3 + $0xe0] sm:$0xff] %v2746_v9  ;;  %v2752_v53 = vadd.f32 %v2720_v6, %v5767_v59  ;;  %v2722_v26 = vld [vmem:[#allocation3 + $0xa0] sm:$0xff]  ;;  %v2723_v62 = vld [vmem:[#allocation3 + $0xf8] sm:$0xff]  ;;  %2779 = vst [vmem:[#allocation3 + $0x90] sm:$0xff] %v2747_v17  ;;  %v2753_v27 = vadd.f32 %v5765_v41, %v2721_v39 }
 0x42f   : > { %2780 = vst [vmem:[#allocation3 + $0x70] sm:$0xff] %v2748_v40  ;;  %2781 = vst [vmem:[#allocation3 + $0xc0] sm:$0xff] %v2749_v31  ;;  %v2754_v2 = vadd.f32 %v2722_v26, %v5771_v61  ;;  %v2755_v58 = vadd.f32 %v5769_v37, %v2723_v62  ;;  %v2724_v57 = vld [vmem:[#allocation3 + $0x20] sm:$0xff]  ;;  %v2725_v44 = vld [vmem:[#allocation3 + $0x98] sm:$0xff] }
 0x430   : > { %2782 = vst [vmem:[#allocation3 + $0xa8] sm:$0xff] %v2750_v52  ;;  %2783 = vst [vmem:[#allocation3 + $0xd0] sm:$0xff] %v2751_v1  ;;  %v2756_v63 = vadd.f32 %v2724_v57, %v5775_v12  ;;  %v2757_v19 = vadd.f32 %v5773_v51, %v2725_v44 }
 0x431   : > { %2784 = vst [vmem:[#allocation3 + $0x10] sm:$0xff] %v2752_v53  ;;  %2785 = vst [vmem:[#allocation3 + $0x28] sm:$0xff] %v2753_v27 }
 0x432   : > { %2786 = vst [vmem:[#allocation3 + $0xa0] sm:$0xff] %v2754_v2  ;;  %2787 = vst [vmem:[#allocation3 + $0xf8] sm:$0xff] %v2755_v58 }
 0x433   : > { %2788 = vst [vmem:[#allocation3 + $0x20] sm:$0xff] %v2756_v63  ;;  %2789 = vst [vmem:[#allocation3 + $0x98] sm:$0xff] %v2757_v19 }
 0x434 PF: > { %p3096_p0 = scmp.ne.s32.totalorder %s3865_s30, 1 }
 0x436   : > { %2793 = sbr.rel (%p3096_p0) target bundleno = 1102 (0x44e), region = 80 }
 0x43b   : > { %v2794_v46 = vld [vmem:[#allocation3 + $0xb0] sm:$0xff]  ;;  %v2795_v5 = vld [vmem:[#allocation3] sm:$0xff]  ;;  %v2796_v33 = vld [vmem:[#allocation3 + $0xd8] sm:$0xff] }
 0x43c   : > { %v2826_v35 = vadd.f32 %v2794_v46, %v5493_v56  ;;  %v2827_v43 = vadd.f32 %v5484_v34, %v2795_v5  ;;  %v2828_v48 = vadd.f32 %v2796_v33, %v5519_v0  ;;  %v2797_v25 = vld [vmem:[#allocation3 + $0x18] sm:$0xff]  ;;  %v2798_v23 = vld [vmem:[#allocation3 + $0x50] sm:$0xff]  ;;  %v2799_v30 = vld [vmem:[#allocation3 + $0x68] sm:$0xff] }
 0x43d   : > { %v2829_v10 = vadd.f32 %v5507_v7, %v2797_v25  ;;  %v2830_v9 = vadd.f32 %v2798_v23, %v5576_v47  ;;  %v6037_v50 = vld [vmem:[#allocation31_spill] sm:$0xff]  ;;  %v2801_v17 = vld [vmem:[#allocation3 + $0x48] sm:$0xff]  ;;  %v2802_v40 = vld [vmem:[#allocation3 + $0x80] sm:$0xff] }
 0x43e   : > { %v2831_v29 = vadd.f32 %v6037_v50, %v2799_v30  ;;  %v2800_v54 = vld [vmem:[#allocation3 + $0x30] sm:$0xff]  ;;  %2858 = vst [vmem:[%s4347_s2] sm:$0xff] %v2826_v35  ;;  %2859 = vst [vmem:[%s4347_s2 + $0x8] sm:$0xff] %v2827_v43  ;;  %v2833_v56 = vadd.f32 %v5660_v21, %v2801_v17  ;;  %v2834_v7 = vadd.f32 %v2802_v40, %v5724_v36  ;;  %v2803_v0 = vld [vmem:[#allocation3 + $0x88] sm:$0xff] }
 0x43f   : > { %2860 = vst [vmem:[%s4347_s2 + $0x10] sm:$0xff] %v2828_v48  ;;  %v2832_v34 = vadd.f32 %v2800_v54, %v5669_v11  ;;  %v2804_v47 = vld [vmem:[#allocation3 + $0xe8] sm:$0xff]  ;;  %v2805_v31 = vld [vmem:[#allocation3 + $0xb8] sm:$0xff]  ;;  %2861 = vst [vmem:[%s4347_s2 + $0x18] sm:$0xff] %v2829_v10  ;;  %v2835_v55 = vadd.f32 %v5721_v24, %v2803_v0 }
 0x440   : > { %2862 = vst [vmem:[%s4347_s2 + $0x20] sm:$0xff] %v2830_v9  ;;  %2863 = vst [vmem:[%s4347_s2 + $0x28] sm:$0xff] %v2831_v29  ;;  %v2836_v8 = vadd.f32 %v2804_v47, %v5730_v3  ;;  %v2837_v11 = vadd.f32 %v5727_v45, %v2805_v31  ;;  %v2806_v6 = vld [vmem:[#allocation3 + $0x60] sm:$0xff]  ;;  %v2807_v21 = vld [vmem:[#allocation3 + $0xf0] sm:$0xff] }
 0x441   : > { %v2808_v52 = vld [vmem:[#allocation3 + $0x8] sm:$0xff]  ;;  %2864 = vst [vmem:[%s4347_s2 + $0x30] sm:$0xff] %v2832_v34  ;;  %2865 = vst [vmem:[%s4347_s2 + $0x38] sm:$0xff] %v2833_v56  ;;  %v2838_v36 = vadd.f32 %v2806_v6, %v5739_v20  ;;  %v2839_v1 = vadd.f32 %v5737_v15, %v2807_v21  ;;  %v2809_v53 = vld [vmem:[#allocation3 + $0x78] sm:$0xff] }
 0x442   : > { %2866 = vst [vmem:[%s4347_s2 + $0x40] sm:$0xff] %v2834_v7  ;;  %v2840_v24 = vadd.f32 %v2808_v52, %v5743_v13  ;;  %v2810_v3 = vld [vmem:[#allocation3 + $0x38] sm:$0xff]  ;;  %2867 = vst [vmem:[%s4347_s2 + $0x48] sm:$0xff] %v2835_v55  ;;  %v2841_v45 = vadd.f32 %v5741_v16, %v2809_v53  ;;  %v2812_v62 = vld [vmem:[#allocation3 + $0x40] sm:$0xff] }
 0x443   : > { %v2811_v39 = vld [vmem:[#allocation3 + $0x58] sm:$0xff]  ;;  %2868 = vst [vmem:[%s4347_s2 + $0x50] sm:$0xff] %v2836_v8  ;;  %2869 = vst [vmem:[%s4347_s2 + $0x58] sm:$0xff] %v2837_v11  ;;  %v2842_v26 = vadd.f32 %v2810_v3, %v5747_v60  ;;  %v2813_v15 = vld [vmem:[#allocation3 + $0xc8] sm:$0xff]  ;;  %v2844_v13 = vadd.f32 %v2812_v62, %v5751_v49 }
 0x444   : > { %v2843_v20 = vadd.f32 %v5745_v14, %v2811_v39  ;;  %v2814_v27 = vld [vmem:[#allocation3 + $0xe0] sm:$0xff]  ;;  %2870 = vst [vmem:[%s4347_s2 + $0x60] sm:$0xff] %v2838_v36  ;;  %2871 = vst [vmem:[%s4347_s2 + $0x68] sm:$0xff] %v2839_v1  ;;  %v2845_v2 = vadd.f32 %v5749_v18, %v2813_v15  ;;  %v2815_v58 = vld [vmem:[#allocation3 + $0x90] sm:$0xff] }
 0x445   : > { %2872 = vst [vmem:[%s4347_s2 + $0x70] sm:$0xff] %v2840_v24  ;;  %v2846_v16 = vadd.f32 %v2814_v27, %v5755_v38  ;;  %v2816_v60 = vld [vmem:[#allocation3 + $0x70] sm:$0xff]  ;;  %v2817_v57 = vld [vmem:[#allocation3 + $0xc0] sm:$0xff]  ;;  %2873 = vst [vmem:[%s4347_s2 + $0x78] sm:$0xff] %v2841_v45  ;;  %v2847_v14 = vadd.f32 %v5753_v22, %v2815_v58 }
 0x446   : > { %2874 = vst [vmem:[%s4347_s2 + $0x80] sm:$0xff] %v2842_v26  ;;  %2875 = vst [vmem:[%s4347_s2 + $0x88] sm:$0xff] %v2843_v20  ;;  %v2848_v44 = vadd.f32 %v2816_v60, %v5759_v28  ;;  %v2849_v49 = vadd.f32 %v5757_v4, %v2817_v57  ;;  %v2818_v63 = vld [vmem:[#allocation3 + $0xa8] sm:$0xff]  ;;  %v2819_v18 = vld [vmem:[#allocation3 + $0xd0] sm:$0xff] }
 0x447   : > { %v2820_v19 = vld [vmem:[#allocation3 + $0x10] sm:$0xff]  ;;  %2876 = vst [vmem:[%s4347_s2 + $0x90] sm:$0xff] %v2844_v13  ;;  %2877 = vst [vmem:[%s4347_s2 + $0x98] sm:$0xff] %v2845_v2  ;;  %v2850_v38 = vadd.f32 %v2818_v63, %v5763_v42  ;;  %v2851_v46 = vadd.f32 %v5761_v32, %v2819_v18  ;;  %v2821_v5 = vld [vmem:[#allocation3 + $0x28] sm:$0xff] }
 0x448   : > { %2878 = vst [vmem:[%s4347_s2 + $0xa0] sm:$0xff] %v2846_v16  ;;  %v2852_v22 = vadd.f32 %v2820_v19, %v5767_v59  ;;  %v2822_v28 = vld [vmem:[#allocation3 + $0xa0] sm:$0xff]  ;;  %v2823_v4 = vld [vmem:[#allocation3 + $0xf8] sm:$0xff]  ;;  %2879 = vst [vmem:[%s4347_s2 + $0xa8] sm:$0xff] %v2847_v14  ;;  %v2853_v33 = vadd.f32 %v5765_v41, %v2821_v5 }
 0x449   : > { %2880 = vst [vmem:[%s4347_s2 + $0xb0] sm:$0xff] %v2848_v44  ;;  %2881 = vst [vmem:[%s4347_s2 + $0xb8] sm:$0xff] %v2849_v49  ;;  %v2854_v42 = vadd.f32 %v2822_v28, %v5771_v61  ;;  %v2855_v35 = vadd.f32 %v5769_v37, %v2823_v4  ;;  %v2824_v32 = vld [vmem:[#allocation3 + $0x20] sm:$0xff]  ;;  %v2825_v43 = vld [vmem:[#allocation3 + $0x98] sm:$0xff] }
 0x44a   : > { %2882 = vst [vmem:[%s4347_s2 + $0xc0] sm:$0xff] %v2850_v38  ;;  %2883 = vst [vmem:[%s4347_s2 + $0xc8] sm:$0xff] %v2851_v46  ;;  %v2856_v59 = vadd.f32 %v2824_v32, %v5775_v12  ;;  %v2857_v48 = vadd.f32 %v5773_v51, %v2825_v43 }
 0x44b   : > { %2884 = vst [vmem:[%s4347_s2 + $0xd0] sm:$0xff] %v2852_v22  ;;  %2885 = vst [vmem:[%s4347_s2 + $0xd8] sm:$0xff] %v2853_v33 }
 0x44c   : > { %2886 = vst [vmem:[%s4347_s2 + $0xe0] sm:$0xff] %v2854_v42  ;;  %2887 = vst [vmem:[%s4347_s2 + $0xe8] sm:$0xff] %v2855_v35 }
 0x44d   : > { %2888 = vst [vmem:[%s4347_s2 + $0xf0] sm:$0xff] %v2856_v59  ;;  %2889 = vst [vmem:[%s4347_s2 + $0xf8] sm:$0xff] %v2857_v48 }
 0x44e PF: > { %s6038_s30 = sld [smem:[#allocation20_spill]]  ;;  %s2904_s15 = sshll.u32 %s4347_s2, 4  ;;  %s5887_s15 = int_to_ptr.vmem [resolvable:$true] %s2904_s15 }
 0x44f   : > { %s6039_s20 = sld [smem:[#allocation26_spill]]  ;;  %s2891_s12 = scalar_lea.sflag [#allocation6], %s4157_s14 }
 0x450   : > { %s6040_s29 = sld [smem:[#allocation40_spill]]  ;;  %s3753_s13 = scalar_lea.vmem %s5887_s15, 4096 }
 0x451   : > { %p3754_p6 = scmp.ne.s32.totalorder %s5887_s15, %s3753_s13  ;;  %s3893_s17 = smov [#allocation12]  }
 0x452   : > { %s3757_s8 = sshll.u32 %s3893_s17, 4  ;;  %s3758_s8 = int_to_ptr.vmem [resolvable:$false] %s3757_s8 }
 0x453   : > { %s3759_s7 = scalar_lea.vmem %s3758_s8, 8192  ;;  %p3760_p2 = scmp.lt.s32.totalorder %s5887_s15, %s3758_s8 }
 0x454   : > { %s3104_s22 = sshll.u32 %s6038_s30, 12  ;;  %p3761_p3 = scmp.lt.s32.totalorder %s3759_s7, %s3753_s13 }
 0x455   : > { %p6042_p9 = scmp.ne.s32.totalorder %s6039_s20, 0 }
 0x456   : > { %s6041_s19 = smov %s6040_s29  ;;  %s5884_s4 = scalar_lea.hbm %s6040_s29, %s3104_s22 }
 0x457   : > { %p3755_p13 = pnand %p3754_p6, %p6042_p9  ;;  %p3762_p10 = por %p3761_p3, %p3760_p2 }
 0x459   : > { %p3756_p7 = pneg %p3755_p13 }
 0x45b   : > { %p3763_p11 = pnand %p3762_p10, %p3756_p7 }
 0x45d   : > { %3766 = shalt.err (!%p3763_p11)
}
 0x45e   : > { %s3767_s26 = scalar_lea.hbm %s5884_s4, 4096  ;;  %s3771_s24 = scalar_lea.hbm %s6041_s19, 8192 }
 0x45f   : > { %p3768_p4 = scmp.ne.s32.totalorder %s5884_s4, %s3767_s26  ;;  %p3772_p8 = scmp.lt.s32.totalorder %s5884_s4, %s6041_s19 }
 0x460   : > { %p3773_p1 = scmp.lt.s32.totalorder %s3771_s24, %s3767_s26 }
 0x461   : > { %p3769_p12 = pnand %p3768_p4, %p6042_p9 }
 0x462   : > { %p3774_p0 = por %p3773_p1, %p3772_p8 }
 0x463   : > { %p3770_p5 = pneg %p3769_p12 }
 0x465   : > { %p3775_p6 = pnand %p3774_p0, %p3770_p5 }
 0x467   : > { %3778 = shalt.err (!%p3775_p6)
}
 0x468   : > { %s3894_s2 = smov 128   ;;  %s3895_s10 = smov 8  }
 0x469   : > { %3371 = dma.vmem_to_hbm [thread:$0]  (%p6042_p9), %s5887_s15, 4096, %s5884_s4, %s2891_s12, %s3894_s2, %s3894_s2, %s3895_s10  }
 0x46a PF: > { %s6043_s0 = sld [smem:[#allocation18_spill]]  ;;  %p3391_p13 = scmp.ge.s32.totalorder %s3881_s11, 2 }
 0x46b   : > { %s6044_s23 = sld [smem:[#allocation27_spill]] }
 0x470   : > { %s2919_s30 = sand.u32 1, %s6043_s0  }
 0x471   : > { %p6045_p7 = scmp.ne.s32.totalorder %s6044_s23, 0  ;;  %s2920_s22 = scalar_lea.sflag [#allocation6], %s2919_s30 }
 0x473   : > { %p3387_p2 = pnand %p3391_p13, %p6045_p7 }
 0x475   : > { %p3388_p3 = pneg %p3387_p2 }
 0x477   : > { %3836 = dma.done.wait (%p3388_p3), %s2920_s22, 4096  }
 0x478   : > { %3838 = vsyncadd (%p3388_p3), %s2920_s22, 4294963200  ;;  %s29_s11 = sadd.s32 1, %s3881_s11   ;;  %s6046_s16 = sld [smem:[#allocation17_spill]] }
 0x479   : > { %p26_p10 = scmp.ge.s32.totalorder %s29_s11, 6   ;;  %s6047_s26 = sld [smem:[#allocation24_spill]] }
 0x47a   : > { %s6048_s14 = sld [smem:[#allocation19_spill]]  ;;  %s6053_s24 = smov %s3845_s25 }
 0x47b   : > { %s6049_s29 = sld [smem:[#allocation25_spill]]  ;;  %s6055_s27 = smov %s3857_s28 }
 0x47c   : > { %s6050_s8 = sld [smem:[#allocation21_spill]]  ;;  %s6057_s30 = smov %s3873_s9 }
 0x47d   : > { %s6051_s20 = sld [smem:[#allocation22_spill]] }
 0x47e   : > { %s6052_s10 = sld [smem:[#allocation23_spill]]  ;;  %s6054_s25 = smov %s6046_s16 }
 0x47f   :  { %28 = sbr.rel (!%p26_p10) target bundleno = 20 (0x14), region = 154 }
 0x480   : > { %s6056_s28 = smov %s6048_s14 }
 0x483   : > { %s6058_s9 = smov %s6051_s20 }
 0x484   :  { %2925 = vsyncpa [#allocation5], 1 }
 0x485   :  { %2927 = vsyncpa [#allocation5 + $0x1], 1 }
 0x486   :  { %2928 = vsyncpa [#allocation8], 1 }
 0x487   :  { %2930 = vsyncpa [#allocation8 + $0x1], 1 }
 0x488   :  { %2931 = vsyncpa [#allocation11], 1 }
 0x489   :  { %2933 = vsyncpa [#allocation11 + $0x1], 1 }
 0x48a   :  { %2934 = vsyncpa [#allocation6], 1 }
 0x48b   :  { %2936 = vsyncpa [#allocation6 + $0x1], 1 }

</bundles_post_ra>
